<compile_context>
chip_gen: v6e
topology: v6e:2x2x1
jax: 0.10.0
libtpu: 0.0.40
codegen_flags: <defaults>
</compile_context>

<pallas_src>
import jax
import jax.numpy as jnp
from jax.experimental import pallas as pl
from jax.experimental.pallas import tpu as pltpu

HIDDEN = 128  # ConvLSTM hidden channels (fixed by the module definition)
_VMEM_LIMIT = 48 * 1024 * 1024  # explicit budget (v7x physical VMEM is 64 MiB)


def _round_up(x, m):
    return ((x + m - 1) // m) * m


# -----------------------------------------------------------------------------
# Tiled matmul + bias Pallas kernel (every conv is expressed as im2col + this)
#   - grid over M rows, marked "parallel" (megacore sharding on v7x)
#   - bf16 operands on the MXU, f32 accumulation, f32 bias add
#   - N is padded to a multiple of 128 by the wrapper => lane-dense output stores
# -----------------------------------------------------------------------------
def _matmul_bias_kernel(a_ref, w_ref, b_ref, o_ref):
    acc = jnp.dot(a_ref[...], w_ref[...], preferred_element_type=jnp.float32)
    o_ref[...] = (acc + b_ref[...]).astype(o_ref.dtype)


def matmul_bias(a, w, b, out_dtype=jnp.float32, tm=256):
    """a: (M, K) @ w: (K, N) + b: (N,), computed with bf16 MXU operands."""
    m, k = a.shape
    n = w.shape[1]
    n_pad = _round_up(n, 128)                       # lane-dense output
    tm = min(tm, _round_up(max(m, 8), 8))           # tile never larger than needed
    m_pad = _round_up(m, tm)

    a_p = jnp.pad(a, ((0, m_pad - m), (0, 0))).astype(jnp.bfloat16)
    w_p = jnp.pad(w, ((0, 0), (0, n_pad - n))).astype(jnp.bfloat16)
    b_p = jnp.pad(b, (0, n_pad - n)).reshape(1, n_pad).astype(jnp.float32)

    out = pl.pallas_call(
        _matmul_bias_kernel,
        out_shape=jax.ShapeDtypeStruct((m_pad, n_pad), out_dtype),
        grid_spec=pltpu.PrefetchScalarGridSpec(
            num_scalar_prefetch=0,
            grid=(m_pad // tm,),
            in_specs=[
                pl.BlockSpec((tm, k), lambda i: (i, 0)),       # A tile (streams)
                pl.BlockSpec((k, n_pad), lambda i: (0, 0)),    # W (resident)
                pl.BlockSpec((1, n_pad), lambda i: (0, 0)),    # bias (resident)
            ],
            out_specs=pl.BlockSpec((tm, n_pad), lambda i: (i, 0)),
        ),
        compiler_params=pltpu.CompilerParams(
            dimension_semantics=("parallel",),
            vmem_limit_bytes=_VMEM_LIMIT,
        ),
    )(a_p, w_p, b_p)
    return out[:m, :n]


def _im2col(x, kh, kw, sh, sw, ph, pw):
    # x: (N, H, W, C) -> (N, Ho, Wo, kh*kw*C); K index order is (ki, kj, c)
    n, h, w, c = x.shape
    xp = jnp.pad(x, ((0, 0), (ph, ph), (pw, pw), (0, 0)))
    ho = (h + 2 * ph - kh) // sh + 1
    wo = (w + 2 * pw - kw) // sw + 1
    cols = []
    for ki in range(kh):
        for kj in range(kw):
            cols.append(
                jax.lax.slice(
                    xp,
                    (0, ki, kj, 0),
                    (n, ki + sh * (ho - 1) + 1, kj + sw * (wo - 1) + 1, c),
                    (1, sh, sw, 1),
                )
            )
    return jnp.concatenate(cols, axis=-1), ho, wo


def conv2d_nhwc(x, w_oihw, b, stride, pad, out_dtype=jnp.float32):
    """Conv2d: im2col (JAX glue) + tiled Pallas matmul kernel (MXU hot path)."""
    cout, cin, kh, kw = w_oihw.shape
    patches, ho, wo = _im2col(x, kh, kw, stride[0], stride[1], pad[0], pad[1])
    w_mat = jnp.transpose(w_oihw, (2, 3, 1, 0)).reshape(kh * kw * cin, cout)
    n = x.shape[0]
    out = matmul_bias(patches.reshape(n * ho * wo, kh * kw * cin), w_mat, b,
                      out_dtype=out_dtype)
    return out.reshape(n, ho, wo, cout)


# -----------------------------------------------------------------------------
# ConvLSTM recurrence kernel: grid over time, state carried in VMEM scratch.
#   hpad_s : (B, H+2, W+2, 128) f32  -- the hidden state lives in the interior;
#                                       the zero border is the 'same' conv padding.
#   c_s    : (B, H, W, 128) f32      -- cell state.
#   hcols_s: (B*H*W, 9*128) bf16     -- per-step shifted-hidden im2col, one K=1152
#                                       MXU matmul against Wh (1152, 512).
# -----------------------------------------------------------------------------
def _convlstm_kernel(gx_ref, nd_ref, wh_ref, h0_ref, c0_ref,
                     o_ref, ht_ref, ct_ref,
                     hpad_s, c_s, hcols_s):
    t = pl.program_id(0)
    b_dim, hp2, wp2, ch = hpad_s.shape
    h_dim, w_dim = hp2 - 2, wp2 - 2
    m = b_dim * h_dim * w_dim

    @pl.when(t == 0)
    def _():
        hpad_s[...] = jnp.zeros_like(hpad_s)            # border stays zero forever
        hpad_s[:, 1:h_dim + 1, 1:w_dim + 1, :] = h0_ref[...]
        c_s[...] = c0_ref[...]

    # episode reset: one broadcast multiply per state tensor (no per-batch loop)
    nd = nd_ref[0].reshape(b_dim, 1, 1, 1)              # (B,1,1,1) in {0,1}
    hpad_s[:, 1:h_dim + 1, 1:w_dim + 1, :] = (
        hpad_s[:, 1:h_dim + 1, 1:w_dim + 1, :] * nd)
    c_s[...] = c_s[...] * nd

    # shifted-hidden im2col -> single K = 9*128 = 1152 MXU matmul (bf16 operands)
    for k in range(9):
        dy, dx = k // 3, k % 3
        hcols_s[:, k * ch:(k + 1) * ch] = (
            hpad_s[:, dy:dy + h_dim, dx:dx + w_dim, :]
            .reshape(m, ch).astype(jnp.bfloat16))

    acc = (gx_ref[0].astype(jnp.float32)
           + jnp.dot(hcols_s[...], wh_ref[...],
                     preferred_element_type=jnp.float32))
    acc = acc.reshape(b_dim, h_dim, w_dim, 4 * ch)

    i_g = jax.nn.sigmoid(acc[..., 0 * ch:1 * ch])
    f_g = jax.nn.sigmoid(acc[..., 1 * ch:2 * ch])
    g_g = jnp.tanh(acc[..., 2 * ch:3 * ch])
    o_g = jax.nn.sigmoid(acc[..., 3 * ch:4 * ch])

    c_new = f_g * c_s[...] + i_g * g_g
    h_new = o_g * jnp.tanh(c_new)

    c_s[...] = c_new
    hpad_s[:, 1:h_dim + 1, 1:w_dim + 1, :] = h_new      # h state lives in hpad_s
    o_ref[0] = h_new.reshape(m, ch)

    @pl.when(t == pl.num_programs(0) - 1)               # final-state outputs only
    def _():
        ht_ref[...] = h_new
        ct_ref[...] = c_new


def conv_lstm_scan(gx, nd, wh_mat, h0, c0, B, H, W):
    T = gx.shape[0]
    ch = h0.shape[-1]
    M = B * H * W
    grid_spec = pltpu.PrefetchScalarGridSpec(
        num_scalar_prefetch=0,
        grid=(T,),
        in_specs=[
            pl.BlockSpec((1, M, 4 * ch), lambda t: (t, 0, 0)),          # gx (bf16)
            pl.BlockSpec((1, B, 1, 1), lambda t: (t, 0, 0, 0)),         # notdone
            pl.BlockSpec((9 * ch, 4 * ch), lambda t: (0, 0)),           # Wh (bf16)
            pl.BlockSpec((B, H, W, ch), lambda t: (0, 0, 0, 0)),        # h0
            pl.BlockSpec((B, H, W, ch), lambda t: (0, 0, 0, 0)),        # c0
        ],
        out_specs=[
            pl.BlockSpec((1, M, ch), lambda t: (t, 0, 0)),              # O (all t)
            pl.BlockSpec((B, H, W, ch), lambda t: (0, 0, 0, 0)),        # h_T
            pl.BlockSpec((B, H, W, ch), lambda t: (0, 0, 0, 0)),        # c_T
        ],
        scratch_shapes=[
            pltpu.VMEM((B, H + 2, W + 2, ch), jnp.float32),   # padded h state
            pltpu.VMEM((B, H, W, ch), jnp.float32),           # c state
            pltpu.VMEM((M, 9 * ch), jnp.bfloat16),            # hidden im2col
        ],
    )
    # TODO(synk): for v7x megacore, split this into a (B_tiles, T) grid with the
    # batch axis "parallel" (state scratch per batch tile); not worthwhile at B=2.
    return pl.pallas_call(
        _convlstm_kernel,
        out_shape=(
            jax.ShapeDtypeStruct((T, M, ch), jnp.float32),
            jax.ShapeDtypeStruct((B, H, W, ch), jnp.float32),
            jax.ShapeDtypeStruct((B, H, W, ch), jnp.float32),
        ),
        grid_spec=grid_spec,
        compiler_params=pltpu.CompilerParams(
            dimension_semantics=("arbitrary",),
            vmem_limit_bytes=_VMEM_LIMIT,
        ),
    )(gx, nd, wh_mat, h0, c0)


# -----------------------------------------------------------------------------
# VisionNetwork.forward
# -----------------------------------------------------------------------------
def vision_network_forward(params, X, done, vision_lstm_state):
    h0, c0 = vision_lstm_state                      # (B, 128, H, W) each, NCHW
    T, B = X.shape[:2]
    x = X.reshape((T * B,) + X.shape[2:]).astype(jnp.float32)
    x = jnp.transpose(x, (0, 2, 3, 1))              # NCHW -> NHWC

    x = conv2d_nhwc(x, params["w1"], params["b1"], (4, 4), (1, 2))
    x = conv2d_nhwc(x, params["w2"], params["b2"], (2, 2), (2, 1))
    _, H, W, _ = x.shape

    # input->gate convolutions (Wxi|Wxf|Wxc|Wxo) for all timesteps at once,
    # stored in bf16 (halves the HBM stream into the recurrence kernel).
    gx = conv2d_nhwc(x, params["wx"], params["bx"], (1, 1), (1, 1),
                     out_dtype=jnp.bfloat16)
    gx = gx.reshape(T, B * H * W, 4 * HIDDEN)

    # Wh reshaped to (9*128, 4*128) matching the in-kernel (dy, dx, c) column order
    wh_mat = jnp.transpose(params["wh"], (2, 3, 1, 0)).reshape(
        9 * HIDDEN, 4 * HIDDEN).astype(jnp.bfloat16)
    h0n = jnp.transpose(h0, (0, 2, 3, 1)).astype(jnp.float32)    # (B,H,W,128)
    c0n = jnp.transpose(c0, (0, 2, 3, 1)).astype(jnp.float32)
    nd = (1.0 - done.astype(jnp.float32)).reshape(T, B, 1, 1)

    O, hT, cT = conv_lstm_scan(gx, nd, wh_mat, h0n, c0n, B, H, W)

    O = O.reshape(T, B, H, W, HIDDEN)
    O = jnp.transpose(O, (0, 1, 4, 2, 3)).reshape(T * B, HIDDEN, H, W)
    hT = jnp.transpose(hT, (0, 3, 1, 2))
    cT = jnp.transpose(cT, (0, 3, 1, 2))
    return O, (hT, cT)


# -----------------------------------------------------------------------------
# Deterministic parameter init (torch-style uniform(-1/sqrt(fan_in), 1/sqrt(fan_in)))
# -----------------------------------------------------------------------------
def init_params(key):
    def u(k, shape, fan_in):
        bound = float(fan_in) ** -0.5
        return jax.random.uniform(k, shape, jnp.float32, -bound, bound)

    ks = jax.random.split(key, 7)
    return {
        "w1": u(ks[0], (32, 3, 8, 8), 3 * 8 * 8),
        "b1": u(ks[1], (32,), 3 * 8 * 8),
        "w2": u(ks[2], (64, 32, 4, 4), 32 * 4 * 4),
        "b2": u(ks[3], (64,), 32 * 4 * 4),
        # ConvLSTM gate convs concatenated along out-channels in order (i, f, c, o)
        "wx": u(ks[4], (4 * HIDDEN, 64, 3, 3), 64 * 3 * 3),
        "bx": u(ks[5], (4 * HIDDEN,), 64 * 3 * 3),
        "wh": u(ks[6], (4 * HIDDEN, HIDDEN, 3, 3), HIDDEN * 3 * 3),  # no bias
    }


# -----------------------------------------------------------------------------
# Pure-JAX reference (for a correctness check only)
# -----------------------------------------------------------------------------
def _conv_ref(x, w, b, stride, pad):
    y = jax.lax.conv_general_dilated(
        x, w, window_strides=stride,
        padding=[(pad[0], pad[0]), (pad[1], pad[1])],
        dimension_numbers=("NCHW", "OIHW", "NCHW"),
        precision=jax.lax.Precision.HIGHEST)
    if b is not None:
        y = y + b[None, :, None, None]
    return y


def vision_network_reference(params, X, done, vision_lstm_state):
    h0, c0 = vision_lstm_state
    T, B = X.shape[:2]
    x = X.reshape((T * B,) + X.shape[2:]).astype(jnp.float32)
    x = _conv_ref(x, params["w1"], params["b1"], (4, 4), (1, 2))
    x = _conv_ref(x, params["w2"], params["b2"], (2, 2), (2, 1))
    _, C, H, W = x.shape
    x = x.reshape(T, B, C, H, W)
    notdone = (~done).astype(jnp.float32)

    def step(carry, inp):
        h, c = carry
        xt, nd = inp
        nd = nd[:, None, None, None]
        h = h * nd
        c = c * nd
        g = (_conv_ref(xt, params["wx"], params["bx"], (1, 1), (1, 1))
             + _conv_ref(h, params["wh"], None, (1, 1), (1, 1)))
        i = jax.nn.sigmoid(g[:, 0 * HIDDEN:1 * HIDDEN])
        f = jax.nn.sigmoid(g[:, 1 * HIDDEN:2 * HIDDEN])
        gg = jnp.tanh(g[:, 2 * HIDDEN:3 * HIDDEN])
        o = jax.nn.sigmoid(g[:, 3 * HIDDEN:4 * HIDDEN])
        c_new = f * c + i * gg
        h_new = o * jnp.tanh(c_new)
        return (h_new, c_new), h_new

    (hT, cT), Os = jax.lax.scan(
        step, (h0.astype(jnp.float32), c0.astype(jnp.float32)), (x, notdone))
    O = Os.reshape(T * B, HIDDEN, H, W)
    return O, (hT, cT)


if __name__ == "__main__":
    key = jax.random.PRNGKey(0)
    kp, kx, kh, kc = jax.random.split(key, 4)
    params = init_params(kp)

    T, B, Hin, Win = 3, 2, 32, 32
    X = jax.random.uniform(kx, (T, B, 3, Hin, Win), jnp.float32)
    done = jnp.array([[False, False], [True, False], [False, True]])
    Hc, Wc = 4, 4  # CNN output spatial size for 32x32 input
    h0 = 0.1 * jax.random.normal(kh, (B, HIDDEN, Hc, Wc), jnp.float32)
    c0 = 0.1 * jax.random.normal(kc, (B, HIDDEN, Hc, Wc), jnp.float32)

    fwd = jax.jit(vision_network_forward)
    O, (hT, cT) = fwd(params, X, done, (h0, c0))
    jax.block_until_ready((O, hT, cT))

    O_ref, (hT_ref, cT_ref) = vision_network_reference(params, X, done, (h0, c0))
    assert O.shape == (T * B, HIDDEN, Hc, Wc)
    assert hT.shape == (B, HIDDEN, Hc, Wc) and cT.shape == (B, HIDDEN, Hc, Wc)
    # tolerance reflects bf16 MXU operands (accumulation is f32); the f32 version
    # of this kernel matched the reference at 3e-3.
    for got, want in ((O, O_ref), (hT, hT_ref), (cT, cT_ref)):
        assert jnp.allclose(got, want, atol=3e-2, rtol=3e-2), float(
            jnp.max(jnp.abs(got - want)))
    print("KERNEL_OK")
</pallas_src>

<mosaic_0001>
module attributes {stable_mosaic.version = 11 : i64} {
  func.func @_matmul_bias_kernel(%arg0: i32, %arg1: memref<256x192xbf16, #tpu.memory_space<vmem>>, %arg2: memref<192x128xbf16, #tpu.memory_space<vmem>>, %arg3: memref<1x128xf32, #tpu.memory_space<vmem>>, %arg4: memref<256x128xf32, #tpu.memory_space<vmem>>) attributes {dimension_semantics = [#tpu.dimension_semantics<parallel>], iteration_bounds = array<i64: 2>, scalar_prefetch = 0 : i64, scratch_operands = 0 : i64, tpu.core_type = #tpu.core_type<tc>, window_params = [{transform_indices = @transform_0, window_bounds = array<i64: 256, 192>}, {pipeline_mode = #tpu.pipeline_mode<synchronous>, transform_indices = @transform_1, window_bounds = array<i64: 192, 128>}, {pipeline_mode = #tpu.pipeline_mode<synchronous>, transform_indices = @transform_2, window_bounds = array<i64: 1, 128>}, {transform_indices = @transform_3, window_bounds = array<i64: 256, 128>}]} {
    %c0 = arith.constant 0 : index
    %c0_0 = arith.constant 0 : index
    %0 = vector.load %arg1[%c0, %c0_0] : memref<256x192xbf16, #tpu.memory_space<vmem>>, vector<256x192xbf16>
    %c0_1 = arith.constant 0 : index
    %c0_2 = arith.constant 0 : index
    %1 = vector.load %arg2[%c0_1, %c0_2] : memref<192x128xbf16, #tpu.memory_space<vmem>>, vector<192x128xbf16>
    %cst = arith.constant dense<0.000000e+00> : vector<256x128xf32>
    %2 = tpu.matmul %0, %1, %cst {dimension_numbers = #tpu.dot_dimension_numbers<[1], [0], [0], [1], [0, 0, 1, 1], [], []>} : vector<256x192xbf16>, vector<192x128xbf16>, vector<256x128xf32> -> vector<256x128xf32>
    %c0_3 = arith.constant 0 : index
    %c0_4 = arith.constant 0 : index
    %3 = vector.load %arg3[%c0_3, %c0_4] : memref<1x128xf32, #tpu.memory_space<vmem>>, vector<1x128xf32>
    %4 = vector.broadcast %3 : vector<1x128xf32> to vector<256x128xf32>
    %5 = arith.addf %2, %4 : vector<256x128xf32>
    %c0_5 = arith.constant 0 : index
    %c0_6 = arith.constant 0 : index
    %6 = vector.load %arg4[%c0_5, %c0_6] : memref<256x128xf32, #tpu.memory_space<vmem>>, vector<256x128xf32>
    tpu.vector_store %arg4[%c0_5, %c0_6], %5 {strides = array<i32>} : memref<256x128xf32, #tpu.memory_space<vmem>>, vector<256x128xf32>,
    return
  }
  func.func @transform_0(%arg0: i32) -> (i32, i32) {
    %c0_i32 = arith.constant 0 : i32
    %c0_i32_0 = arith.constant 0 : i32
    return %arg0, %c0_i32 : i32, i32
  }
  func.func @transform_1(%arg0: i32) -> (i32, i32) {
    %c0_i32 = arith.constant 0 : i32
    %c0_i32_0 = arith.constant 0 : i32
    %c0_i32_1 = arith.constant 0 : i32
    return %c0_i32, %c0_i32_0 : i32, i32
  }
  func.func @transform_2(%arg0: i32) -> (i32, i32) {
    %c0_i32 = arith.constant 0 : i32
    %c0_i32_0 = arith.constant 0 : i32
    %c0_i32_1 = arith.constant 0 : i32
    return %c0_i32, %c0_i32_0 : i32, i32
  }
  func.func @transform_3(%arg0: i32) -> (i32, i32) {
    %c0_i32 = arith.constant 0 : i32
    %c0_i32_0 = arith.constant 0 : i32
    return %arg0, %c0_i32 : i32, i32
  }
}

module attributes {stable_mosaic.version = 11 : i64} {
  func.func @_matmul_bias_kernel(%arg0: i32, %arg1: memref<96x512xbf16, #tpu.memory_space<vmem>>, %arg2: memref<512x128xbf16, #tpu.memory_space<vmem>>, %arg3: memref<1x128xf32, #tpu.memory_space<vmem>>, %arg4: memref<96x128xf32, #tpu.memory_space<vmem>>) attributes {dimension_semantics = [#tpu.dimension_semantics<parallel>], iteration_bounds = array<i64: 1>, scalar_prefetch = 0 : i64, scratch_operands = 0 : i64, tpu.core_type = #tpu.core_type<tc>, window_params = [{transform_indices = @transform_0, window_bounds = array<i64: 96, 512>}, {pipeline_mode = #tpu.pipeline_mode<synchronous>, transform_indices = @transform_1, window_bounds = array<i64: 512, 128>}, {pipeline_mode = #tpu.pipeline_mode<synchronous>, transform_indices = @transform_2, window_bounds = array<i64: 1, 128>}, {transform_indices = @transform_3, window_bounds = array<i64: 96, 128>}]} {
    %c0 = arith.constant 0 : index
    %c0_0 = arith.constant 0 : index
    %0 = vector.load %arg1[%c0, %c0_0] : memref<96x512xbf16, #tpu.memory_space<vmem>>, vector<96x512xbf16>
    %c0_1 = arith.constant 0 : index
    %c0_2 = arith.constant 0 : index
    %1 = vector.load %arg2[%c0_1, %c0_2] : memref<512x128xbf16, #tpu.memory_space<vmem>>, vector<512x128xbf16>
    %cst = arith.constant dense<0.000000e+00> : vector<96x128xf32>
    %2 = tpu.matmul %0, %1, %cst {dimension_numbers = #tpu.dot_dimension_numbers<[1], [0], [0], [1], [0, 0, 1, 1], [], []>} : vector<96x512xbf16>, vector<512x128xbf16>, vector<96x128xf32> -> vector<96x128xf32>
    %c0_3 = arith.constant 0 : index
    %c0_4 = arith.constant 0 : index
    %3 = vector.load %arg3[%c0_3, %c0_4] : memref<1x128xf32, #tpu.memory_space<vmem>>, vector<1x128xf32>
    %4 = vector.broadcast %3 : vector<1x128xf32> to vector<96x128xf32>
    %5 = arith.addf %2, %4 : vector<96x128xf32>
    %c0_5 = arith.constant 0 : index
    %c0_6 = arith.constant 0 : index
    %6 = vector.load %arg4[%c0_5, %c0_6] : memref<96x128xf32, #tpu.memory_space<vmem>>, vector<96x128xf32>
    tpu.vector_store %arg4[%c0_5, %c0_6], %5 {strides = array<i32>} : memref<96x128xf32, #tpu.memory_space<vmem>>, vector<96x128xf32>,
    return
  }
  func.func @transform_0(%arg0: i32) -> (i32, i32) {
    %c0_i32 = arith.constant 0 : i32
    %c0_i32_0 = arith.constant 0 : i32
    return %arg0, %c0_i32 : i32, i32
  }
  func.func @transform_1(%arg0: i32) -> (i32, i32) {
    %c0_i32 = arith.constant 0 : i32
    %c0_i32_0 = arith.constant 0 : i32
    %c0_i32_1 = arith.constant 0 : i32
    return %c0_i32, %c0_i32_0 : i32, i32
  }
  func.func @transform_2(%arg0: i32) -> (i32, i32) {
    %c0_i32 = arith.constant 0 : i32
    %c0_i32_0 = arith.constant 0 : i32
    %c0_i32_1 = arith.constant 0 : i32
    return %c0_i32, %c0_i32_0 : i32, i32
  }
  func.func @transform_3(%arg0: i32) -> (i32, i32) {
    %c0_i32 = arith.constant 0 : i32
    %c0_i32_0 = arith.constant 0 : i32
    return %arg0, %c0_i32 : i32, i32
  }
}

module attributes {stable_mosaic.version = 11 : i64} {
  func.func @_matmul_bias_kernel(%arg0: i32, %arg1: memref<96x576xbf16, #tpu.memory_space<vmem>>, %arg2: memref<576x512xbf16, #tpu.memory_space<vmem>>, %arg3: memref<1x512xf32, #tpu.memory_space<vmem>>, %arg4: memref<96x512xbf16, #tpu.memory_space<vmem>>) attributes {dimension_semantics = [#tpu.dimension_semantics<parallel>], iteration_bounds = array<i64: 1>, scalar_prefetch = 0 : i64, scratch_operands = 0 : i64, tpu.core_type = #tpu.core_type<tc>, window_params = [{transform_indices = @transform_0, window_bounds = array<i64: 96, 576>}, {pipeline_mode = #tpu.pipeline_mode<synchronous>, transform_indices = @transform_1, window_bounds = array<i64: 576, 512>}, {pipeline_mode = #tpu.pipeline_mode<synchronous>, transform_indices = @transform_2, window_bounds = array<i64: 1, 512>}, {transform_indices = @transform_3, window_bounds = array<i64: 96, 512>}]} {
    %c0 = arith.constant 0 : index
    %c0_0 = arith.constant 0 : index
    %0 = vector.load %arg1[%c0, %c0_0] : memref<96x576xbf16, #tpu.memory_space<vmem>>, vector<96x576xbf16>
    %c0_1 = arith.constant 0 : index
    %c0_2 = arith.constant 0 : index
    %1 = vector.load %arg2[%c0_1, %c0_2] : memref<576x512xbf16, #tpu.memory_space<vmem>>, vector<576x512xbf16>
    %cst = arith.constant dense<0.000000e+00> : vector<96x512xf32>
    %2 = tpu.matmul %0, %1, %cst {dimension_numbers = #tpu.dot_dimension_numbers<[1], [0], [0], [1], [0, 0, 1, 1], [], []>} : vector<96x576xbf16>, vector<576x512xbf16>, vector<96x512xf32> -> vector<96x512xf32>
    %c0_3 = arith.constant 0 : index
    %c0_4 = arith.constant 0 : index
    %3 = vector.load %arg3[%c0_3, %c0_4] : memref<1x512xf32, #tpu.memory_space<vmem>>, vector<1x512xf32>
    %4 = vector.broadcast %3 : vector<1x512xf32> to vector<96x512xf32>
    %5 = arith.addf %2, %4 : vector<96x512xf32>
    %6 = arith.truncf %5 : vector<96x512xf32> to vector<96x512xbf16>
    %c0_5 = arith.constant 0 : index
    %c0_6 = arith.constant 0 : index
    %7 = vector.load %arg4[%c0_5, %c0_6] : memref<96x512xbf16, #tpu.memory_space<vmem>>, vector<96x512xbf16>
    tpu.vector_store %arg4[%c0_5, %c0_6], %6 {strides = array<i32>} : memref<96x512xbf16, #tpu.memory_space<vmem>>, vector<96x512xbf16>,
    return
  }
  func.func @transform_0(%arg0: i32) -> (i32, i32) {
    %c0_i32 = arith.constant 0 : i32
    %c0_i32_0 = arith.constant 0 : i32
    return %arg0, %c0_i32 : i32, i32
  }
  func.func @transform_1(%arg0: i32) -> (i32, i32) {
    %c0_i32 = arith.constant 0 : i32
    %c0_i32_0 = arith.constant 0 : i32
    %c0_i32_1 = arith.constant 0 : i32
    return %c0_i32, %c0_i32_0 : i32, i32
  }
  func.func @transform_2(%arg0: i32) -> (i32, i32) {
    %c0_i32 = arith.constant 0 : i32
    %c0_i32_0 = arith.constant 0 : i32
    %c0_i32_1 = arith.constant 0 : i32
    return %c0_i32, %c0_i32_0 : i32, i32
  }
  func.func @transform_3(%arg0: i32) -> (i32, i32) {
    %c0_i32 = arith.constant 0 : i32
    %c0_i32_0 = arith.constant 0 : i32
    return %arg0, %c0_i32 : i32, i32
  }
}

module attributes {stable_mosaic.version = 11 : i64} {
  func.func @_convlstm_kernel(%arg0: i32, %arg1: memref<1x32x512xbf16, #tpu.memory_space<vmem>>, %arg2: memref<1x2x1x1xf32, #tpu.memory_space<vmem>>, %arg3: memref<1152x512xbf16, #tpu.memory_space<vmem>>, %arg4: memref<2x4x4x128xf32, #tpu.memory_space<vmem>>, %arg5: memref<2x4x4x128xf32, #tpu.memory_space<vmem>>, %arg6: memref<1x32x128xf32, #tpu.memory_space<vmem>>, %arg7: memref<2x4x4x128xf32, #tpu.memory_space<vmem>>, %arg8: memref<2x4x4x128xf32, #tpu.memory_space<vmem>>, %arg9: memref<2x6x6x128xf32, #tpu.memory_space<vmem>>, %arg10: memref<2x4x4x128xf32, #tpu.memory_space<vmem>>, %arg11: memref<32x1152xbf16, #tpu.memory_space<vmem>>) attributes {dimension_semantics = [#tpu.dimension_semantics<arbitrary>], iteration_bounds = array<i64: 3>, scalar_prefetch = 0 : i64, scratch_operands = 3 : i64, tpu.core_type = #tpu.core_type<tc>, window_params = [{transform_indices = @transform_0, window_bounds = array<i64: 1, 32, 512>}, {transform_indices = @transform_1, window_bounds = array<i64: 1, 2, 1, 1>}, {pipeline_mode = #tpu.pipeline_mode<synchronous>, transform_indices = @transform_2, window_bounds = array<i64: 1152, 512>}, {pipeline_mode = #tpu.pipeline_mode<synchronous>, transform_indices = @transform_3, window_bounds = array<i64: 2, 4, 4, 128>}, {pipeline_mode = #tpu.pipeline_mode<synchronous>, transform_indices = @transform_4, window_bounds = array<i64: 2, 4, 4, 128>}, {transform_indices = @transform_5, window_bounds = array<i64: 1, 32, 128>}, {pipeline_mode = #tpu.pipeline_mode<synchronous>, transform_indices = @transform_6, window_bounds = array<i64: 2, 4, 4, 128>}, {pipeline_mode = #tpu.pipeline_mode<synchronous>, transform_indices = @transform_7, window_bounds = array<i64: 2, 4, 4, 128>}]} {
    %c0_i32 = arith.constant 0 : i32
    %0 = arith.cmpi eq, %arg0, %c0_i32 : i32
    %1 = arith.extui %0 : i1 to i32
    %c0_i32_0 = arith.constant 0 : i32
    %2 = arith.cmpi ne, %1, %c0_i32_0 : i32
    scf.if %2 {
      %cst_90 = arith.constant 0.000000e+00 : f32
      %93 = vector.broadcast %cst_90 : f32 to vector<2x6x6x128xf32>
      %c0_91 = arith.constant 0 : index
      %c0_92 = arith.constant 0 : index
      %c0_93 = arith.constant 0 : index
      %c0_94 = arith.constant 0 : index
      %94 = vector.load %arg9[%c0_91, %c0_92, %c0_93, %c0_94] : memref<2x6x6x128xf32, #tpu.memory_space<vmem>>, vector<2x6x6x128xf32>
      tpu.vector_store %arg9[%c0_91, %c0_92, %c0_93, %c0_94], %93 {strides = array<i32>} : memref<2x6x6x128xf32, #tpu.memory_space<vmem>>, vector<2x6x6x128xf32>,
      %c0_95 = arith.constant 0 : index
      %c0_96 = arith.constant 0 : index
      %c0_97 = arith.constant 0 : index
      %c0_98 = arith.constant 0 : index
      %95 = vector.load %arg4[%c0_95, %c0_96, %c0_97, %c0_98] : memref<2x4x4x128xf32, #tpu.memory_space<vmem>>, vector<2x4x4x128xf32>
      %c0_99 = arith.constant 0 : index
      %c1_100 = arith.constant 1 : index
      %c1_101 = arith.constant 1 : index
      %c0_102 = arith.constant 0 : index
      %96 = vector.load %arg9[%c0_99, %c1_100, %c1_101, %c0_102] : memref<2x6x6x128xf32, #tpu.memory_space<vmem>>, vector<2x4x4x128xf32>
      tpu.vector_store %arg9[%c0_99, %c1_100, %c1_101, %c0_102], %95 {strides = array<i32>} : memref<2x6x6x128xf32, #tpu.memory_space<vmem>>, vector<2x4x4x128xf32>,
      %c0_103 = arith.constant 0 : index
      %c0_104 = arith.constant 0 : index
      %c0_105 = arith.constant 0 : index
      %c0_106 = arith.constant 0 : index
      %97 = vector.load %arg5[%c0_103, %c0_104, %c0_105, %c0_106] : memref<2x4x4x128xf32, #tpu.memory_space<vmem>>, vector<2x4x4x128xf32>
      %c0_107 = arith.constant 0 : index
      %c0_108 = arith.constant 0 : index
      %c0_109 = arith.constant 0 : index
      %c0_110 = arith.constant 0 : index
      %98 = vector.load %arg10[%c0_107, %c0_108, %c0_109, %c0_110] : memref<2x4x4x128xf32, #tpu.memory_space<vmem>>, vector<2x4x4x128xf32>
      tpu.vector_store %arg10[%c0_107, %c0_108, %c0_109, %c0_110], %97 {strides = array<i32>} : memref<2x4x4x128xf32, #tpu.memory_space<vmem>>, vector<2x4x4x128xf32>,
    } else {
    }
    %c0 = arith.constant 0 : index
    %c0_1 = arith.constant 0 : index
    %c0_2 = arith.constant 0 : index
    %c0_3 = arith.constant 0 : index
    %3 = vector.load %arg2[%c0, %c0_1, %c0_2, %c0_3] : memref<1x2x1x1xf32, #tpu.memory_space<vmem>>, vector<1x2x1x1xf32>
    %4 = vector.shape_cast %3 : vector<1x2x1x1xf32> to vector<2x1x1xf32>
    %5 = vector.shape_cast %4 : vector<2x1x1xf32> to vector<2x1x1x1xf32>
    %c0_4 = arith.constant 0 : index
    %c1 = arith.constant 1 : index
    %c1_5 = arith.constant 1 : index
    %c0_6 = arith.constant 0 : index
    %6 = vector.load %arg9[%c0_4, %c1, %c1_5, %c0_6] : memref<2x6x6x128xf32, #tpu.memory_space<vmem>>, vector<2x4x4x128xf32>
    %7 = vector.broadcast %5 : vector<2x1x1x1xf32> to vector<2x4x4x128xf32>
    %8 = arith.mulf %6, %7 : vector<2x4x4x128xf32>
    %c0_7 = arith.constant 0 : index
    %c1_8 = arith.constant 1 : index
    %c1_9 = arith.constant 1 : index
    %c0_10 = arith.constant 0 : index
    %9 = vector.load %arg9[%c0_7, %c1_8, %c1_9, %c0_10] : memref<2x6x6x128xf32, #tpu.memory_space<vmem>>, vector<2x4x4x128xf32>
    tpu.vector_store %arg9[%c0_7, %c1_8, %c1_9, %c0_10], %8 {strides = array<i32>} : memref<2x6x6x128xf32, #tpu.memory_space<vmem>>, vector<2x4x4x128xf32>,
    %c0_11 = arith.constant 0 : index
    %c0_12 = arith.constant 0 : index
    %c0_13 = arith.constant 0 : index
    %c0_14 = arith.constant 0 : index
    %10 = vector.load %arg10[%c0_11, %c0_12, %c0_13, %c0_14] : memref<2x4x4x128xf32, #tpu.memory_space<vmem>>, vector<2x4x4x128xf32>
    %11 = vector.broadcast %5 : vector<2x1x1x1xf32> to vector<2x4x4x128xf32>
    %12 = arith.mulf %10, %11 : vector<2x4x4x128xf32>
    %c0_15 = arith.constant 0 : index
    %c0_16 = arith.constant 0 : index
    %c0_17 = arith.constant 0 : index
    %c0_18 = arith.constant 0 : index
    %13 = vector.load %arg10[%c0_15, %c0_16, %c0_17, %c0_18] : memref<2x4x4x128xf32, #tpu.memory_space<vmem>>, vector<2x4x4x128xf32>
    tpu.vector_store %arg10[%c0_15, %c0_16, %c0_17, %c0_18], %12 {strides = array<i32>} : memref<2x4x4x128xf32, #tpu.memory_space<vmem>>, vector<2x4x4x128xf32>,
    %c0_19 = arith.constant 0 : index
    %c0_20 = arith.constant 0 : index
    %c0_21 = arith.constant 0 : index
    %c0_22 = arith.constant 0 : index
    %14 = vector.load %arg9[%c0_19, %c0_20, %c0_21, %c0_22] : memref<2x6x6x128xf32, #tpu.memory_space<vmem>>, vector<2x4x4x128xf32>
    %15 = vector.shape_cast %14 : vector<2x4x4x128xf32> to vector<32x128xf32>
    %16 = arith.truncf %15 : vector<32x128xf32> to vector<32x128xbf16>
    %c0_23 = arith.constant 0 : index
    %c0_24 = arith.constant 0 : index
    %17 = vector.load %arg11[%c0_23, %c0_24] : memref<32x1152xbf16, #tpu.memory_space<vmem>>, vector<32x128xbf16>
    tpu.vector_store %arg11[%c0_23, %c0_24], %16 {strides = array<i32>} : memref<32x1152xbf16, #tpu.memory_space<vmem>>, vector<32x128xbf16>,
    %c0_25 = arith.constant 0 : index
    %c0_26 = arith.constant 0 : index
    %c1_27 = arith.constant 1 : index
    %c0_28 = arith.constant 0 : index
    %18 = vector.load %arg9[%c0_25, %c0_26, %c1_27, %c0_28] : memref<2x6x6x128xf32, #tpu.memory_space<vmem>>, vector<2x4x4x128xf32>
    %19 = vector.shape_cast %18 : vector<2x4x4x128xf32> to vector<32x128xf32>
    %20 = arith.truncf %19 : vector<32x128xf32> to vector<32x128xbf16>
    %c0_29 = arith.constant 0 : index
    %c128 = arith.constant 128 : index
    %21 = vector.load %arg11[%c0_29, %c128] : memref<32x1152xbf16, #tpu.memory_space<vmem>>, vector<32x128xbf16>
    tpu.vector_store %arg11[%c0_29, %c128], %20 {strides = array<i32>} : memref<32x1152xbf16, #tpu.memory_space<vmem>>, vector<32x128xbf16>,
    %c0_30 = arith.constant 0 : index
    %c0_31 = arith.constant 0 : index
    %c2 = arith.constant 2 : index
    %c0_32 = arith.constant 0 : index
    %22 = vector.load %arg9[%c0_30, %c0_31, %c2, %c0_32] : memref<2x6x6x128xf32, #tpu.memory_space<vmem>>, vector<2x4x4x128xf32>
    %23 = vector.shape_cast %22 : vector<2x4x4x128xf32> to vector<32x128xf32>
    %24 = arith.truncf %23 : vector<32x128xf32> to vector<32x128xbf16>
    %c0_33 = arith.constant 0 : index
    %c256 = arith.constant 256 : index
    %25 = vector.load %arg11[%c0_33, %c256] : memref<32x1152xbf16, #tpu.memory_space<vmem>>, vector<32x128xbf16>
    tpu.vector_store %arg11[%c0_33, %c256], %24 {strides = array<i32>} : memref<32x1152xbf16, #tpu.memory_space<vmem>>, vector<32x128xbf16>,
    %c0_34 = arith.constant 0 : index
    %c1_35 = arith.constant 1 : index
    %c0_36 = arith.constant 0 : index
    %c0_37 = arith.constant 0 : index
    %26 = vector.load %arg9[%c0_34, %c1_35, %c0_36, %c0_37] : memref<2x6x6x128xf32, #tpu.memory_space<vmem>>, vector<2x4x4x128xf32>
    %27 = vector.shape_cast %26 : vector<2x4x4x128xf32> to vector<32x128xf32>
    %28 = arith.truncf %27 : vector<32x128xf32> to vector<32x128xbf16>
    %c0_38 = arith.constant 0 : index
    %c384 = arith.constant 384 : index
    %29 = vector.load %arg11[%c0_38, %c384] : memref<32x1152xbf16, #tpu.memory_space<vmem>>, vector<32x128xbf16>
    tpu.vector_store %arg11[%c0_38, %c384], %28 {strides = array<i32>} : memref<32x1152xbf16, #tpu.memory_space<vmem>>, vector<32x128xbf16>,
    %c0_39 = arith.constant 0 : index
    %c1_40 = arith.constant 1 : index
    %c1_41 = arith.constant 1 : index
    %c0_42 = arith.constant 0 : index
    %30 = vector.load %arg9[%c0_39, %c1_40, %c1_41, %c0_42] : memref<2x6x6x128xf32, #tpu.memory_space<vmem>>, vector<2x4x4x128xf32>
    %31 = vector.shape_cast %30 : vector<2x4x4x128xf32> to vector<32x128xf32>
    %32 = arith.truncf %31 : vector<32x128xf32> to vector<32x128xbf16>
    %c0_43 = arith.constant 0 : index
    %c512 = arith.constant 512 : index
    %33 = vector.load %arg11[%c0_43, %c512] : memref<32x1152xbf16, #tpu.memory_space<vmem>>, vector<32x128xbf16>
    tpu.vector_store %arg11[%c0_43, %c512], %32 {strides = array<i32>} : memref<32x1152xbf16, #tpu.memory_space<vmem>>, vector<32x128xbf16>,
    %c0_44 = arith.constant 0 : index
    %c1_45 = arith.constant 1 : index
    %c2_46 = arith.constant 2 : index
    %c0_47 = arith.constant 0 : index
    %34 = vector.load %arg9[%c0_44, %c1_45, %c2_46, %c0_47] : memref<2x6x6x128xf32, #tpu.memory_space<vmem>>, vector<2x4x4x128xf32>
    %35 = vector.shape_cast %34 : vector<2x4x4x128xf32> to vector<32x128xf32>
    %36 = arith.truncf %35 : vector<32x128xf32> to vector<32x128xbf16>
    %c0_48 = arith.constant 0 : index
    %c640 = arith.constant 640 : index
    %37 = vector.load %arg11[%c0_48, %c640] : memref<32x1152xbf16, #tpu.memory_space<vmem>>, vector<32x128xbf16>
    tpu.vector_store %arg11[%c0_48, %c640], %36 {strides = array<i32>} : memref<32x1152xbf16, #tpu.memory_space<vmem>>, vector<32x128xbf16>,
    %c0_49 = arith.constant 0 : index
    %c2_50 = arith.constant 2 : index
    %c0_51 = arith.constant 0 : index
    %c0_52 = arith.constant 0 : index
    %38 = vector.load %arg9[%c0_49, %c2_50, %c0_51, %c0_52] : memref<2x6x6x128xf32, #tpu.memory_space<vmem>>, vector<2x4x4x128xf32>
    %39 = vector.shape_cast %38 : vector<2x4x4x128xf32> to vector<32x128xf32>
    %40 = arith.truncf %39 : vector<32x128xf32> to vector<32x128xbf16>
    %c0_53 = arith.constant 0 : index
    %c768 = arith.constant 768 : index
    %41 = vector.load %arg11[%c0_53, %c768] : memref<32x1152xbf16, #tpu.memory_space<vmem>>, vector<32x128xbf16>
    tpu.vector_store %arg11[%c0_53, %c768], %40 {strides = array<i32>} : memref<32x1152xbf16, #tpu.memory_space<vmem>>, vector<32x128xbf16>,
    %c0_54 = arith.constant 0 : index
    %c2_55 = arith.constant 2 : index
    %c1_56 = arith.constant 1 : index
    %c0_57 = arith.constant 0 : index
    %42 = vector.load %arg9[%c0_54, %c2_55, %c1_56, %c0_57] : memref<2x6x6x128xf32, #tpu.memory_space<vmem>>, vector<2x4x4x128xf32>
    %43 = vector.shape_cast %42 : vector<2x4x4x128xf32> to vector<32x128xf32>
    %44 = arith.truncf %43 : vector<32x128xf32> to vector<32x128xbf16>
    %c0_58 = arith.constant 0 : index
    %c896 = arith.constant 896 : index
    %45 = vector.load %arg11[%c0_58, %c896] : memref<32x1152xbf16, #tpu.memory_space<vmem>>, vector<32x128xbf16>
    tpu.vector_store %arg11[%c0_58, %c896], %44 {strides = array<i32>} : memref<32x1152xbf16, #tpu.memory_space<vmem>>, vector<32x128xbf16>,
    %c0_59 = arith.constant 0 : index
    %c2_60 = arith.constant 2 : index
    %c2_61 = arith.constant 2 : index
    %c0_62 = arith.constant 0 : index
    %46 = vector.load %arg9[%c0_59, %c2_60, %c2_61, %c0_62] : memref<2x6x6x128xf32, #tpu.memory_space<vmem>>, vector<2x4x4x128xf32>
    %47 = vector.shape_cast %46 : vector<2x4x4x128xf32> to vector<32x128xf32>
    %48 = arith.truncf %47 : vector<32x128xf32> to vector<32x128xbf16>
    %c0_63 = arith.constant 0 : index
    %c1024 = arith.constant 1024 : index
    %49 = vector.load %arg11[%c0_63, %c1024] : memref<32x1152xbf16, #tpu.memory_space<vmem>>, vector<32x128xbf16>
    tpu.vector_store %arg11[%c0_63, %c1024], %48 {strides = array<i32>} : memref<32x1152xbf16, #tpu.memory_space<vmem>>, vector<32x128xbf16>,
    %c0_64 = arith.constant 0 : index
    %c0_65 = arith.constant 0 : index
    %c0_66 = arith.constant 0 : index
    %50 = vector.load %arg1[%c0_64, %c0_65, %c0_66] : memref<1x32x512xbf16, #tpu.memory_space<vmem>>, vector<1x32x512xbf16>
    %51 = vector.shape_cast %50 : vector<1x32x512xbf16> to vector<32x512xbf16>
    %52 = arith.extf %51 : vector<32x512xbf16> to vector<32x512xf32>
    %c0_67 = arith.constant 0 : index
    %c0_68 = arith.constant 0 : index
    %53 = vector.load %arg11[%c0_67, %c0_68] : memref<32x1152xbf16, #tpu.memory_space<vmem>>, vector<32x1152xbf16>
    %c0_69 = arith.constant 0 : index
    %c0_70 = arith.constant 0 : index
    %54 = vector.load %arg3[%c0_69, %c0_70] : memref<1152x512xbf16, #tpu.memory_space<vmem>>, vector<1152x512xbf16>
    %cst = arith.constant dense<0.000000e+00> : vector<32x512xf32>
    %55 = tpu.matmul %53, %54, %cst {dimension_numbers = #tpu.dot_dimension_numbers<[1], [0], [0], [1], [0, 0, 1, 1], [], []>} : vector<32x1152xbf16>, vector<1152x512xbf16>, vector<32x512xf32> -> vector<32x512xf32>
    %56 = arith.addf %52, %55 : vector<32x512xf32>
    %57 = vector.shape_cast %56 : vector<32x512xf32> to vector<2x4x4x512xf32>
    %58 = vector.extract_strided_slice %57 {offsets = [0, 0, 0, 0], sizes = [2, 4, 4, 128], strides = [1, 1, 1, 1]} : vector<2x4x4x512xf32> to vector<2x4x4x128xf32>
    %59 = arith.negf %58 : vector<2x4x4x128xf32>
    %60 = math.exp %59 : vector<2x4x4x128xf32>
    %cst_71 = arith.constant 1.000000e+00 : f32
    %61 = vector.broadcast %cst_71 : f32 to vector<2x4x4x128xf32>
    %62 = arith.addf %61, %60 : vector<2x4x4x128xf32>
    %63 = arith.divf %61, %62 : vector<2x4x4x128xf32>
    %64 = vector.extract_strided_slice %57 {offsets = [0, 0, 0, 128], sizes = [2, 4, 4, 128], strides = [1, 1, 1, 1]} : vector<2x4x4x512xf32> to vector<2x4x4x128xf32>
    %65 = arith.negf %64 : vector<2x4x4x128xf32>
    %66 = math.exp %65 : vector<2x4x4x128xf32>
    %cst_72 = arith.constant 1.000000e+00 : f32
    %67 = vector.broadcast %cst_72 : f32 to vector<2x4x4x128xf32>
    %68 = arith.addf %67, %66 : vector<2x4x4x128xf32>
    %69 = arith.divf %67, %68 : vector<2x4x4x128xf32>
    %70 = vector.extract_strided_slice %57 {offsets = [0, 0, 0, 256], sizes = [2, 4, 4, 128], strides = [1, 1, 1, 1]} : vector<2x4x4x512xf32> to vector<2x4x4x128xf32>
    %71 = math.tanh %70 : vector<2x4x4x128xf32>
    %72 = vector.extract_strided_slice %57 {offsets = [0, 0, 0, 384], sizes = [2, 4, 4, 128], strides = [1, 1, 1, 1]} : vector<2x4x4x512xf32> to vector<2x4x4x128xf32>
    %73 = arith.negf %72 : vector<2x4x4x128xf32>
    %74 = math.exp %73 : vector<2x4x4x128xf32>
    %cst_73 = arith.constant 1.000000e+00 : f32
    %75 = vector.broadcast %cst_73 : f32 to vector<2x4x4x128xf32>
    %76 = arith.addf %75, %74 : vector<2x4x4x128xf32>
    %77 = arith.divf %75, %76 : vector<2x4x4x128xf32>
    %c0_74 = arith.constant 0 : index
    %c0_75 = arith.constant 0 : index
    %c0_76 = arith.constant 0 : index
    %c0_77 = arith.constant 0 : index
    %78 = vector.load %arg10[%c0_74, %c0_75, %c0_76, %c0_77] : memref<2x4x4x128xf32, #tpu.memory_space<vmem>>, vector<2x4x4x128xf32>
    %79 = arith.mulf %69, %78 : vector<2x4x4x128xf32>
    %80 = arith.mulf %63, %71 : vector<2x4x4x128xf32>
    %81 = arith.addf %79, %80 : vector<2x4x4x128xf32>
    %82 = math.tanh %81 : vector<2x4x4x128xf32>
    %83 = arith.mulf %77, %82 : vector<2x4x4x128xf32>
    %c0_78 = arith.constant 0 : index
    %c0_79 = arith.constant 0 : index
    %c0_80 = arith.constant 0 : index
    %c0_81 = arith.constant 0 : index
    %84 = vector.load %arg10[%c0_78, %c0_79, %c0_80, %c0_81] : memref<2x4x4x128xf32, #tpu.memory_space<vmem>>, vector<2x4x4x128xf32>
    tpu.vector_store %arg10[%c0_78, %c0_79, %c0_80, %c0_81], %81 {strides = array<i32>} : memref<2x4x4x128xf32, #tpu.memory_space<vmem>>, vector<2x4x4x128xf32>,
    %c0_82 = arith.constant 0 : index
    %c1_83 = arith.constant 1 : index
    %c1_84 = arith.constant 1 : index
    %c0_85 = arith.constant 0 : index
    %85 = vector.load %arg9[%c0_82, %c1_83, %c1_84, %c0_85] : memref<2x6x6x128xf32, #tpu.memory_space<vmem>>, vector<2x4x4x128xf32>
    tpu.vector_store %arg9[%c0_82, %c1_83, %c1_84, %c0_85], %83 {strides = array<i32>} : memref<2x6x6x128xf32, #tpu.memory_space<vmem>>, vector<2x4x4x128xf32>,
    %86 = vector.shape_cast %83 : vector<2x4x4x128xf32> to vector<32x128xf32>
    %c0_86 = arith.constant 0 : index
    %c0_87 = arith.constant 0 : index
    %c0_88 = arith.constant 0 : index
    %87 = vector.load %arg6[%c0_86, %c0_87, %c0_88] : memref<1x32x128xf32, #tpu.memory_space<vmem>>, vector<1x32x128xf32>
    %88 = vector.shape_cast %87 : vector<1x32x128xf32> to vector<32x128xf32>
    %89 = vector.shape_cast %86 : vector<32x128xf32> to vector<1x32x128xf32>
    tpu.vector_store %arg6[%c0_86, %c0_87, %c0_88], %89 {strides = array<i32>} : memref<1x32x128xf32, #tpu.memory_space<vmem>>, vector<1x32x128xf32>,
    %c2_i32 = arith.constant 2 : i32
    %90 = arith.cmpi eq, %arg0, %c2_i32 : i32
    %91 = arith.extui %90 : i1 to i32
    %c0_i32_89 = arith.constant 0 : i32
    %92 = arith.cmpi ne, %91, %c0_i32_89 : i32
    scf.if %92 {
      %c0_90 = arith.constant 0 : index
      %c0_91 = arith.constant 0 : index
      %c0_92 = arith.constant 0 : index
      %c0_93 = arith.constant 0 : index
      %93 = vector.load %arg7[%c0_90, %c0_91, %c0_92, %c0_93] : memref<2x4x4x128xf32, #tpu.memory_space<vmem>>, vector<2x4x4x128xf32>
      tpu.vector_store %arg7[%c0_90, %c0_91, %c0_92, %c0_93], %83 {strides = array<i32>} : memref<2x4x4x128xf32, #tpu.memory_space<vmem>>, vector<2x4x4x128xf32>,
      %c0_94 = arith.constant 0 : index
      %c0_95 = arith.constant 0 : index
      %c0_96 = arith.constant 0 : index
      %c0_97 = arith.constant 0 : index
      %94 = vector.load %arg8[%c0_94, %c0_95, %c0_96, %c0_97] : memref<2x4x4x128xf32, #tpu.memory_space<vmem>>, vector<2x4x4x128xf32>
      tpu.vector_store %arg8[%c0_94, %c0_95, %c0_96, %c0_97], %81 {strides = array<i32>} : memref<2x4x4x128xf32, #tpu.memory_space<vmem>>, vector<2x4x4x128xf32>,
    } else {
    }
    return
  }
  func.func @transform_0(%arg0: i32) -> (i32, i32, i32) {
    %c0_i32 = arith.constant 0 : i32
    %c0_i32_0 = arith.constant 0 : i32
    %c0_i32_1 = arith.constant 0 : i32
    return %arg0, %c0_i32, %c0_i32_0 : i32, i32, i32
  }
  func.func @transform_1(%arg0: i32) -> (i32, i32, i32, i32) {
    %c0_i32 = arith.constant 0 : i32
    %c0_i32_0 = arith.constant 0 : i32
    %c0_i32_1 = arith.constant 0 : i32
    %c0_i32_2 = arith.constant 0 : i32
    return %arg0, %c0_i32, %c0_i32_0, %c0_i32_1 : i32, i32, i32, i32
  }
  func.func @transform_2(%arg0: i32) -> (i32, i32) {
    %c0_i32 = arith.constant 0 : i32
    %c0_i32_0 = arith.constant 0 : i32
    %c0_i32_1 = arith.constant 0 : i32
    return %c0_i32, %c0_i32_0 : i32, i32
  }
  func.func @transform_3(%arg0: i32) -> (i32, i32, i32, i32) {
    %c0_i32 = arith.constant 0 : i32
    %c0_i32_0 = arith.constant 0 : i32
    %c0_i32_1 = arith.constant 0 : i32
    %c0_i32_2 = arith.constant 0 : i32
    %c0_i32_3 = arith.constant 0 : i32
    return %c0_i32, %c0_i32_0, %c0_i32_1, %c0_i32_2 : i32, i32, i32, i32
  }
  func.func @transform_4(%arg0: i32) -> (i32, i32, i32, i32) {
    %c0_i32 = arith.constant 0 : i32
    %c0_i32_0 = arith.constant 0 : i32
    %c0_i32_1 = arith.constant 0 : i32
    %c0_i32_2 = arith.constant 0 : i32
    %c0_i32_3 = arith.constant 0 : i32
    return %c0_i32, %c0_i32_0, %c0_i32_1, %c0_i32_2 : i32, i32, i32, i32
  }
  func.func @transform_5(%arg0: i32) -> (i32, i32, i32) {
    %c0_i32 = arith.constant 0 : i32
    %c0_i32_0 = arith.constant 0 : i32
    %c0_i32_1 = arith.constant 0 : i32
    return %arg0, %c0_i32, %c0_i32_0 : i32, i32, i32
  }
  func.func @transform_6(%arg0: i32) -> (i32, i32, i32, i32) {
    %c0_i32 = arith.constant 0 : i32
    %c0_i32_0 = arith.constant 0 : i32
    %c0_i32_1 = arith.constant 0 : i32
    %c0_i32_2 = arith.constant 0 : i32
    %c0_i32_3 = arith.constant 0 : i32
    return %c0_i32, %c0_i32_0, %c0_i32_1, %c0_i32_2 : i32, i32, i32, i32
  }
  func.func @transform_7(%arg0: i32) -> (i32, i32, i32, i32) {
    %c0_i32 = arith.constant 0 : i32
    %c0_i32_0 = arith.constant 0 : i32
    %c0_i32_1 = arith.constant 0 : i32
    %c0_i32_2 = arith.constant 0 : i32
    %c0_i32_3 = arith.constant 0 : i32
    return %c0_i32, %c0_i32_0, %c0_i32_1, %c0_i32_2 : i32, i32, i32, i32
  }
}

</mosaic_0001>

<bundles_post_ra>
// kernel: vision_network_forward.4
= control target key start
LH: loop header
LB: loop body
LE: loop exit
PB: predicated region body
PF: predicated region fallthrough
CT: control target
= control target key end

     0   :  { %s951_s12 = smov 0   ;;  %s1156_s0 = inlined_call_operand.vmem [shape: bf16[512,192], index: 0, kind: input, shape index: {}]   ;;  %s1157_s1 = inlined_call_operand.vmem [shape: bf16[192,128], index: 1, kind: input, shape index: {}]   ;;  %s1158_s2 = inlined_call_operand.vmem [shape: f32[1,128], index: 2, kind: input, shape index: {}]   ;;  %s1159_s3 = inlined_call_operand.vmem [shape: f32[512,128], index: 3, kind: output, shape index: {}]  }
   0x1 LB: > { %s755_s13 = sadd.s32 4294967295, %s928_s12   ;;  %p759_p0 = scmp.ge.s32.totalorder %s928_s12, 1  ;;  %s928_s12 = sphi %s951_s12, %s13_s12  }
   0x2   : > { %p139_p1 = scmp.lt.s32.totalorder %s928_s12, 3 }
   0x4   : > { %p140_p2 = pnand %p759_p0, %p139_p1 }
   0x5   : > { %s760_s16 = sshll.u32 (!%p140_p2), %s755_s13, 5 }
   0x6   : > { %143 = sbr.rel (%p140_p2) target bundleno = 316 (0x13c), region = 32  ;;  %p165_p3 = scmp.lt.s32.totalorder (!%p140_p2), %s760_s16, 63 }
   0xb   : > { %v862_v0 = vld [vmem:[%s1157_s1 + $0x38] sm:$0xff]   ;;  %v930_v1 = vmov 0   ;;  %v863_v2 = vld [vmem:[%s1157_s1 + $0x30] sm:$0xff]   ;;  %s1161_s16 = smov (!%p165_p3, %s760_s16), 63  ;;  %v864_v3 = vld [vmem:[%s1157_s1 + $0x28] sm:$0xff]   ;;  %vm457_vm0 = vcmask 523264  }
   0xc   : > { %506 = vmatprep.subr.bf16.mxu0 %v930_v1  ;;  %829 = vmatprep.subr.bf16.mxu1 %v930_v1  ;;  %s828_s21 = sshll.u32 %s1161_s16, 3  ;;  %v865_v4 = vld [vmem:[%s1157_s1 + $0x20] sm:$0xff]   ;;  %v866_v6 = vld [vmem:[%s1157_s1 + $0x18] sm:$0xff]   ;;  %v867_v8 = vld [vmem:[%s1157_s1 + $0x10] sm:$0xff]  }
   0xd   : > { %507 = vmatpush1.bf16.msra.mxu0 %v862_v0  ;;  %841 = vmatpush1.bf16.msra.mxu1 %v862_v0  ;;  %s985_s26 = scalar_lea.vmem %s1156_s0, %s828_s21  ;;  %v868_v9 = vld [vmem:[%s1157_s1 + $0x8] sm:$0xff]   ;;  %v869_v10 = vld [vmem:[%s1157_s1] sm:$0xff]   ;;  %v870_v11 = vld [vmem:[%s1157_s1 + $0x58] sm:$0xff]   ;;  %s1087_s23 = scalar_lea.vmem %s1159_s3, %s828_s21 }
   0xe   : > { %508 = vmatprep.subr.bf16.mxu0 %v930_v1  ;;  %830 = vmatprep.subr.bf16.mxu1 %v930_v1  ;;  %v876_v5 = vld [vmem:[%s985_s26 + $0x4] ss:$8 sps:$4 sm:$0xff]   ;;  %v871_v12 = vld [vmem:[%s1157_s1 + $0x50] sm:$0xff]   ;;  %v874_v15 = vld [vmem:[%s985_s26] ss:$8 sps:$4 sm:$0xff]  }
   0xf   : > { %v879_v7 = vld [vmem:[%s985_s26 + $0x84] ss:$8 sps:$4 sm:$0xff]   ;;  %810 = vmatprep.mubr.msk.bf16.mxu0 %vm457_vm0, %v876_v5  ;;  %v877_v16 = vld [vmem:[%s985_s26 + $0x80] ss:$8 sps:$4 sm:$0xff]   ;;  %v880_v17 = vld [vmem:[%s985_s26 + $0x14] ss:$8 sps:$4 sm:$0xff]  }
  0x10   : > { %818 = vmatprep.mubr.msk.bf16.mxu1 %vm457_vm0, %v879_v7  ;;  %v872_v13 = vld [vmem:[%s1157_s1 + $0x48] sm:$0xff]   ;;  %v873_v14 = vld [vmem:[%s1157_s1 + $0x40] sm:$0xff]   ;;  %v882_v18 = vld [vmem:[%s985_s26 + $0x94] ss:$8 sps:$4 sm:$0xff]  }
  0x11   : > { %509 = vmatpush1.bf16.msra.mxu0 %v863_v2  ;;  %842 = vmatpush1.bf16.msra.mxu1 %v863_v2  ;;  %v884_v19 = vld [vmem:[%s985_s26 + $0x10] ss:$8 sps:$4 sm:$0xff]   ;;  %v886_v21 = vld [vmem:[%s985_s26 + $0x24] ss:$8 sps:$4 sm:$0xff]   ;;  %v890_v23 = vld [vmem:[%s985_s26 + $0x20] ss:$8 sps:$4 sm:$0xff]  }
  0x12   : > { %510 = vmatprep.subr.bf16.mxu0 %v930_v1  ;;  %831 = vmatprep.subr.bf16.mxu1 %v930_v1  ;;  %v885_v20 = vld [vmem:[%s985_s26 + $0x90] ss:$8 sps:$4 sm:$0xff]   ;;  %v888_v22 = vld [vmem:[%s985_s26 + $0xa4] ss:$8 sps:$4 sm:$0xff]   ;;  %v891_v24 = vld [vmem:[%s985_s26 + $0xa0] ss:$8 sps:$4 sm:$0xff]  }
  0x13   : > { %v892_v25 = vld [vmem:[%s985_s26 + $0x34] ss:$8 sps:$4 sm:$0xff]   ;;  %v896_v27 = vld [vmem:[%s985_s26 + $0x30] ss:$8 sps:$4 sm:$0xff]   ;;  %v898_v29 = vld [vmem:[%s985_s26 + $0x44] ss:$8 sps:$4 sm:$0xff]  }
  0x14   : > { %v894_v26 = vld [vmem:[%s985_s26 + $0xb4] ss:$8 sps:$4 sm:$0xff]   ;;  %v897_v28 = vld [vmem:[%s985_s26 + $0xb0] ss:$8 sps:$4 sm:$0xff]   ;;  %v900_v30 = vld [vmem:[%s985_s26 + $0xc4] ss:$8 sps:$4 sm:$0xff]  }
  0x15   : > { %511 = vmatpush1.bf16.msra.mxu0 %v864_v3  ;;  %843 = vmatpush1.bf16.msra.mxu1 %v864_v3  ;;  %v902_v31 = vld [vmem:[%s985_s26 + $0x40] ss:$8 sps:$4 sm:$0xff]   ;;  %v904_v33 = vld [vmem:[%s985_s26 + $0x54] ss:$8 sps:$4 sm:$0xff]   ;;  %v908_v35 = vld [vmem:[%s985_s26 + $0x50] ss:$8 sps:$4 sm:$0xff]  }
  0x16   : > { %512 = vmatprep.subr.bf16.mxu0 %v930_v1  ;;  %832 = vmatprep.subr.bf16.mxu1 %v930_v1  ;;  %v903_v32 = vld [vmem:[%s985_s26 + $0xc0] ss:$8 sps:$4 sm:$0xff]   ;;  %v906_v34 = vld [vmem:[%s985_s26 + $0xd4] ss:$8 sps:$4 sm:$0xff]   ;;  %v909_v36 = vld [vmem:[%s985_s26 + $0xd0] ss:$8 sps:$4 sm:$0xff]  }
  0x17   : > { %v910_v37 = vld [vmem:[%s985_s26 + $0x64] ss:$8 sps:$4 sm:$0xff]   ;;  %v914_v39 = vld [vmem:[%s985_s26 + $0x60] ss:$8 sps:$4 sm:$0xff]   ;;  %v916_v41 = vld [vmem:[%s985_s26 + $0x74] ss:$8 sps:$4 sm:$0xff]  }
  0x18   : > { %v912_v38 = vld [vmem:[%s985_s26 + $0xe4] ss:$8 sps:$4 sm:$0xff]   ;;  %v915_v40 = vld [vmem:[%s985_s26 + $0xe0] ss:$8 sps:$4 sm:$0xff]   ;;  %v918_v42 = vld [vmem:[%s985_s26 + $0xf4] ss:$8 sps:$4 sm:$0xff]  }
  0x19   : > { %513 = vmatpush1.bf16.msra.mxu0 %v865_v4  ;;  %844 = vmatpush1.bf16.msra.mxu1 %v865_v4  ;;  %v920_v43 = vld [vmem:[%s985_s26 + $0x70] ss:$8 sps:$4 sm:$0xff]   ;;  %v1080_v45 = vld [vmem:[%s1158_s2] ss:$0 sm:$0xff] }
  0x1a   : > { %514 = vmatprep.subr.bf16.mxu0 %v930_v1  ;;  %833 = vmatprep.subr.bf16.mxu1 %v930_v1  ;;  %v921_v44 = vld [vmem:[%s985_s26 + $0xf0] ss:$8 sps:$4 sm:$0xff]  }
  0x1d   : > { %515 = vmatpush1.bf16.msra.mxu0 %v866_v6  ;;  %845 = vmatpush1.bf16.msra.mxu1 %v866_v6 }
  0x1e   : > { %516 = vmatprep.subr.bf16.mxu0 %v930_v1  ;;  %834 = vmatprep.subr.bf16.mxu1 %v930_v1 }
  0x21   : > { %517 = vmatpush1.bf16.msra.mxu0 %v867_v8  ;;  %846 = vmatpush1.bf16.msra.mxu1 %v867_v8 }
  0x22   : > { %518 = vmatprep.subr.bf16.mxu0 %v930_v1  ;;  %835 = vmatprep.subr.bf16.mxu1 %v930_v1 }
  0x25   : > { %519 = vmatpush1.bf16.msra.mxu0 %v868_v9  ;;  %847 = vmatpush1.bf16.msra.mxu1 %v868_v9 }
  0x26   : > { %520 = vmatprep.subr.bf16.mxu0 %v930_v1  ;;  %836 = vmatprep.subr.bf16.mxu1 %v930_v1 }
  0x29   : > { %521 = vmatpush1.bf16.msra.mxu0 %v869_v10  ;;  %848 = vmatpush1.bf16.msra.mxu1 %v869_v10 }
  0x2a   : > { %530 = vmatprep.subr.bf16.mxu0 %v930_v1  ;;  %837 = vmatprep.subr.bf16.mxu1 %v930_v1 }
  0x2d   : > { %531 = vmatpush2.bf16.msra.mxu0 %v870_v11  ;;  %849 = vmatpush2.bf16.msra.mxu1 %v870_v11 }
  0x2e   : > { %532 = vmatprep.subr.bf16.mxu0 %v930_v1  ;;  %838 = vmatprep.subr.bf16.mxu1 %v930_v1 }
  0x31   : > { %533 = vmatpush2.bf16.msra.mxu0 %v871_v12  ;;  %850 = vmatpush2.bf16.msra.mxu1 %v871_v12 }
  0x32   : > { %534 = vmatprep.subr.bf16.mxu0 %v930_v1  ;;  %839 = vmatprep.subr.bf16.mxu1 %v930_v1 }
  0x35   : > { %535 = vmatpush2.bf16.msra.mxu0 %v872_v13  ;;  %851 = vmatpush2.bf16.msra.mxu1 %v872_v13 }
  0x36   : > { %536 = vmatprep.subr.bf16.mxu0 %v930_v1  ;;  %840 = vmatprep.subr.bf16.mxu1 %v930_v1 }
  0x39   : > { %537 = vmatpush2.bf16.msra.mxu0 %v873_v14  ;;  %852 = vmatpush2.bf16.msra.mxu1 %v873_v14 }
  0x3c   : > { %539 = vmatmul.mubr.bf16.vlgmr.msra.gmra.mxu0 %v874_v15  ;;  %603 = vmatmul.mubr.bf16.vlgmr.msra.gmra.mxu1 %v877_v16 }
  0x3d   : > { %811 = vmatprep.mubr.msk.bf16.mxu0 %vm457_vm0, %v880_v17  ;;  %819 = vmatprep.mubr.msk.bf16.mxu1 %vm457_vm0, %v882_v18 }
  0x44   : > { %547 = vmatmul.mubr.bf16.gmra.mxu0 %v884_v19  ;;  %611 = vmatmul.mubr.bf16.gmra.mxu1 %v885_v20 }
  0x45   : > { %812 = vmatprep.mubr.msk.bf16.mxu0 %vm457_vm0, %v886_v21  ;;  %820 = vmatprep.mubr.msk.bf16.mxu1 %vm457_vm0, %v888_v22 }
  0x4c   : > { %555 = vmatmul.mubr.bf16.gmra.mxu0 %v890_v23  ;;  %619 = vmatmul.mubr.bf16.gmra.mxu1 %v891_v24 }
  0x4d   : > { %813 = vmatprep.mubr.msk.bf16.mxu0 %vm457_vm0, %v892_v25  ;;  %821 = vmatprep.mubr.msk.bf16.mxu1 %vm457_vm0, %v894_v26 }
  0x54   : > { %563 = vmatmul.mubr.bf16.gmra.mxu0 %v896_v27  ;;  %627 = vmatmul.mubr.bf16.gmra.mxu1 %v897_v28 }
  0x55   : > { %814 = vmatprep.mubr.msk.bf16.mxu0 %vm457_vm0, %v898_v29  ;;  %822 = vmatprep.mubr.msk.bf16.mxu1 %vm457_vm0, %v900_v30 }
  0x5c   : > { %571 = vmatmul.mubr.bf16.gmra.mxu0 %v902_v31  ;;  %635 = vmatmul.mubr.bf16.gmra.mxu1 %v903_v32 }
  0x5d   : > { %815 = vmatprep.mubr.msk.bf16.mxu0 %vm457_vm0, %v904_v33  ;;  %823 = vmatprep.mubr.msk.bf16.mxu1 %vm457_vm0, %v906_v34 }
  0x64   : > { %579 = vmatmul.mubr.bf16.gmra.mxu0 %v908_v35  ;;  %643 = vmatmul.mubr.bf16.gmra.mxu1 %v909_v36 }
  0x65   : > { %816 = vmatprep.mubr.msk.bf16.mxu0 %vm457_vm0, %v910_v37  ;;  %824 = vmatprep.mubr.msk.bf16.mxu1 %vm457_vm0, %v912_v38 }
  0x6c   : > { %587 = vmatmul.mubr.bf16.gmra.mxu0 %v914_v39  ;;  %651 = vmatmul.mubr.bf16.gmra.mxu1 %v915_v40 }
  0x6d   : > { %817 = vmatprep.mubr.msk.bf16.mxu0 %vm457_vm0, %v916_v41  ;;  %825 = vmatprep.mubr.msk.bf16.mxu1 %vm457_vm0, %v918_v42 }
  0x74   : > { %595 = vmatmul.mubr.bf16.gmra.mxu0 %v920_v43  ;;  %659 = vmatmul.mubr.bf16.gmra.mxu1 %v921_v44 }
  0xfc   : > { %v540_v46 = vpop.f32.mrf.mxu0  ;;  %v604_v47 = vpop.f32.mrf.mxu1 }
  0xfd   : > { %v541_v48 = vadd.f32 %v1080_v45, %v540_v46  ;;  %v605_v49 = vadd.f32 %v1080_v45, %v604_v47 }
  0xfe   : > { %v542_v50 = vpop.f32.mrf.mxu0  ;;  %v606_v51 = vpop.f32.mrf.mxu1 }
  0xff   : > { %667 = vst [vmem:[%s1087_s23] sm:$0xff] %v541_v48  ;;  %683 = vst [vmem:[%s1087_s23 + $0x80] sm:$0xff] %v605_v49 }
 0x100   : > { %v543_v52 = vpop.f32.mrf.mxu0  ;;  %v607_v53 = vpop.f32.mrf.mxu1 }
 0x101   : > { %v544_v54 = vadd.f32 %v1080_v45, %v543_v52  ;;  %v608_v55 = vadd.f32 %v1080_v45, %v607_v53 }
 0x102   : > { %v545_v56 = vpop.f32.mrf.mxu0  ;;  %v609_v57 = vpop.f32.mrf.mxu1 }
 0x103   : > { %668 = vst [vmem:[%s1087_s23 + $0x8] sm:$0xff] %v544_v54  ;;  %684 = vst [vmem:[%s1087_s23 + $0x88] sm:$0xff] %v608_v55 }
 0x104   : > { %v548_v58 = vpop.f32.mrf.mxu0  ;;  %v612_v59 = vpop.f32.mrf.mxu1 }
 0x105   : > { %v549_v60 = vadd.f32 %v1080_v45, %v548_v58  ;;  %v613_v61 = vadd.f32 %v1080_v45, %v612_v59 }
 0x106   : > { %v550_v62 = vpop.f32.mrf.mxu0  ;;  %v614_v63 = vpop.f32.mrf.mxu1 }
 0x107   : > { %669 = vst [vmem:[%s1087_s23 + $0x10] sm:$0xff] %v549_v60  ;;  %685 = vst [vmem:[%s1087_s23 + $0x90] sm:$0xff] %v613_v61 }
 0x108   : > { %v551_v0 = vpop.f32.mrf.mxu0  ;;  %v615_v1 = vpop.f32.mrf.mxu1 }
 0x109   : > { %v552_v2 = vadd.f32 %v1080_v45, %v551_v0  ;;  %v616_v3 = vadd.f32 %v1080_v45, %v615_v1 }
 0x10a   : > { %v553_v4 = vpop.f32.mrf.mxu0  ;;  %v617_v5 = vpop.f32.mrf.mxu1 }
 0x10b   : > { %670 = vst [vmem:[%s1087_s23 + $0x18] sm:$0xff] %v552_v2  ;;  %686 = vst [vmem:[%s1087_s23 + $0x98] sm:$0xff] %v616_v3 }
 0x10c   : > { %v556_v6 = vpop.f32.mrf.mxu0  ;;  %v620_v7 = vpop.f32.mrf.mxu1 }
 0x10d   : > { %v557_v8 = vadd.f32 %v1080_v45, %v556_v6  ;;  %v621_v9 = vadd.f32 %v1080_v45, %v620_v7 }
 0x10e   : > { %v558_v10 = vpop.f32.mrf.mxu0  ;;  %v622_v11 = vpop.f32.mrf.mxu1 }
 0x10f   : > { %671 = vst [vmem:[%s1087_s23 + $0x20] sm:$0xff] %v557_v8  ;;  %687 = vst [vmem:[%s1087_s23 + $0xa0] sm:$0xff] %v621_v9 }
 0x110   : > { %v559_v12 = vpop.f32.mrf.mxu0  ;;  %v623_v13 = vpop.f32.mrf.mxu1 }
 0x111   : > { %v560_v14 = vadd.f32 %v1080_v45, %v559_v12  ;;  %v624_v15 = vadd.f32 %v1080_v45, %v623_v13 }
 0x112   : > { %v561_v16 = vpop.f32.mrf.mxu0  ;;  %v625_v17 = vpop.f32.mrf.mxu1 }
 0x113   : > { %672 = vst [vmem:[%s1087_s23 + $0x28] sm:$0xff] %v560_v14  ;;  %688 = vst [vmem:[%s1087_s23 + $0xa8] sm:$0xff] %v624_v15 }
 0x114   : > { %v564_v18 = vpop.f32.mrf.mxu0  ;;  %v628_v19 = vpop.f32.mrf.mxu1 }
 0x115   : > { %v565_v20 = vadd.f32 %v1080_v45, %v564_v18  ;;  %v629_v21 = vadd.f32 %v1080_v45, %v628_v19 }
 0x116   : > { %v566_v22 = vpop.f32.mrf.mxu0  ;;  %v630_v23 = vpop.f32.mrf.mxu1 }
 0x117   : > { %673 = vst [vmem:[%s1087_s23 + $0x30] sm:$0xff] %v565_v20  ;;  %689 = vst [vmem:[%s1087_s23 + $0xb0] sm:$0xff] %v629_v21 }
 0x118   : > { %v567_v24 = vpop.f32.mrf.mxu0  ;;  %v631_v25 = vpop.f32.mrf.mxu1 }
 0x119   : > { %v568_v26 = vadd.f32 %v1080_v45, %v567_v24  ;;  %v632_v27 = vadd.f32 %v1080_v45, %v631_v25 }
 0x11a   : > { %v569_v28 = vpop.f32.mrf.mxu0  ;;  %v633_v29 = vpop.f32.mrf.mxu1 }
 0x11b   : > { %674 = vst [vmem:[%s1087_s23 + $0x38] sm:$0xff] %v568_v26  ;;  %690 = vst [vmem:[%s1087_s23 + $0xb8] sm:$0xff] %v632_v27 }
 0x11c   : > { %v572_v30 = vpop.f32.mrf.mxu0  ;;  %v636_v31 = vpop.f32.mrf.mxu1 }
 0x11d   : > { %v573_v32 = vadd.f32 %v1080_v45, %v572_v30  ;;  %v637_v33 = vadd.f32 %v1080_v45, %v636_v31 }
 0x11e   : > { %v574_v34 = vpop.f32.mrf.mxu0  ;;  %v638_v35 = vpop.f32.mrf.mxu1 }
 0x11f   : > { %675 = vst [vmem:[%s1087_s23 + $0x40] sm:$0xff] %v573_v32  ;;  %691 = vst [vmem:[%s1087_s23 + $0xc0] sm:$0xff] %v637_v33 }
 0x120   : > { %v575_v36 = vpop.f32.mrf.mxu0  ;;  %v639_v37 = vpop.f32.mrf.mxu1 }
 0x121   : > { %v576_v38 = vadd.f32 %v1080_v45, %v575_v36  ;;  %v640_v39 = vadd.f32 %v1080_v45, %v639_v37 }
 0x122   : > { %v577_v40 = vpop.f32.mrf.mxu0  ;;  %v641_v41 = vpop.f32.mrf.mxu1 }
 0x123   : > { %676 = vst [vmem:[%s1087_s23 + $0x48] sm:$0xff] %v576_v38  ;;  %692 = vst [vmem:[%s1087_s23 + $0xc8] sm:$0xff] %v640_v39 }
 0x124   : > { %v580_v42 = vpop.f32.mrf.mxu0  ;;  %v644_v43 = vpop.f32.mrf.mxu1 }
 0x125   : > { %v581_v44 = vadd.f32 %v1080_v45, %v580_v42  ;;  %v645_v46 = vadd.f32 %v1080_v45, %v644_v43 }
 0x126   : > { %v582_v47 = vpop.f32.mrf.mxu0  ;;  %v646_v48 = vpop.f32.mrf.mxu1 }
 0x127   : > { %677 = vst [vmem:[%s1087_s23 + $0x50] sm:$0xff] %v581_v44  ;;  %693 = vst [vmem:[%s1087_s23 + $0xd0] sm:$0xff] %v645_v46 }
 0x128   : > { %v583_v49 = vpop.f32.mrf.mxu0  ;;  %v647_v50 = vpop.f32.mrf.mxu1 }
 0x129   : > { %v584_v51 = vadd.f32 %v1080_v45, %v583_v49  ;;  %v648_v52 = vadd.f32 %v1080_v45, %v647_v50 }
 0x12a   : > { %v585_v53 = vpop.f32.mrf.mxu0  ;;  %v649_v54 = vpop.f32.mrf.mxu1 }
 0x12b   : > { %678 = vst [vmem:[%s1087_s23 + $0x58] sm:$0xff] %v584_v51  ;;  %694 = vst [vmem:[%s1087_s23 + $0xd8] sm:$0xff] %v648_v52 }
 0x12c   : > { %v588_v55 = vpop.f32.mrf.mxu0  ;;  %v652_v56 = vpop.f32.mrf.mxu1 }
 0x12d   : > { %v589_v57 = vadd.f32 %v1080_v45, %v588_v55  ;;  %v653_v58 = vadd.f32 %v1080_v45, %v652_v56 }
 0x12e   : > { %v590_v59 = vpop.f32.mrf.mxu0  ;;  %v654_v60 = vpop.f32.mrf.mxu1 }
 0x12f   : > { %679 = vst [vmem:[%s1087_s23 + $0x60] sm:$0xff] %v589_v57  ;;  %695 = vst [vmem:[%s1087_s23 + $0xe0] sm:$0xff] %v653_v58 }
 0x130   : > { %v591_v61 = vpop.f32.mrf.mxu0  ;;  %v655_v62 = vpop.f32.mrf.mxu1 }
 0x131   : > { %v592_v63 = vadd.f32 %v1080_v45, %v591_v61  ;;  %v656_v0 = vadd.f32 %v1080_v45, %v655_v62 }
 0x132   : > { %v593_v1 = vpop.f32.mrf.mxu0  ;;  %v657_v2 = vpop.f32.mrf.mxu1 }
 0x133   : > { %680 = vst [vmem:[%s1087_s23 + $0x68] sm:$0xff] %v592_v63  ;;  %696 = vst [vmem:[%s1087_s23 + $0xe8] sm:$0xff] %v656_v0 }
 0x134   : > { %v596_v3 = vpop.f32.mrf.mxu0  ;;  %v660_v4 = vpop.f32.mrf.mxu1 }
 0x135   : > { %v597_v5 = vadd.f32 %v1080_v45, %v596_v3  ;;  %v661_v6 = vadd.f32 %v1080_v45, %v660_v4 }
 0x136   : > { %v598_v7 = vpop.f32.mrf.mxu0  ;;  %v662_v8 = vpop.f32.mrf.mxu1 }
 0x137   : > { %681 = vst [vmem:[%s1087_s23 + $0x70] sm:$0xff] %v597_v5  ;;  %697 = vst [vmem:[%s1087_s23 + $0xf0] sm:$0xff] %v661_v6 }
 0x138   : > { %v599_v9 = vpop.f32.mrf.mxu0  ;;  %v663_v10 = vpop.f32.mrf.mxu1 }
 0x139   : > { %v600_v11 = vadd.f32 %v1080_v45, %v599_v9  ;;  %v664_v12 = vadd.f32 %v1080_v45, %v663_v10 }
 0x13a   : > { %v601_v13 = vpop.f32.mrf.mxu0  ;;  %v665_v14 = vpop.f32.mrf.mxu1 }
 0x13b   : > { %682 = vst [vmem:[%s1087_s23 + $0x78] sm:$0xff] %v600_v11  ;;  %698 = vst [vmem:[%s1087_s23 + $0xf8] sm:$0xff] %v664_v12 }
 0x13c PF: > { %s13_s12 = sadd.s32 1, %s928_s12  }
 0x13d   : > { %p10_p4 = scmp.ge.s32.totalorder %s13_s12, 4  }
 0x13f   :  { %12 = sbr.rel (!%p10_p4) target bundleno = 1 (0x1), region = 62 }

// kernel: vision_network_forward.5
= control target key start
LH: loop header
LB: loop body
LE: loop exit
PB: predicated region body
PF: predicated region fallthrough
CT: control target
= control target key end

     0   :  { %s1070_s1 = inlined_call_operand.vmem [shape: bf16[512,128], index: 1, kind: input, shape index: {}]   ;;  %s1071_s0 = inlined_call_operand.vmem [shape: bf16[96,512], index: 0, kind: input, shape index: {}]   ;;  %s1072_s2 = inlined_call_operand.vmem [shape: f32[1,128], index: 2, kind: input, shape index: {}]   ;;  %s1073_s3 = inlined_call_operand.vmem [shape: f32[96,128], index: 3, kind: output, shape index: {}]  }
   0x1   :  { %v761_v0 = vld [vmem:[%s1070_s1 + $0x78] sm:$0xff]   ;;  %v765_v4 = vld [vmem:[%s1070_s1 + $0x70] sm:$0xff]   ;;  %v769_v8 = vld [vmem:[%s1070_s1 + $0x68] sm:$0xff]  }
   0x2   :  { %v762_v1 = vld [vmem:[%s1070_s1 + $0xf8] sm:$0xff]   ;;  %657 = vmatprep.subr.bf16.mxu0 %v761_v0  ;;  %v766_v5 = vld [vmem:[%s1070_s1 + $0xf0] sm:$0xff]   ;;  %v770_v9 = vld [vmem:[%s1070_s1 + $0xe8] sm:$0xff]  }
   0x3   :  { %v763_v2 = vld [vmem:[%s1070_s1 + $0x38] sm:$0xff]   ;;  %709 = vmatprep.subr.bf16.mxu1 %v762_v1  ;;  %v767_v6 = vld [vmem:[%s1070_s1 + $0x30] sm:$0xff]   ;;  %v771_v10 = vld [vmem:[%s1070_s1 + $0x28] sm:$0xff]  }
   0x4   :  { %v764_v3 = vld [vmem:[%s1070_s1 + $0xb8] sm:$0xff]   ;;  %658 = vmatpush3.bf16.msra.mxu0 %v763_v2  ;;  %v768_v7 = vld [vmem:[%s1070_s1 + $0xb0] sm:$0xff]   ;;  %v772_v11 = vld [vmem:[%s1070_s1 + $0xa8] sm:$0xff]  }
   0x5   :  { %710 = vmatpush3.bf16.msra.mxu1 %v764_v3  ;;  %659 = vmatprep.subr.bf16.mxu0 %v765_v4  ;;  %v773_v12 = vld [vmem:[%s1070_s1 + $0x60] sm:$0xff]   ;;  %v777_v16 = vld [vmem:[%s1070_s1 + $0x58] sm:$0xff]   ;;  %v781_v20 = vld [vmem:[%s1070_s1 + $0x50] sm:$0xff]  }
   0x6   :  { %711 = vmatprep.subr.bf16.mxu1 %v766_v5  ;;  %v774_v13 = vld [vmem:[%s1070_s1 + $0xe0] sm:$0xff]   ;;  %v778_v17 = vld [vmem:[%s1070_s1 + $0xd8] sm:$0xff]   ;;  %v782_v21 = vld [vmem:[%s1070_s1 + $0xd0] sm:$0xff]  }
   0x7   :  { %v775_v14 = vld [vmem:[%s1070_s1 + $0x20] sm:$0xff]   ;;  %v779_v18 = vld [vmem:[%s1070_s1 + $0x18] sm:$0xff]   ;;  %v783_v22 = vld [vmem:[%s1070_s1 + $0x10] sm:$0xff]  }
   0x8   :  { %660 = vmatpush3.bf16.msra.mxu0 %v767_v6  ;;  %v776_v15 = vld [vmem:[%s1070_s1 + $0xa0] sm:$0xff]   ;;  %v780_v19 = vld [vmem:[%s1070_s1 + $0x98] sm:$0xff]   ;;  %v784_v23 = vld [vmem:[%s1070_s1 + $0x90] sm:$0xff]  }
   0x9   :  { %712 = vmatpush3.bf16.msra.mxu1 %v768_v7  ;;  %661 = vmatprep.subr.bf16.mxu0 %v769_v8  ;;  %v785_v24 = vld [vmem:[%s1070_s1 + $0x48] sm:$0xff]   ;;  %v789_v28 = vld [vmem:[%s1070_s1 + $0x40] sm:$0xff]  }
   0xa   :  { %713 = vmatprep.subr.bf16.mxu1 %v770_v9  ;;  %v786_v25 = vld [vmem:[%s1070_s1 + $0xc8] sm:$0xff]   ;;  %v790_v29 = vld [vmem:[%s1070_s1 + $0xc0] sm:$0xff]  }
   0xb   :  { %v787_v26 = vld [vmem:[%s1070_s1 + $0x8] sm:$0xff]   ;;  %v791_v30 = vld [vmem:[%s1070_s1] sm:$0xff]  }
   0xc   :  { %662 = vmatpush3.bf16.msra.mxu0 %v771_v10  ;;  %v788_v27 = vld [vmem:[%s1070_s1 + $0x88] sm:$0xff]   ;;  %v792_v31 = vld [vmem:[%s1070_s1 + $0x80] sm:$0xff]  }
   0xd   :  { %714 = vmatpush3.bf16.msra.mxu1 %v772_v11  ;;  %663 = vmatprep.subr.bf16.mxu0 %v773_v12  ;;  %v793_v32 = vld [vmem:[%s1071_s0] ss:$16 sps:$4 sm:$0xff]   ;;  %v795_v33 = vld [vmem:[%s1071_s0 + $0x4] ss:$16 sps:$4 sm:$0xff]   ;;  %v796_v34 = vld [vmem:[%s1071_s0 + $0x8] ss:$16 sps:$4 sm:$0xff]  }
   0xe   :  { %715 = vmatprep.subr.bf16.mxu1 %v774_v13  ;;  %v798_v35 = vld [vmem:[%s1071_s0 + $0xc] ss:$16 sps:$4 sm:$0xff]   ;;  %454 = vmatprep.mubr.bf16.mxu0 %v795_v33  ;;  %v799_v36 = vld [vmem:[%s1071_s0 + $0x24] ss:$16 sps:$4 sm:$0xff]   ;;  %v803_v38 = vld [vmem:[%s1071_s0 + $0x20] ss:$16 sps:$4 sm:$0xff]  }
   0xf   :  { %535 = vmatprep.mubr.bf16.mxu1 %v798_v35  ;;  %v801_v37 = vld [vmem:[%s1071_s0 + $0x2c] ss:$16 sps:$4 sm:$0xff]   ;;  %v804_v39 = vld [vmem:[%s1071_s0 + $0x28] ss:$16 sps:$4 sm:$0xff]   ;;  %v805_v40 = vld [vmem:[%s1071_s0 + $0x44] ss:$16 sps:$4 sm:$0xff]  }
  0x10   :  { %664 = vmatpush3.bf16.msra.mxu0 %v775_v14  ;;  %v807_v41 = vld [vmem:[%s1071_s0 + $0x4c] ss:$16 sps:$4 sm:$0xff]   ;;  %v809_v42 = vld [vmem:[%s1071_s0 + $0x40] ss:$16 sps:$4 sm:$0xff]   ;;  %v810_v43 = vld [vmem:[%s1071_s0 + $0x48] ss:$16 sps:$4 sm:$0xff]  }
  0x11   :  { %716 = vmatpush3.bf16.msra.mxu1 %v776_v15  ;;  %665 = vmatprep.subr.bf16.mxu0 %v777_v16  ;;  %v811_v44 = vld [vmem:[%s1071_s0 + $0x64] ss:$16 sps:$4 sm:$0xff]   ;;  %v813_v45 = vld [vmem:[%s1071_s0 + $0x6c] ss:$16 sps:$4 sm:$0xff]   ;;  %v815_v46 = vld [vmem:[%s1071_s0 + $0x60] ss:$16 sps:$4 sm:$0xff]  }
  0x12   :  { %717 = vmatprep.subr.bf16.mxu1 %v778_v17  ;;  %v816_v47 = vld [vmem:[%s1071_s0 + $0x68] ss:$16 sps:$4 sm:$0xff]   ;;  %v817_v48 = vld [vmem:[%s1071_s0 + $0x84] ss:$16 sps:$4 sm:$0xff]   ;;  %v819_v49 = vld [vmem:[%s1071_s0 + $0x8c] ss:$16 sps:$4 sm:$0xff]  }
  0x13   :  { %v821_v50 = vld [vmem:[%s1071_s0 + $0x80] ss:$16 sps:$4 sm:$0xff]   ;;  %v822_v51 = vld [vmem:[%s1071_s0 + $0x88] ss:$16 sps:$4 sm:$0xff]   ;;  %v823_v52 = vld [vmem:[%s1071_s0 + $0xa4] ss:$16 sps:$4 sm:$0xff]  }
  0x14   :  { %666 = vmatpush3.bf16.msra.mxu0 %v779_v18  ;;  %v825_v53 = vld [vmem:[%s1071_s0 + $0xac] ss:$16 sps:$4 sm:$0xff]   ;;  %v827_v54 = vld [vmem:[%s1071_s0 + $0xa0] ss:$16 sps:$4 sm:$0xff]   ;;  %v828_v55 = vld [vmem:[%s1071_s0 + $0xa8] ss:$16 sps:$4 sm:$0xff]  }
  0x15   :  { %718 = vmatpush3.bf16.msra.mxu1 %v780_v19  ;;  %667 = vmatprep.subr.bf16.mxu0 %v781_v20  ;;  %v1020_v58 = vld [vmem:[%s1072_s2] ss:$0 sm:$0xff] }
  0x16   :  { %719 = vmatprep.subr.bf16.mxu1 %v782_v21 }
  0x18   :  { %668 = vmatpush3.bf16.msra.mxu0 %v783_v22 }
  0x19   :  { %720 = vmatpush3.bf16.msra.mxu1 %v784_v23  ;;  %669 = vmatprep.subr.bf16.mxu0 %v785_v24 }
  0x1a   :  { %721 = vmatprep.subr.bf16.mxu1 %v786_v25 }
  0x1c   :  { %670 = vmatpush3.bf16.msra.mxu0 %v787_v26 }
  0x1d   :  { %722 = vmatpush3.bf16.msra.mxu1 %v788_v27  ;;  %671 = vmatprep.subr.bf16.mxu0 %v789_v28 }
  0x1e   :  { %723 = vmatprep.subr.bf16.mxu1 %v790_v29 }
  0x20   :  { %672 = vmatpush3.bf16.msra.mxu0 %v791_v30 }
  0x21   :  { %724 = vmatpush3.bf16.msra.mxu1 %v792_v31 }
  0x23   :  { %455 = vmatmul.mubr.bf16.vlgmr.msra.gmra.mxu0 %v793_v32 }
  0x24   :  { %536 = vmatmul.mubr.bf16.vlgmr.msra.gmra.mxu1 %v796_v34  ;;  %462 = vmatprep.mubr.bf16.mxu0 %v799_v36 }
  0x25   :  { %543 = vmatprep.mubr.bf16.mxu1 %v801_v37 }
  0x2b   :  { %463 = vmatmul.mubr.bf16.gmra.mxu0 %v803_v38 }
  0x2c   :  { %544 = vmatmul.mubr.bf16.gmra.mxu1 %v804_v39  ;;  %470 = vmatprep.mubr.bf16.mxu0 %v805_v40 }
  0x2d   :  { %551 = vmatprep.mubr.bf16.mxu1 %v807_v41 }
  0x33   :  { %471 = vmatmul.mubr.bf16.gmra.mxu0 %v809_v42 }
  0x34   :  { %552 = vmatmul.mubr.bf16.gmra.mxu1 %v810_v43  ;;  %478 = vmatprep.mubr.bf16.mxu0 %v811_v44 }
  0x35   :  { %559 = vmatprep.mubr.bf16.mxu1 %v813_v45 }
  0x3b   :  { %479 = vmatmul.mubr.bf16.gmra.mxu0 %v815_v46 }
  0x3c   :  { %560 = vmatmul.mubr.bf16.gmra.mxu1 %v816_v47  ;;  %486 = vmatprep.mubr.bf16.mxu0 %v817_v48 }
  0x3d   :  { %567 = vmatprep.mubr.bf16.mxu1 %v819_v49 }
  0x43   :  { %487 = vmatmul.mubr.bf16.gmra.mxu0 %v821_v50 }
  0x44   :  { %568 = vmatmul.mubr.bf16.gmra.mxu1 %v822_v51  ;;  %494 = vmatprep.mubr.bf16.mxu0 %v823_v52 }
  0x45   :  { %575 = vmatprep.mubr.bf16.mxu1 %v825_v53 }
  0x4b   :  { %495 = vmatmul.mubr.bf16.gmra.mxu0 %v827_v54 }
  0x4c   :  { %576 = vmatmul.mubr.bf16.gmra.mxu1 %v828_v55 }
  0xe3   :  { %v673_v56 = vpop.f32.mrf.mxu0 }
  0xe4   :  { %v725_v57 = vpop.f32.mrf.mxu1 }
  0xe5   :  { %v674_v59 = vpop.f32.mrf.mxu0 }
  0xe6   :  { %v675_v60 = vadd.f32 %v674_v59, %v673_v56  ;;  %v726_v61 = vpop.f32.mrf.mxu1 }
  0xe7   :  { %v676_v62 = vpop.f32.mrf.mxu0  ;;  %v727_v0 = vadd.f32 %v726_v61, %v725_v57 }
  0xe8   :  { %v457_v63 = vadd.f32 %v675_v60, %v1020_v58  ;;  %v728_v1 = vpop.f32.mrf.mxu1 }
  0xe9   :  { %v677_v2 = vpop.f32.mrf.mxu0 }
  0xea   :  { %v538_v3 = vadd.f32 %v727_v0, %v457_v63  ;;  %v678_v4 = vadd.f32 %v677_v2, %v676_v62  ;;  %v729_v5 = vpop.f32.mrf.mxu1 }
  0xeb   :  { %v679_v6 = vpop.f32.mrf.mxu0  ;;  %v730_v8 = vadd.f32 %v729_v5, %v728_v1 }
  0xec   :  { %584 = vst [vmem:[%s1073_s3] sm:$0xff] %v538_v3  ;;  %v460_v7 = vadd.f32 %v678_v4, %v1020_v58  ;;  %v731_v9 = vpop.f32.mrf.mxu1 }
  0xed   :  { %v680_v10 = vpop.f32.mrf.mxu0 }
  0xee   :  { %v541_v11 = vadd.f32 %v730_v8, %v460_v7  ;;  %v681_v12 = vadd.f32 %v680_v10, %v679_v6  ;;  %v732_v13 = vpop.f32.mrf.mxu1 }
  0xef   :  { %v682_v14 = vpop.f32.mrf.mxu0  ;;  %v733_v16 = vadd.f32 %v732_v13, %v731_v9 }
  0xf0   :  { %585 = vst [vmem:[%s1073_s3 + $0x8] sm:$0xff] %v541_v11  ;;  %v465_v15 = vadd.f32 %v681_v12, %v1020_v58  ;;  %v734_v17 = vpop.f32.mrf.mxu1 }
  0xf1   :  { %v683_v18 = vpop.f32.mrf.mxu0 }
  0xf2   :  { %v546_v19 = vadd.f32 %v733_v16, %v465_v15  ;;  %v684_v20 = vadd.f32 %v683_v18, %v682_v14  ;;  %v735_v21 = vpop.f32.mrf.mxu1 }
  0xf3   :  { %v685_v22 = vpop.f32.mrf.mxu0  ;;  %v736_v24 = vadd.f32 %v735_v21, %v734_v17 }
  0xf4   :  { %586 = vst [vmem:[%s1073_s3 + $0x10] sm:$0xff] %v546_v19  ;;  %v468_v23 = vadd.f32 %v684_v20, %v1020_v58  ;;  %v737_v25 = vpop.f32.mrf.mxu1 }
  0xf5   :  { %v686_v26 = vpop.f32.mrf.mxu0 }
  0xf6   :  { %v549_v27 = vadd.f32 %v736_v24, %v468_v23  ;;  %v687_v28 = vadd.f32 %v686_v26, %v685_v22  ;;  %v738_v29 = vpop.f32.mrf.mxu1 }
  0xf7   :  { %v688_v30 = vpop.f32.mrf.mxu0  ;;  %v739_v32 = vadd.f32 %v738_v29, %v737_v25 }
  0xf8   :  { %587 = vst [vmem:[%s1073_s3 + $0x18] sm:$0xff] %v549_v27  ;;  %v473_v31 = vadd.f32 %v687_v28, %v1020_v58  ;;  %v740_v33 = vpop.f32.mrf.mxu1 }
  0xf9   :  { %v689_v34 = vpop.f32.mrf.mxu0 }
  0xfa   :  { %v554_v35 = vadd.f32 %v739_v32, %v473_v31  ;;  %v690_v36 = vadd.f32 %v689_v34, %v688_v30  ;;  %v741_v37 = vpop.f32.mrf.mxu1 }
  0xfb   :  { %v691_v38 = vpop.f32.mrf.mxu0  ;;  %v742_v40 = vadd.f32 %v741_v37, %v740_v33 }
  0xfc   :  { %588 = vst [vmem:[%s1073_s3 + $0x20] sm:$0xff] %v554_v35  ;;  %v476_v39 = vadd.f32 %v690_v36, %v1020_v58  ;;  %v743_v41 = vpop.f32.mrf.mxu1 }
  0xfd   :  { %v692_v42 = vpop.f32.mrf.mxu0 }
  0xfe   :  { %v557_v43 = vadd.f32 %v742_v40, %v476_v39  ;;  %v693_v44 = vadd.f32 %v692_v42, %v691_v38  ;;  %v744_v45 = vpop.f32.mrf.mxu1 }
  0xff   :  { %v694_v46 = vpop.f32.mrf.mxu0  ;;  %v745_v48 = vadd.f32 %v744_v45, %v743_v41 }
 0x100   :  { %589 = vst [vmem:[%s1073_s3 + $0x28] sm:$0xff] %v557_v43  ;;  %v481_v47 = vadd.f32 %v693_v44, %v1020_v58  ;;  %v746_v49 = vpop.f32.mrf.mxu1 }
 0x101   :  { %v695_v50 = vpop.f32.mrf.mxu0 }
 0x102   :  { %v562_v51 = vadd.f32 %v745_v48, %v481_v47  ;;  %v696_v52 = vadd.f32 %v695_v50, %v694_v46  ;;  %v747_v53 = vpop.f32.mrf.mxu1 }
 0x103   :  { %v697_v54 = vpop.f32.mrf.mxu0  ;;  %v748_v56 = vadd.f32 %v747_v53, %v746_v49 }
 0x104   :  { %590 = vst [vmem:[%s1073_s3 + $0x30] sm:$0xff] %v562_v51  ;;  %v484_v55 = vadd.f32 %v696_v52, %v1020_v58  ;;  %v749_v57 = vpop.f32.mrf.mxu1 }
 0x105   :  { %v698_v59 = vpop.f32.mrf.mxu0 }
 0x106   :  { %v565_v60 = vadd.f32 %v748_v56, %v484_v55  ;;  %v699_v61 = vadd.f32 %v698_v59, %v697_v54  ;;  %v750_v62 = vpop.f32.mrf.mxu1 }
 0x107   :  { %v700_v63 = vpop.f32.mrf.mxu0  ;;  %v751_v1 = vadd.f32 %v750_v62, %v749_v57 }
 0x108   :  { %591 = vst [vmem:[%s1073_s3 + $0x38] sm:$0xff] %v565_v60  ;;  %v489_v0 = vadd.f32 %v699_v61, %v1020_v58  ;;  %v752_v2 = vpop.f32.mrf.mxu1 }
 0x109   :  { %v701_v3 = vpop.f32.mrf.mxu0 }
 0x10a   :  { %v570_v4 = vadd.f32 %v751_v1, %v489_v0  ;;  %v702_v5 = vadd.f32 %v701_v3, %v700_v63  ;;  %v753_v6 = vpop.f32.mrf.mxu1 }
 0x10b   :  { %v703_v7 = vpop.f32.mrf.mxu0  ;;  %v754_v9 = vadd.f32 %v753_v6, %v752_v2 }
 0x10c   :  { %592 = vst [vmem:[%s1073_s3 + $0x40] sm:$0xff] %v570_v4  ;;  %v492_v8 = vadd.f32 %v702_v5, %v1020_v58  ;;  %v755_v10 = vpop.f32.mrf.mxu1 }
 0x10d   :  { %v704_v11 = vpop.f32.mrf.mxu0 }
 0x10e   :  { %v573_v12 = vadd.f32 %v754_v9, %v492_v8  ;;  %v705_v13 = vadd.f32 %v704_v11, %v703_v7  ;;  %v756_v14 = vpop.f32.mrf.mxu1 }
 0x10f   :  { %v706_v15 = vpop.f32.mrf.mxu0  ;;  %v757_v17 = vadd.f32 %v756_v14, %v755_v10 }
 0x110   :  { %593 = vst [vmem:[%s1073_s3 + $0x48] sm:$0xff] %v573_v12  ;;  %v497_v16 = vadd.f32 %v705_v13, %v1020_v58  ;;  %v758_v18 = vpop.f32.mrf.mxu1 }
 0x111   :  { %v707_v19 = vpop.f32.mrf.mxu0 }
 0x112   :  { %v578_v20 = vadd.f32 %v757_v17, %v497_v16  ;;  %v708_v21 = vadd.f32 %v707_v19, %v706_v15  ;;  %v759_v22 = vpop.f32.mrf.mxu1 }
 0x113   :  { %v760_v24 = vadd.f32 %v759_v22, %v758_v18 }
 0x114   :  { %594 = vst [vmem:[%s1073_s3 + $0x50] sm:$0xff] %v578_v20  ;;  %v500_v23 = vadd.f32 %v708_v21, %v1020_v58 }
 0x116   :  { %v581_v25 = vadd.f32 %v760_v24, %v500_v23 }
 0x118   :  { %595 = vst [vmem:[%s1073_s3 + $0x58] sm:$0xff] %v581_v25 }

// kernel: vision_network_forward.6
= control target key start
LH: loop header
LB: loop body
LE: loop exit
PB: predicated region body
PF: predicated region fallthrough
CT: control target
= control target key end

     0   :  { %vm1087_vm0 = vcmask 523264   ;;  %s3341_s1 = inlined_call_operand.vmem [shape: bf16[576,512], index: 1, kind: input, shape index: {}]   ;;  %s3342_s0 = inlined_call_operand.vmem [shape: bf16[96,576], index: 0, kind: input, shape index: {}]   ;;  %s3343_s2 = inlined_call_operand.vmem [shape: f32[1,512], index: 2, kind: input, shape index: {}]   ;;  %s3344_s3 = inlined_call_operand.vmem [shape: bf16[96,512], index: 3, kind: output, shape index: {}]  }
   0x1   :  { %v2071_v0 = vld [vmem:[%s3341_s1 + $0xe4] ss:$16 sps:$4 sm:$0xff]   ;;  %v2075_v2 = vld [vmem:[%s3341_s1 + $0xe0] ss:$16 sps:$4 sm:$0xff]  }
   0x2   :  { %v2073_v1 = vld [vmem:[%s3341_s1 + $0x2e4] ss:$16 sps:$4 sm:$0xff]   ;;  %1106 = vmatprep.subr.bf16.mxu0 %v2071_v0  ;;  %v2076_v3 = vld [vmem:[%s3341_s1 + $0x2e0] ss:$16 sps:$4 sm:$0xff]  }
   0x3   :  { %1199 = vmatprep.subr.bf16.mxu1 %v2073_v1  ;;  %v2077_v4 = vld [vmem:[%s3341_s1 + $0xc4] ss:$16 sps:$4 sm:$0xff]   ;;  %1107 = vmatpush1.bf16.msra.mxu0 %v2075_v2  ;;  %v2081_v6 = vld [vmem:[%s3341_s1 + $0xc0] ss:$16 sps:$4 sm:$0xff]  }
   0x4   :  { %1200 = vmatpush1.bf16.msra.mxu1 %v2076_v3  ;;  %v2079_v5 = vld [vmem:[%s3341_s1 + $0x2c4] ss:$16 sps:$4 sm:$0xff]   ;;  %1108 = vmatprep.subr.bf16.mxu0 %v2077_v4  ;;  %v2082_v7 = vld [vmem:[%s3341_s1 + $0x2c0] ss:$16 sps:$4 sm:$0xff]   ;;  %v2178_v3 = vld [vmem:[%s3341_s1 + $0xec] ss:$16 sps:$4 sm:$0xff]  }
   0x5   :  { %1201 = vmatprep.subr.bf16.mxu1 %v2079_v5  ;;  %v2083_v8 = vld [vmem:[%s3341_s1 + $0xa4] ss:$16 sps:$4 sm:$0xff]   ;;  %v2087_v10 = vld [vmem:[%s3341_s1 + $0xa0] ss:$16 sps:$4 sm:$0xff]   ;;  %v2568_v5 = vld [vmem:[%s3342_s0 + $0x8] ss:$20 sps:$4 sm:$0xff]  }
   0x6   :  { %v2085_v9 = vld [vmem:[%s3341_s1 + $0x2a4] ss:$16 sps:$4 sm:$0xff]   ;;  %v2088_v11 = vld [vmem:[%s3341_s1 + $0x2a0] ss:$16 sps:$4 sm:$0xff]  }
   0x7   :  { %1109 = vmatpush1.bf16.msra.mxu0 %v2081_v6  ;;  %v2089_v12 = vld [vmem:[%s3341_s1 + $0x84] ss:$16 sps:$4 sm:$0xff]   ;;  %v2093_v14 = vld [vmem:[%s3341_s1 + $0x80] ss:$16 sps:$4 sm:$0xff]  }
   0x8   :  { %1202 = vmatpush1.bf16.msra.mxu1 %v2082_v7  ;;  %1110 = vmatprep.subr.bf16.mxu0 %v2083_v8  ;;  %v2091_v13 = vld [vmem:[%s3341_s1 + $0x284] ss:$16 sps:$4 sm:$0xff]   ;;  %v2094_v15 = vld [vmem:[%s3341_s1 + $0x280] ss:$16 sps:$4 sm:$0xff]   ;;  %v2176_v7 = vld [vmem:[%s3341_s1 + $0xe8] ss:$16 sps:$4 sm:$0xff]  }
   0x9   :  { %1203 = vmatprep.subr.bf16.mxu1 %v2085_v9  ;;  %v2095_v16 = vld [vmem:[%s3341_s1 + $0x64] ss:$16 sps:$4 sm:$0xff]   ;;  %v2099_v18 = vld [vmem:[%s3341_s1 + $0x60] ss:$16 sps:$4 sm:$0xff]   ;;  %v2181_v8 = vld [vmem:[%s3341_s1 + $0xcc] ss:$16 sps:$4 sm:$0xff]  }
   0xa   :  { %v2097_v17 = vld [vmem:[%s3341_s1 + $0x264] ss:$16 sps:$4 sm:$0xff]   ;;  %v2100_v19 = vld [vmem:[%s3341_s1 + $0x260] ss:$16 sps:$4 sm:$0xff]  }
   0xb   :  { %1111 = vmatpush1.bf16.msra.mxu0 %v2087_v10  ;;  %v2101_v20 = vld [vmem:[%s3341_s1 + $0x44] ss:$16 sps:$4 sm:$0xff]   ;;  %v2105_v22 = vld [vmem:[%s3341_s1 + $0x40] ss:$16 sps:$4 sm:$0xff]  }
   0xc   :  { %1204 = vmatpush1.bf16.msra.mxu1 %v2088_v11  ;;  %1112 = vmatprep.subr.bf16.mxu0 %v2089_v12  ;;  %v2103_v21 = vld [vmem:[%s3341_s1 + $0x244] ss:$16 sps:$4 sm:$0xff]   ;;  %v2106_v23 = vld [vmem:[%s3341_s1 + $0x240] ss:$16 sps:$4 sm:$0xff]   ;;  %v2179_v12 = vld [vmem:[%s3341_s1 + $0xc8] ss:$16 sps:$4 sm:$0xff]  }
   0xd   :  { %1205 = vmatprep.subr.bf16.mxu1 %v2091_v13  ;;  %v2107_v24 = vld [vmem:[%s3341_s1 + $0x24] ss:$16 sps:$4 sm:$0xff]   ;;  %v2111_v26 = vld [vmem:[%s3341_s1 + $0x20] ss:$16 sps:$4 sm:$0xff]   ;;  %v2187_v13 = vld [vmem:[%s3341_s1 + $0xac] ss:$16 sps:$4 sm:$0xff]  }
   0xe   :  { %v2109_v25 = vld [vmem:[%s3341_s1 + $0x224] ss:$16 sps:$4 sm:$0xff]   ;;  %v2112_v27 = vld [vmem:[%s3341_s1 + $0x220] ss:$16 sps:$4 sm:$0xff]  }
   0xf   :  { %1113 = vmatpush1.bf16.msra.mxu0 %v2093_v14  ;;  %v2113_v28 = vld [vmem:[%s3341_s1 + $0x4] ss:$16 sps:$4 sm:$0xff]   ;;  %v2117_v30 = vld [vmem:[%s3341_s1] ss:$16 sps:$4 sm:$0xff]  }
  0x10   :  { %1206 = vmatpush1.bf16.msra.mxu1 %v2094_v15  ;;  %1114 = vmatprep.subr.bf16.mxu0 %v2095_v16  ;;  %v2115_v29 = vld [vmem:[%s3341_s1 + $0x204] ss:$16 sps:$4 sm:$0xff]   ;;  %v2118_v31 = vld [vmem:[%s3341_s1 + $0x200] ss:$16 sps:$4 sm:$0xff]   ;;  %v2610_v16 = vld [vmem:[%s3342_s0 + $0x28] ss:$20 sps:$4 sm:$0xff]  }
  0x11   :  { %1207 = vmatprep.subr.bf16.mxu1 %v2097_v17  ;;  %v2119_v32 = vld [vmem:[%s3341_s1 + $0x1e4] ss:$16 sps:$4 sm:$0xff]   ;;  %v2123_v34 = vld [vmem:[%s3341_s1 + $0x1e0] ss:$16 sps:$4 sm:$0xff]   ;;  %v2185_v17 = vld [vmem:[%s3341_s1 + $0xa8] ss:$16 sps:$4 sm:$0xff]  }
  0x12   :  { %v2121_v33 = vld [vmem:[%s3341_s1 + $0x3e4] ss:$16 sps:$4 sm:$0xff]   ;;  %v2124_v35 = vld [vmem:[%s3341_s1 + $0x3e0] ss:$16 sps:$4 sm:$0xff]  }
  0x13   :  { %1115 = vmatpush1.bf16.msra.mxu0 %v2099_v18  ;;  %v2125_v36 = vld [vmem:[%s3341_s1 + $0x1c4] ss:$16 sps:$4 sm:$0xff]   ;;  %v2129_v38 = vld [vmem:[%s3341_s1 + $0x1c0] ss:$16 sps:$4 sm:$0xff]  }
  0x14   :  { %1208 = vmatpush1.bf16.msra.mxu1 %v2100_v19  ;;  %1116 = vmatprep.subr.bf16.mxu0 %v2101_v20  ;;  %v2127_v37 = vld [vmem:[%s3341_s1 + $0x3c4] ss:$16 sps:$4 sm:$0xff]   ;;  %v2130_v39 = vld [vmem:[%s3341_s1 + $0x3c0] ss:$16 sps:$4 sm:$0xff]   ;;  %v2196_v19 = vld [vmem:[%s3341_s1 + $0x8c] ss:$16 sps:$4 sm:$0xff]  }
  0x15   :  { %1209 = vmatprep.subr.bf16.mxu1 %v2103_v21  ;;  %v2131_v40 = vld [vmem:[%s3341_s1 + $0x1a4] ss:$16 sps:$4 sm:$0xff]   ;;  %v2135_v42 = vld [vmem:[%s3341_s1 + $0x1a0] ss:$16 sps:$4 sm:$0xff]  }
  0x16   :  { %v2133_v41 = vld [vmem:[%s3341_s1 + $0x3a4] ss:$16 sps:$4 sm:$0xff]   ;;  %v2136_v43 = vld [vmem:[%s3341_s1 + $0x3a0] ss:$16 sps:$4 sm:$0xff]  }
  0x17   :  { %1117 = vmatpush1.bf16.msra.mxu0 %v2105_v22  ;;  %v2137_v44 = vld [vmem:[%s3341_s1 + $0x184] ss:$16 sps:$4 sm:$0xff]   ;;  %v2141_v46 = vld [vmem:[%s3341_s1 + $0x180] ss:$16 sps:$4 sm:$0xff]  }
  0x18   :  { %1210 = vmatpush1.bf16.msra.mxu1 %v2106_v23  ;;  %1118 = vmatprep.subr.bf16.mxu0 %v2107_v24  ;;  %v2139_v45 = vld [vmem:[%s3341_s1 + $0x384] ss:$16 sps:$4 sm:$0xff]   ;;  %v2142_v47 = vld [vmem:[%s3341_s1 + $0x380] ss:$16 sps:$4 sm:$0xff]   ;;  %v2194_v24 = vld [vmem:[%s3341_s1 + $0x88] ss:$16 sps:$4 sm:$0xff]  }
  0x19   :  { %1211 = vmatprep.subr.bf16.mxu1 %v2109_v25  ;;  %v2143_v48 = vld [vmem:[%s3341_s1 + $0x164] ss:$16 sps:$4 sm:$0xff]   ;;  %v2508_v51 = vld [vmem:[%s3342_s0 + $0xc] ss:$20 sps:$4 sm:$0xff]   ;;  %v2632_v21 = vld [vmem:[%s3342_s0 + $0x5c] ss:$20 sps:$4 sm:$0xff]  }
  0x1a   :  { %v2500_v49 = vld [vmem:[%s3342_s0 + $0x4] ss:$20 sps:$4 sm:$0xff]   ;;  %v2147_v52 = vld [vmem:[%s3341_s1 + $0x160] ss:$16 sps:$4 sm:$0xff]   ;;  %1231 = vmatprep.mubr.bf16.mxu1 %v2508_v51  ;;  %v2587_v10 = vld [vmem:[%s3342_s0 + $0x34] ss:$20 sps:$4 sm:$0xff]  }
  0x1b   :  { %1119 = vmatpush1.bf16.msra.mxu0 %v2111_v26  ;;  %v2145_v50 = vld [vmem:[%s3341_s1 + $0x364] ss:$16 sps:$4 sm:$0xff]   ;;  %1138 = vmatprep.mubr.bf16.mxu0 %v2500_v49  ;;  %v2148_v53 = vld [vmem:[%s3341_s1 + $0x360] ss:$16 sps:$4 sm:$0xff]   ;;  %v2202_v26 = vld [vmem:[%s3341_s1 + $0x6c] ss:$16 sps:$4 sm:$0xff]  }
  0x1c   :  { %1212 = vmatpush1.bf16.msra.mxu1 %v2112_v27  ;;  %1120 = vmatprep.subr.bf16.mxu0 %v2113_v28  ;;  %v2149_v54 = vld [vmem:[%s3341_s1 + $0x144] ss:$16 sps:$4 sm:$0xff]   ;;  %v2153_v56 = vld [vmem:[%s3341_s1 + $0x140] ss:$16 sps:$4 sm:$0xff]   ;;  %v2200_v27 = vld [vmem:[%s3341_s1 + $0x68] ss:$16 sps:$4 sm:$0xff]  }
  0x1d   :  { %1213 = vmatprep.subr.bf16.mxu1 %v2115_v29  ;;  %v2151_v55 = vld [vmem:[%s3341_s1 + $0x344] ss:$16 sps:$4 sm:$0xff]   ;;  %v2154_v57 = vld [vmem:[%s3341_s1 + $0x340] ss:$16 sps:$4 sm:$0xff]   ;;  %v2664_v29 = vld [vmem:[%s3342_s0 + $0x58] ss:$20 sps:$4 sm:$0xff]  }
  0x1e   :  { %v2155_v58 = vld [vmem:[%s3341_s1 + $0x124] ss:$16 sps:$4 sm:$0xff]   ;;  %v2159_v60 = vld [vmem:[%s3341_s1 + $0x120] ss:$16 sps:$4 sm:$0xff]  }
  0x1f   :  { %1121 = vmatpush1.bf16.msra.mxu0 %v2117_v30  ;;  %v2157_v59 = vld [vmem:[%s3341_s1 + $0x324] ss:$16 sps:$4 sm:$0xff]   ;;  %v2160_v61 = vld [vmem:[%s3341_s1 + $0x320] ss:$16 sps:$4 sm:$0xff]   ;;  %v2208_v30 = vld [vmem:[%s3341_s1 + $0x4c] ss:$16 sps:$4 sm:$0xff]  }
  0x20   :  { %1214 = vmatpush1.bf16.msra.mxu1 %v2118_v31  ;;  %1122 = vmatprep.subr.bf16.mxu0 %v2119_v32  ;;  %v2161_v62 = vld [vmem:[%s3341_s1 + $0x104] ss:$16 sps:$4 sm:$0xff]   ;;  %v2165_v0 = vld [vmem:[%s3341_s1 + $0x100] ss:$16 sps:$4 sm:$0xff]  }
  0x21   :  { %1215 = vmatprep.subr.bf16.mxu1 %v2121_v33  ;;  %v2163_v63 = vld [vmem:[%s3341_s1 + $0x304] ss:$16 sps:$4 sm:$0xff]   ;;  %v2166_v1 = vld [vmem:[%s3341_s1 + $0x300] ss:$16 sps:$4 sm:$0xff]   ;;  %v2253_v33 = vld [vmem:[%s3341_s1 + $0x2ec] ss:$16 sps:$4 sm:$0xff]  }
  0x22   :  { %v2175_v2 = vld [vmem:[%s3341_s1 + $0x464] ss:$16 sps:$4 sm:$0xff]   ;;  %v2173_v6 = vld [vmem:[%s3341_s1 + $0x460] ss:$16 sps:$4 sm:$0xff]  }
  0x23   :  { %1123 = vmatpush2.bf16.msra.mxu0 %v2123_v34  ;;  %v2563_v4 = vld [vmem:[%s3342_s0] ss:$20 sps:$4 sm:$0xff]   ;;  %v2619_v18 = vld [vmem:[%s3342_s0 + $0x30] ss:$20 sps:$4 sm:$0xff]   ;;  %v2206_v34 = vld [vmem:[%s3341_s1 + $0x48] ss:$16 sps:$4 sm:$0xff]  }
  0x24   :  { %1216 = vmatpush2.bf16.msra.mxu1 %v2124_v35  ;;  %1124 = vmatprep.subr.bf16.mxu0 %v2125_v36  ;;  %v2582_v9 = vld [vmem:[%s3342_s0 + $0x2c] ss:$20 sps:$4 sm:$0xff]   ;;  %v2193_v11 = vld [vmem:[%s3341_s1 + $0x444] ss:$16 sps:$4 sm:$0xff]   ;;  %v2672_v31 = vld [vmem:[%s3342_s0 + $0x7c] ss:$20 sps:$4 sm:$0xff]  }
  0x25   :  { %1217 = vmatprep.subr.bf16.mxu1 %v2127_v37  ;;  %v2191_v14 = vld [vmem:[%s3341_s1 + $0x440] ss:$16 sps:$4 sm:$0xff]   ;;  %v2214_v15 = vld [vmem:[%s3341_s1 + $0x424] ss:$16 sps:$4 sm:$0xff]   ;;  %v2217_v35 = vld [vmem:[%s3341_s1 + $0x2c] ss:$16 sps:$4 sm:$0xff]  }
  0x26   :  { %v2627_v20 = vld [vmem:[%s3342_s0 + $0x54] ss:$20 sps:$4 sm:$0xff]   ;;  %v2212_v22 = vld [vmem:[%s3341_s1 + $0x420] ss:$16 sps:$4 sm:$0xff]   ;;  %v2677_v32 = vld [vmem:[%s3342_s0 + $0x84] ss:$20 sps:$4 sm:$0xff]  }
  0x27   :  { %1125 = vmatpush2.bf16.msra.mxu0 %v2129_v38  ;;  %v2235_v23 = vld [vmem:[%s3341_s1 + $0x404] ss:$16 sps:$4 sm:$0xff]   ;;  %v2233_v28 = vld [vmem:[%s3341_s1 + $0x400] ss:$16 sps:$4 sm:$0xff]   ;;  %v2695_v36 = vld [vmem:[%s3342_s0 + $0x78] ss:$20 sps:$4 sm:$0xff]  }
  0x28   :  { %1218 = vmatpush2.bf16.msra.mxu1 %v2130_v39  ;;  %1126 = vmatprep.subr.bf16.mxu0 %v2131_v40  ;;  %v2649_v25 = vld [vmem:[%s3342_s0 + $0x50] ss:$20 sps:$4 sm:$0xff]   ;;  %v2215_v37 = vld [vmem:[%s3341_s1 + $0x28] ss:$16 sps:$4 sm:$0xff]   ;;  %v2703_v38 = vld [vmem:[%s3342_s0 + $0x80] ss:$20 sps:$4 sm:$0xff]  }
  0x29   :  { %1219 = vmatprep.subr.bf16.mxu1 %v2133_v41  ;;  %v2708_v39 = vld [vmem:[%s3342_s0 + $0xa4] ss:$20 sps:$4 sm:$0xff]   ;;  %v2223_v40 = vld [vmem:[%s3341_s1 + $0xc] ss:$16 sps:$4 sm:$0xff]  }
  0x2a   :  { %v2716_v41 = vld [vmem:[%s3342_s0 + $0xac] ss:$20 sps:$4 sm:$0xff]  }
  0x2b   :  { %1127 = vmatpush2.bf16.msra.mxu0 %v2135_v42  ;;  %v2221_v42 = vld [vmem:[%s3341_s1 + $0x8] ss:$16 sps:$4 sm:$0xff]  }
  0x2c   :  { %1220 = vmatpush2.bf16.msra.mxu1 %v2136_v43  ;;  %1128 = vmatprep.subr.bf16.mxu0 %v2137_v44  ;;  %v2727_v43 = vld [vmem:[%s3342_s0 + $0xa0] ss:$20 sps:$4 sm:$0xff]   ;;  %v2229_v44 = vld [vmem:[%s3341_s1 + $0x1ec] ss:$16 sps:$4 sm:$0xff]  }
  0x2d   :  { %1221 = vmatprep.subr.bf16.mxu1 %v2139_v45  ;;  %v2227_v45 = vld [vmem:[%s3341_s1 + $0x1e8] ss:$16 sps:$4 sm:$0xff]  }
  0x2f   :  { %1129 = vmatpush2.bf16.msra.mxu0 %v2141_v46  ;;  %v2739_v46 = vld [vmem:[%s3342_s0 + $0xa8] ss:$20 sps:$4 sm:$0xff]  }
  0x30   :  { %1222 = vmatpush2.bf16.msra.mxu1 %v2142_v47  ;;  %1130 = vmatprep.subr.bf16.mxu0 %v2143_v48  ;;  %v2744_v47 = vld [vmem:[%s3342_s0 + $0xcc] ss:$20 sps:$4 sm:$0xff]  }
  0x31   :  { %1223 = vmatprep.subr.bf16.mxu1 %v2145_v50  ;;  %v2238_v48 = vld [vmem:[%s3341_s1 + $0x1cc] ss:$16 sps:$4 sm:$0xff]   ;;  %v2752_v50 = vld [vmem:[%s3342_s0 + $0xd4] ss:$20 sps:$4 sm:$0xff]  }
  0x33   :  { %1131 = vmatpush2.bf16.msra.mxu0 %v2147_v52  ;;  %v2236_v52 = vld [vmem:[%s3341_s1 + $0x1c8] ss:$16 sps:$4 sm:$0xff]  }
  0x34   :  { %1224 = vmatpush2.bf16.msra.mxu1 %v2148_v53  ;;  %1132 = vmatprep.subr.bf16.mxu0 %v2149_v54  ;;  %v2244_v53 = vld [vmem:[%s3341_s1 + $0x1ac] ss:$16 sps:$4 sm:$0xff]  }
  0x35   :  { %1225 = vmatprep.subr.bf16.mxu1 %v2151_v55  ;;  %v2767_v54 = vld [vmem:[%s3342_s0 + $0xc8] ss:$20 sps:$4 sm:$0xff]   ;;  %v2772_v55 = vld [vmem:[%s3342_s0 + $0xd0] ss:$20 sps:$4 sm:$0xff]  }
  0x37   :  { %1133 = vmatpush2.bf16.msra.mxu0 %v2153_v56  ;;  %v2242_v56 = vld [vmem:[%s3341_s1 + $0x1a8] ss:$16 sps:$4 sm:$0xff]  }
  0x38   :  { %1226 = vmatpush2.bf16.msra.mxu1 %v2154_v57  ;;  %1134 = vmatprep.subr.bf16.mxu0 %v2155_v58  ;;  %v2250_v57 = vld [vmem:[%s3341_s1 + $0x18c] ss:$16 sps:$4 sm:$0xff]   ;;  %v2248_v58 = vld [vmem:[%s3341_s1 + $0x188] ss:$16 sps:$4 sm:$0xff]  }
  0x39   :  { %1227 = vmatprep.subr.bf16.mxu1 %v2157_v59  ;;  %v2329_v59 = vmov 0  }
  0x3b   :  { %1135 = vmatpush2.bf16.msra.mxu0 %v2159_v60  ;;  %v2257_v60 = vld [vmem:[%s3341_s1 + $0x16c] ss:$16 sps:$4 sm:$0xff]  }
  0x3c   :  { %1228 = vmatpush2.bf16.msra.mxu1 %v2160_v61  ;;  %1136 = vmatprep.subr.bf16.mxu0 %v2161_v62  ;;  %v2793_v61 = vld [vmem:[%s3342_s0 + $0x10] ss:$20 sps:$4 sm:$0xff]   ;;  %v2251_v62 = vld [vmem:[%s3341_s1 + $0x2e8] ss:$16 sps:$4 sm:$0xff]  }
  0x3d   :  { %1229 = vmatprep.subr.bf16.mxu1 %v2163_v63  ;;  %v2255_v63 = vld [vmem:[%s3341_s1 + $0x168] ss:$16 sps:$4 sm:$0xff]  }
  0x3f   :  { %1137 = vmatpush2.bf16.msra.mxu0 %v2165_v0  ;;  %v2263_v0 = vld [vmem:[%s3341_s1 + $0x14c] ss:$16 sps:$4 sm:$0xff]  }
  0x40   :  { %1230 = vmatpush2.bf16.msra.mxu1 %v2166_v1  ;;  %1300 = vmatprep.subr.bf16.mxu0 %v2175_v2  ;;  %v2258_v1 = vld [vmem:[%s3341_s1 + $0x2c8] ss:$16 sps:$4 sm:$0xff]  }
  0x41   :  { %1385 = vmatprep.subr.bf16.mxu1 %v2178_v3  ;;  %v2261_v2 = vld [vmem:[%s3341_s1 + $0x148] ss:$16 sps:$4 sm:$0xff]   ;;  %v2266_v3 = vld [vmem:[%s3341_s1 + $0x2ac] ss:$16 sps:$4 sm:$0xff]  }
  0x42   :  { %1139 = vmatmul.mubr.bf16.vlgmr.msra.gmra.mxu0 %v2563_v4 }
  0x43   :  { %1232 = vmatmul.mubr.bf16.vlgmr.msra.gmra.mxu1 %v2568_v5  ;;  %1301 = vmatpush1.bf16.msra.mxu0 %v2173_v6  ;;  %v2270_v6 = vld [vmem:[%s3341_s1 + $0x12c] ss:$16 sps:$4 sm:$0xff]  }
  0x44   :  { %1386 = vmatpush1.bf16.msra.mxu1 %v2176_v7  ;;  %1148 = vmatprep.mubr.bf16.mxu0 %v2582_v9  ;;  %v2825_v7 = vld [vmem:[%s3342_s0 + $0x38] ss:$20 sps:$4 sm:$0xff]  }
  0x45   :  { %1387 = vmatprep.subr.bf16.mxu1 %v2181_v8  ;;  %1241 = vmatprep.mubr.bf16.mxu1 %v2587_v10  ;;  %v2264_v8 = vld [vmem:[%s3341_s1 + $0x2a8] ss:$16 sps:$4 sm:$0xff]  }
  0x46   :  { %1302 = vmatprep.subr.bf16.mxu0 %v2193_v11  ;;  %v2268_v11 = vld [vmem:[%s3341_s1 + $0x128] ss:$16 sps:$4 sm:$0xff]  }
  0x47   :  { %1303 = vmatpush1.bf16.msra.mxu0 %v2191_v14  ;;  %v2271_v14 = vld [vmem:[%s3341_s1 + $0x288] ss:$16 sps:$4 sm:$0xff]  }
  0x48   :  { %1388 = vmatpush1.bf16.msra.mxu1 %v2179_v12  ;;  %1304 = vmatprep.subr.bf16.mxu0 %v2214_v15  ;;  %v2273_v12 = vld [vmem:[%s3341_s1 + $0x28c] ss:$16 sps:$4 sm:$0xff]   ;;  %v2274_v15 = vld [vmem:[%s3341_s1 + $0x108] ss:$16 sps:$4 sm:$0xff]  }
  0x49   :  { %1389 = vmatprep.subr.bf16.mxu1 %v2187_v13  ;;  %v2276_v13 = vld [vmem:[%s3341_s1 + $0x10c] ss:$16 sps:$4 sm:$0xff]  }
  0x4a   :  { %1149 = vmatmul.mubr.bf16.gmra.mxu0 %v2610_v16 }
  0x4b   :  { %1242 = vmatmul.mubr.bf16.gmra.mxu1 %v2619_v18  ;;  %1158 = vmatprep.mubr.bf16.mxu0 %v2627_v20 }
  0x4c   :  { %1390 = vmatpush1.bf16.msra.mxu1 %v2185_v17  ;;  %1251 = vmatprep.mubr.bf16.mxu1 %v2632_v21  ;;  %v2279_v17 = vld [vmem:[%s3341_s1 + $0x26c] ss:$16 sps:$4 sm:$0xff]  }
  0x4d   :  { %1391 = vmatprep.subr.bf16.mxu1 %v2196_v19  ;;  %1305 = vmatpush1.bf16.msra.mxu0 %v2212_v22  ;;  %v2283_v19 = vld [vmem:[%s3341_s1 + $0x46c] ss:$16 sps:$4 sm:$0xff]   ;;  %v2857_v22 = vld [vmem:[%s3342_s0 + $0x60] ss:$20 sps:$4 sm:$0xff]  }
  0x4e   :  { %1306 = vmatprep.subr.bf16.mxu0 %v2235_v23  ;;  %v2277_v23 = vld [vmem:[%s3341_s1 + $0x268] ss:$16 sps:$4 sm:$0xff]  }
  0x50   :  { %1392 = vmatpush1.bf16.msra.mxu1 %v2194_v24  ;;  %v2281_v24 = vld [vmem:[%s3341_s1 + $0x468] ss:$16 sps:$4 sm:$0xff]  }
  0x51   :  { %1393 = vmatprep.subr.bf16.mxu1 %v2202_v26  ;;  %1307 = vmatpush1.bf16.msra.mxu0 %v2233_v28  ;;  %v2286_v26 = vld [vmem:[%s3341_s1 + $0x24c] ss:$16 sps:$4 sm:$0xff]   ;;  %v2284_v28 = vld [vmem:[%s3341_s1 + $0x248] ss:$16 sps:$4 sm:$0xff]  }
  0x52   :  { %1159 = vmatmul.mubr.bf16.gmra.mxu0 %v2649_v25  ;;  %1478 = vmatprep.subr.bf16.mxu0 %v2253_v33  ;;  %v2289_v33 = vld [vmem:[%s3341_s1 + $0x22c] ss:$16 sps:$4 sm:$0xff]  }
  0x53   :  { %1252 = vmatmul.mubr.bf16.gmra.mxu1 %v2664_v29  ;;  %1168 = vmatprep.mubr.bf16.mxu0 %v2672_v31 }
  0x54   :  { %1394 = vmatpush1.bf16.msra.mxu1 %v2200_v27  ;;  %1261 = vmatprep.mubr.bf16.mxu1 %v2677_v32  ;;  %v2296_v27 = vld [vmem:[%s3341_s1 + $0x44c] ss:$16 sps:$4 sm:$0xff]  }
  0x55   :  { %1395 = vmatprep.subr.bf16.mxu1 %v2208_v30  ;;  %v2294_v30 = vld [vmem:[%s3341_s1 + $0x448] ss:$16 sps:$4 sm:$0xff]  }
  0x58   :  { %1396 = vmatpush1.bf16.msra.mxu1 %v2206_v34  ;;  %v2891_v34 = vld [vmem:[%s3342_s0 + $0x88] ss:$20 sps:$4 sm:$0xff]  }
  0x59   :  { %1397 = vmatprep.subr.bf16.mxu1 %v2217_v35  ;;  %v2287_v35 = vld [vmem:[%s3341_s1 + $0x228] ss:$16 sps:$4 sm:$0xff]  }
  0x5a   :  { %1169 = vmatmul.mubr.bf16.gmra.mxu0 %v2695_v36 }
  0x5b   :  { %1262 = vmatmul.mubr.bf16.gmra.mxu1 %v2703_v38  ;;  %1178 = vmatprep.mubr.bf16.mxu0 %v2708_v39 }
  0x5c   :  { %1398 = vmatpush1.bf16.msra.mxu1 %v2215_v37  ;;  %1271 = vmatprep.mubr.bf16.mxu1 %v2716_v41  ;;  %v2293_v37 = vld [vmem:[%s3341_s1 + $0x20c] ss:$16 sps:$4 sm:$0xff]  }
  0x5d   :  { %1399 = vmatprep.subr.bf16.mxu1 %v2223_v40  ;;  %v2322_v40 = vld [vmem:[%s3341_s1 + $0x40c] ss:$16 sps:$4 sm:$0xff]  }
  0x60   :  { %1400 = vmatpush1.bf16.msra.mxu1 %v2221_v42  ;;  %v2291_v42 = vld [vmem:[%s3341_s1 + $0x208] ss:$16 sps:$4 sm:$0xff]  }
  0x61   :  { %1401 = vmatprep.subr.bf16.mxu1 %v2229_v44  ;;  %v2299_v44 = vld [vmem:[%s3341_s1 + $0x3ec] ss:$16 sps:$4 sm:$0xff]  }
  0x62   :  { %1179 = vmatmul.mubr.bf16.gmra.mxu0 %v2727_v43 }
  0x63   :  { %1272 = vmatmul.mubr.bf16.gmra.mxu1 %v2739_v46  ;;  %1188 = vmatprep.mubr.bf16.mxu0 %v2744_v47 }
  0x64   :  { %1402 = vmatpush2.bf16.msra.mxu1 %v2227_v45  ;;  %1281 = vmatprep.mubr.bf16.mxu1 %v2752_v50  ;;  %v2922_v45 = vld [vmem:[%s3342_s0 + $0xb0] ss:$20 sps:$4 sm:$0xff]  }
  0x65   :  { %1403 = vmatprep.subr.bf16.mxu1 %v2238_v48  ;;  %v2303_v48 = vld [vmem:[%s3341_s1 + $0x3cc] ss:$16 sps:$4 sm:$0xff]  }
  0x68   :  { %1404 = vmatpush2.bf16.msra.mxu1 %v2236_v52  ;;  %v2301_v52 = vld [vmem:[%s3341_s1 + $0x3c8] ss:$16 sps:$4 sm:$0xff]  }
  0x69   :  { %1405 = vmatprep.subr.bf16.mxu1 %v2244_v53  ;;  %v2306_v53 = vld [vmem:[%s3341_s1 + $0x3ac] ss:$16 sps:$4 sm:$0xff]  }
  0x6a   :  { %1189 = vmatmul.mubr.bf16.gmra.mxu0 %v2767_v54 }
  0x6b   :  { %1282 = vmatmul.mubr.bf16.gmra.mxu1 %v2772_v55  ;;  %1324 = vmatprep.mubr.bf16.mxu0 %v2329_v59 }
  0x6c   :  { %1406 = vmatpush2.bf16.msra.mxu1 %v2242_v56  ;;  %1417 = vmatprep.mubr.bf16.mxu1 %v2500_v49  ;;  %v2260_v49 = vld [vmem:[%s3341_s1 + $0x2cc] ss:$16 sps:$4 sm:$0xff]  }
  0x6d   :  { %1407 = vmatprep.subr.bf16.mxu1 %v2250_v57  ;;  %v2307_v56 = vld [vmem:[%s3342_s0 + $0xd8] ss:$20 sps:$4 sm:$0xff]  }
  0x6e   :  { %v2313_v57 = vld [vmem:[%s3341_s1 + $0x38c] ss:$16 sps:$4 sm:$0xff]  }
  0x70   :  { %1408 = vmatpush2.bf16.msra.mxu1 %v2248_v58  ;;  %v2316_v58 = vld [vmem:[%s3341_s1 + $0x36c] ss:$16 sps:$4 sm:$0xff]  }
  0x71   :  { %1409 = vmatprep.subr.bf16.mxu1 %v2257_v60  ;;  %v2314_v60 = vld [vmem:[%s3341_s1 + $0x368] ss:$16 sps:$4 sm:$0xff]  }
  0x72   :  { %2010 = vmatmul.mubr.msk.bf16.vlgmr.msra.gmra.mxu0 %vm1087_vm0, %v2793_v61 }
  0x73   :  { %1479 = vmatpush1.bf16.msra.mxu0 %v2251_v62  ;;  %1334 = vmatprep.mubr.bf16.mxu0 %v2329_v59  ;;  %v2323_v62 = vld [vmem:[%s3341_s1 + $0x328] ss:$16 sps:$4 sm:$0xff]  }
  0x74   :  { %1410 = vmatpush2.bf16.msra.mxu1 %v2255_v63  ;;  %1480 = vmatprep.subr.bf16.mxu0 %v2260_v49 }
  0x75   :  { %1411 = vmatprep.subr.bf16.mxu1 %v2263_v0 }
  0x77   :  { %1481 = vmatpush1.bf16.msra.mxu0 %v2258_v1 }
  0x78   :  { %1412 = vmatpush2.bf16.msra.mxu1 %v2261_v2  ;;  %1482 = vmatprep.subr.bf16.mxu0 %v2266_v3 }
  0x79   :  { %1413 = vmatprep.subr.bf16.mxu1 %v2270_v6 }
  0x7a   :  { %2011 = vmatmul.mubr.msk.bf16.gmra.mxu0 %vm1087_vm0, %v2825_v7 }
  0x7b   :  { %1483 = vmatpush1.bf16.msra.mxu0 %v2264_v8  ;;  %1344 = vmatprep.mubr.bf16.mxu0 %v2329_v59 }
  0x7c   :  { %1414 = vmatpush2.bf16.msra.mxu1 %v2268_v11  ;;  %1484 = vmatprep.subr.bf16.mxu0 %v2273_v12 }
  0x7d   :  { %1415 = vmatprep.subr.bf16.mxu1 %v2276_v13 }
  0x7f   :  { %1485 = vmatpush1.bf16.msra.mxu0 %v2271_v14 }
  0x80   :  { %1416 = vmatpush2.bf16.msra.mxu1 %v2274_v15  ;;  %1486 = vmatprep.subr.bf16.mxu0 %v2279_v17 }
  0x81   :  { %1579 = vmatprep.subr.bf16.mxu1 %v2283_v19 }
  0x82   :  { %2012 = vmatmul.mubr.msk.bf16.gmra.mxu0 %vm1087_vm0, %v2857_v22 }
  0x83   :  { %1418 = vmatmul.mubr.bf16.vlgmr.msra.gmra.mxu1 %v2563_v4  ;;  %1487 = vmatpush1.bf16.msra.mxu0 %v2277_v23  ;;  %v2310_v4 = vld [vmem:[%s3341_s1 + $0x42c] ss:$16 sps:$4 sm:$0xff]  }
  0x84   :  { %1580 = vmatpush1.bf16.msra.mxu1 %v2281_v24  ;;  %1488 = vmatprep.subr.bf16.mxu0 %v2286_v26 }
  0x85   :  { %1354 = vmatprep.mubr.bf16.mxu0 %v2329_v59  ;;  %1427 = vmatprep.mubr.bf16.mxu1 %v2582_v9  ;;  %v2308_v9 = vld [vmem:[%s3341_s1 + $0x428] ss:$16 sps:$4 sm:$0xff]  }
  0x86   :  { %1581 = vmatprep.subr.bf16.mxu1 %v2296_v27 }
  0x87   :  { %1489 = vmatpush1.bf16.msra.mxu0 %v2284_v28 }
  0x88   :  { %1582 = vmatpush1.bf16.msra.mxu1 %v2294_v30  ;;  %1490 = vmatprep.subr.bf16.mxu0 %v2289_v33 }
  0x89   :  { %1583 = vmatprep.subr.bf16.mxu1 %v2310_v4 }
  0x8a   :  { %2013 = vmatmul.mubr.msk.bf16.gmra.mxu0 %vm1087_vm0, %v2891_v34 }
  0x8b   :  { %1428 = vmatmul.mubr.bf16.gmra.mxu1 %v2610_v16  ;;  %1491 = vmatpush1.bf16.msra.mxu0 %v2287_v35  ;;  %v2320_v16 = vld [vmem:[%s3341_s1 + $0x408] ss:$16 sps:$4 sm:$0xff]   ;;  %v3071_v35 = vld [vmem:[%s3343_s2] sm:$0xf] }
  0x8c   :  { %1364 = vmatprep.mubr.bf16.mxu0 %v2329_v59  ;;  %1492 = vmatprep.subr.bf16.mxu0 %v2293_v37 }
  0x8d   :  { %1437 = vmatprep.mubr.bf16.mxu1 %v2627_v20  ;;  %1584 = vmatpush1.bf16.msra.mxu1 %v2308_v9  ;;  %v2297_v20 = vld [vmem:[%s3341_s1 + $0x3e8] ss:$16 sps:$4 sm:$0xff]  }
  0x8e   :  { %1585 = vmatprep.subr.bf16.mxu1 %v2322_v40 }
  0x8f   :  { %1493 = vmatpush1.bf16.msra.mxu0 %v2291_v42 }
  0x90   :  { %1494 = vmatprep.subr.bf16.mxu0 %v2299_v44 }
  0x91   :  { %1586 = vmatpush1.bf16.msra.mxu1 %v2320_v16 }
  0x92   :  { %2014 = vmatmul.mubr.msk.bf16.gmra.mxu0 %vm1087_vm0, %v2922_v45 }
  0x93   :  { %1438 = vmatmul.mubr.bf16.gmra.mxu1 %v2649_v25  ;;  %1495 = vmatpush2.bf16.msra.mxu0 %v2297_v20  ;;  %v2304_v25 = vld [vmem:[%s3341_s1 + $0x3a8] ss:$16 sps:$4 sm:$0xff]  }
  0x94   :  { %1374 = vmatprep.mubr.bf16.mxu0 %v2329_v59  ;;  %1496 = vmatprep.subr.bf16.mxu0 %v2303_v48 }
  0x95   :  { %1447 = vmatprep.mubr.bf16.mxu1 %v2672_v31  ;;  %v2311_v31 = vld [vmem:[%s3341_s1 + $0x388] ss:$16 sps:$4 sm:$0xff]  }
  0x97   :  { %1497 = vmatpush2.bf16.msra.mxu0 %v2301_v52 }
  0x98   :  { %1498 = vmatprep.subr.bf16.mxu0 %v2306_v53 }
  0x9a   :  { %2015 = vmatmul.mubr.msk.bf16.gmra.mxu0 %vm1087_vm0, %v2307_v56 }
  0x9b   :  { %1448 = vmatmul.mubr.bf16.gmra.mxu1 %v2695_v36  ;;  %1499 = vmatpush2.bf16.msra.mxu0 %v2304_v25  ;;  %v2319_v36 = vld [vmem:[%s3341_s1 + $0x34c] ss:$16 sps:$4 sm:$0xff]  }
  0x9c   :  { %1457 = vmatprep.mubr.bf16.mxu1 %v2708_v39  ;;  %1500 = vmatprep.subr.bf16.mxu0 %v2313_v57  ;;  %v2317_v39 = vld [vmem:[%s3341_s1 + $0x348] ss:$16 sps:$4 sm:$0xff]  }
  0x9d   :  { %1510 = vmatprep.mubr.bf16.mxu0 %v2508_v51  ;;  %v2325_v51 = vld [vmem:[%s3341_s1 + $0x32c] ss:$16 sps:$4 sm:$0xff]  }
  0x9f   :  { %1501 = vmatpush2.bf16.msra.mxu0 %v2311_v31 }
  0xa0   :  { %1502 = vmatprep.subr.bf16.mxu0 %v2316_v58 }
  0xa3   :  { %1458 = vmatmul.mubr.bf16.gmra.mxu1 %v2727_v43  ;;  %1503 = vmatpush2.bf16.msra.mxu0 %v2314_v60  ;;  %v2328_v43 = vld [vmem:[%s3341_s1 + $0x30c] ss:$16 sps:$4 sm:$0xff]  }
  0xa4   :  { %1467 = vmatprep.mubr.bf16.mxu1 %v2744_v47  ;;  %1504 = vmatprep.subr.bf16.mxu0 %v2319_v36  ;;  %v2326_v47 = vld [vmem:[%s3341_s1 + $0x308] ss:$16 sps:$4 sm:$0xff]  }
  0xa7   :  { %1505 = vmatpush2.bf16.msra.mxu0 %v2317_v39 }
  0xa8   :  { %1506 = vmatprep.subr.bf16.mxu0 %v2325_v51 }
  0xab   :  { %1468 = vmatmul.mubr.bf16.gmra.mxu1 %v2767_v54  ;;  %1507 = vmatpush2.bf16.msra.mxu0 %v2323_v62 }
  0xac   :  { %1603 = vmatprep.mubr.bf16.mxu1 %v2329_v59  ;;  %1508 = vmatprep.subr.bf16.mxu0 %v2328_v43 }
  0xaf   :  { %1509 = vmatpush2.bf16.msra.mxu0 %v2326_v47 }
  0xb2   :  { %1511 = vmatmul.mubr.bf16.vlgmr.msra.gmra.mxu0 %v2568_v5 }
  0xb3   :  { %2016 = vmatmul.mubr.msk.bf16.vlgmr.msra.gmra.mxu1 %vm1087_vm0, %v2793_v61  ;;  %1520 = vmatprep.mubr.bf16.mxu0 %v2587_v10 }
  0xb4   :  { %1613 = vmatprep.mubr.bf16.mxu1 %v2329_v59 }
  0xba   :  { %1521 = vmatmul.mubr.bf16.gmra.mxu0 %v2619_v18 }
  0xbb   :  { %2017 = vmatmul.mubr.msk.bf16.gmra.mxu1 %vm1087_vm0, %v2825_v7  ;;  %1530 = vmatprep.mubr.bf16.mxu0 %v2632_v21 }
  0xbc   :  { %1623 = vmatprep.mubr.bf16.mxu1 %v2329_v59 }
  0xc2   :  { %1531 = vmatmul.mubr.bf16.gmra.mxu0 %v2664_v29 }
  0xc3   :  { %2018 = vmatmul.mubr.msk.bf16.gmra.mxu1 %vm1087_vm0, %v2857_v22  ;;  %1540 = vmatprep.mubr.bf16.mxu0 %v2677_v32  ;;  %v197_v22 = vlaneseq }
  0xc4   :  { %1633 = vmatprep.mubr.bf16.mxu1 %v2329_v59 }
  0xc5   :  { %v3058_v27 = vshrl.u32 %v197_v22, 7 }
  0xc7   :  { %v199_v4 = vsub.s32 0, %v3058_v27 }
  0xc9   :  { %v3080_v42 = vrot.slane %v3071_v35, %v199_v4 }
  0xca   :  { %1541 = vmatmul.mubr.bf16.gmra.mxu0 %v2703_v38 }
  0xcb   :  { %2019 = vmatmul.mubr.msk.bf16.gmra.mxu1 %vm1087_vm0, %v2891_v34  ;;  %1550 = vmatprep.mubr.bf16.mxu0 %v2716_v41  ;;  %v203_v34 = vsub.s32 1, %v3058_v27 }
  0xcc   :  { %1643 = vmatprep.mubr.bf16.mxu1 %v2329_v59 }
  0xcd   :  { %v3083_v44 = vrot.slane %v3071_v35, %v203_v34 }
  0xd2   :  { %1551 = vmatmul.mubr.bf16.gmra.mxu0 %v2739_v46 }
  0xd3   :  { %2020 = vmatmul.mubr.msk.bf16.gmra.mxu1 %vm1087_vm0, %v2922_v45  ;;  %1560 = vmatprep.mubr.bf16.mxu0 %v2752_v50 }
  0xd4   :  { %1653 = vmatprep.mubr.bf16.mxu1 %v2329_v59 }
  0xda   :  { %1561 = vmatmul.mubr.bf16.gmra.mxu0 %v2772_v55 }
  0xdb   :  { %2021 = vmatmul.mubr.msk.bf16.gmra.mxu1 %vm1087_vm0, %v2307_v56 }
 0x102   :  { %v1140_v5 = vpop.f32.mrf.mxu0 }
 0x103   :  { %v1233_v10 = vpop.f32.mrf.mxu1  ;;  %v1141_v48 = vadd.f32 %v1140_v5, %v3080_v42 }
 0x104   :  { %v1142_v18 = vpop.f32.mrf.mxu0 }
 0x105   :  { %v1235_v21 = vpop.f32.mrf.mxu1  ;;  %v1143_v52 = vadd.f32 %v1142_v18, %v3083_v44  ;;  %v1234_v57 = vadd.f32 %v1233_v10, %v1141_v48 }
 0x106   :  { %v1144_v29 = vpop.f32.mrf.mxu0 }
 0x107   :  { %v1237_v32 = vpop.f32.mrf.mxu1  ;;  %v1236_v31 = vadd.f32 %v1235_v21, %v1143_v52  ;;  %v1145_v58 = vadd.f32 %v1144_v29, %v3080_v42 }
 0x108   :  { %v1146_v38 = vpop.f32.mrf.mxu0 }
 0x109   :  { %v1239_v41 = vpop.f32.mrf.mxu1  ;;  %v1147_v60 = vadd.f32 %v1146_v38, %v3083_v44  ;;  %v1238_v5 = vadd.f32 %v1237_v32, %v1145_v58 }
 0x10a   :  { %v1150_v46 = vpop.f32.mrf.mxu0 }
 0x10b   :  { %v3012_v54 = vpop.f32.mrf.mxu1  ;;  %v1151_v43 = vadd.f32 %v1150_v46, %v3080_v42  ;;  %v1240_v18 = vadd.f32 %v1239_v41, %v1147_v60 }
 0x10c   :  { %v1152_v61 = vpop.f32.mrf.mxu0 }
 0x10d   :  { %v3014_v63 = vpop.f32.mrf.mxu1  ;;  %v1153_v22 = vadd.f32 %v1152_v61, %v3083_v44  ;;  %v1244_v38 = vadd.f32 %v3012_v54, %v1151_v43 }
 0x10e   :  { %v3016_v50 = vpop.f32.mrf.mxu0 }
 0x10f   :  { %v3018_v59 = vpop.f32.mrf.mxu1  ;;  %v1155_v46 = vadd.f32 %v3016_v50, %v3080_v42  ;;  %v1246_v32 = vadd.f32 %v3014_v63, %v1153_v22 }
 0x110   :  { %v3020_v55 = vpop.f32.mrf.mxu0 }
 0x111   :  { %v3022_v49 = vpop.f32.mrf.mxu1  ;;  %v1157_v41 = vadd.f32 %v3020_v55, %v3083_v44  ;;  %v1248_v50 = vadd.f32 %v3018_v59, %v1155_v46 }
 0x112   :  { %v3024_v0 = vpop.f32.mrf.mxu0 }
 0x113   :  { %v3026_v1 = vpop.f32.mrf.mxu1  ;;  %v1161_v54 = vadd.f32 %v3024_v0, %v3080_v42  ;;  %v1250_v63 = vadd.f32 %v3022_v49, %v1157_v41 }
 0x114   :  { %v3028_v2 = vpop.f32.mrf.mxu0 }
 0x115   :  { %v3030_v3 = vpop.f32.mrf.mxu1  ;;  %v1163_v55 = vadd.f32 %v3028_v2, %v3083_v44  ;;  %v1254_v0 = vadd.f32 %v3026_v1, %v1161_v54 }
 0x116   :  { %v3032_v6 = vpop.f32.mrf.mxu0 }
 0x117   :  { %v3034_v7 = vpop.f32.mrf.mxu1  ;;  %v1165_v59 = vadd.f32 %v3032_v6, %v3080_v42  ;;  %v1256_v49 = vadd.f32 %v3030_v3, %v1163_v55 }
 0x118   :  { %v3036_v8 = vpop.f32.mrf.mxu0 }
 0x119   :  { %v3038_v11 = vpop.f32.mrf.mxu1  ;;  %v1167_v2 = vadd.f32 %v3036_v8, %v3083_v44  ;;  %v1258_v3 = vadd.f32 %v3034_v7, %v1165_v59 }
 0x11a   :  { %v3040_v12 = vpop.f32.mrf.mxu0 }
 0x11b   :  { %v3042_v13 = vpop.f32.mrf.mxu1  ;;  %v1260_v8 = vadd.f32 %v3038_v11, %v1167_v2 }
 0x11c   :  { %v3044_v14 = vpop.f32.mrf.mxu0 }
 0x11d   :  { %v3046_v15 = vpop.f32.mrf.mxu1 }
 0x11e   :  { %v3048_v17 = vpop.f32.mrf.mxu0 }
 0x11f   :  { %v3050_v19 = vpop.f32.mrf.mxu1  ;;  %v1175_v7 = vadd.f32 %v3048_v17, %v3080_v42 }
 0x120   :  { %v3052_v23 = vpop.f32.mrf.mxu0 }
 0x121   :  { %v3054_v24 = vpop.f32.mrf.mxu1 }
 0x122   :  { %v3056_v26 = vpop.f32.mrf.mxu0 }
 0x123   :  { %v3062_v30 = vpop.f32.mrf.mxu1 }
 0x124   :  { %v3060_v28 = vpop.f32.mrf.mxu0 }
 0x125   :  { %v3073_v37 = vpop.f32.mrf.mxu1 }
 0x126   :  { %v3064_v33 = vpop.f32.mrf.mxu0 }
 0x127   :  { %v3085_v16 = vpop.f32.mrf.mxu1 }
 0x128   :  { %v3075_v9 = vpop.f32.mrf.mxu0 }
 0x129   :  { %v3093_v53 = vpop.f32.mrf.mxu1 }
 0x12a   :  { %v3077_v40 = vpop.f32.mrf.mxu0 }
 0x12b   :  { %v3099_v36 = vpop.f32.mrf.mxu1 }
 0x12c   :  { %v3087_v45 = vpop.f32.mrf.mxu0 }
 0x12d   :  { %v3103_v34 = vpop.f32.mrf.mxu1 }
 0x12e   :  { %v3089_v20 = vpop.f32.mrf.mxu0 }
 0x12f   :  { %v3114_v52 = vpop.f32.mrf.mxu1 }
 0x130   :  { %v3095_v56 = vpop.f32.mrf.mxu0 }
 0x132   :  { %v1326_v25 = vpop.f32.mrf.mxu0 }
 0x133   :  { %v1327_v51 = vadd.f32 %v1326_v25, %v1234_v57 }
 0x134   :  { %v1328_v39 = vpop.f32.mrf.mxu0 }
 0x135   :  { %v1329_v62 = vadd.f32 %v1328_v39, %v1236_v31  ;;  %v3125_v39 = vpop.f32.mrf.mxu1 }
 0x136   :  { %v1330_v47 = vpop.f32.mrf.mxu0 }
 0x137   :  { %v2046_v4 = vpack.c.bf16 %v1329_v62, %v1327_v51  ;;  %v1331_v21 = vadd.f32 %v1330_v47, %v1238_v5 }
 0x138   :  { %v1332_v10 = vpop.f32.mrf.mxu0 }
 0x139   :  { %1808 = vst [vmem:[%s3344_s3] sm:$0xff] %v2046_v4  ;;  %v1333_v29 = vadd.f32 %v1332_v10, %v1240_v18 }
 0x13a   :  { %v1336_v48 = vpop.f32.mrf.mxu0 }
 0x13b   :  { %v2048_v61 = vpack.c.bf16 %v1333_v29, %v1331_v21  ;;  %v1337_v57 = vadd.f32 %v1336_v48, %v1244_v38  ;;  %v1171_v21 = vadd.f32 %v3040_v12, %v3080_v42  ;;  %v1173_v38 = vadd.f32 %v3044_v14, %v3083_v44 }
 0x13c   :  { %v1338_v25 = vpop.f32.mrf.mxu0  ;;  %v1177_v14 = vadd.f32 %v3052_v23, %v3083_v44 }
 0x13d   :  { %1810 = vst [vmem:[%s3344_s3 + $0x10] sm:$0xff] %v2048_v61  ;;  %v1339_v31 = vadd.f32 %v1338_v25, %v1246_v32  ;;  %v1264_v61 = vadd.f32 %v3042_v13, %v1171_v21  ;;  %v1266_v11 = vadd.f32 %v3046_v15, %v1173_v38  ;;  %v1268_v15 = vadd.f32 %v3050_v19, %v1175_v7 }
 0x13e   :  { %v1340_v58 = vpop.f32.mrf.mxu0  ;;  %v1270_v23 = vadd.f32 %v3054_v24, %v1177_v14  ;;  %v1185_v19 = vadd.f32 %v3064_v33, %v3080_v42 }
 0x13f   :  { %v2050_v60 = vpack.c.bf16 %v1339_v31, %v1337_v57  ;;  %v1341_v62 = vadd.f32 %v1340_v58, %v1248_v50 }
 0x140   :  { %v1342_v51 = vpop.f32.mrf.mxu0 }
 0x141   :  { %1812 = vst [vmem:[%s3344_s3 + $0x20] sm:$0xff] %v2050_v60  ;;  %v1343_v43 = vadd.f32 %v1342_v51, %v1250_v63  ;;  %v1181_v63 = vadd.f32 %v3056_v26, %v3080_v42  ;;  %v1183_v60 = vadd.f32 %v3060_v28, %v3083_v44  ;;  %v1187_v28 = vadd.f32 %v3075_v9, %v3083_v44 }
 0x142   :  { %v1346_v47 = vpop.f32.mrf.mxu0 }
 0x143   :  { %v3131_v5 = vpop.f32.mrf.mxu1  ;;  %v2052_v18 = vpack.c.bf16 %v1343_v43, %v1341_v62  ;;  %v1347_v1 = vadd.f32 %v1346_v47, %v1254_v0  ;;  %v1274_v47 = vadd.f32 %v3062_v30, %v1181_v63  ;;  %v1276_v24 = vadd.f32 %v3073_v37, %v1183_v60 }
 0x144   :  { %v1348_v22 = vpop.f32.mrf.mxu0  ;;  %v1278_v37 = vadd.f32 %v3085_v16, %v1185_v19  ;;  %v1280_v9 = vadd.f32 %v3093_v53, %v1187_v28  ;;  %v1195_v16 = vadd.f32 %v3089_v20, %v3080_v42  ;;  %v1197_v53 = vadd.f32 %v3095_v56, %v3083_v44 }
 0x145   :  { %v3138_v4 = vpop.f32.mrf.mxu1  ;;  %1814 = vst [vmem:[%s3344_s3 + $0x30] sm:$0xff] %v2052_v18  ;;  %v1349_v10 = vadd.f32 %v1348_v22, %v1256_v49  ;;  %v211_v60 = vsub.s32 3, %v3058_v27 }
 0x146   :  { %v1350_v29 = vpop.f32.mrf.mxu0  ;;  %v1290_v20 = vadd.f32 %v3125_v39, %v1197_v53 }
 0x147   :  { %v3145_v6 = vpop.f32.mrf.mxu1  ;;  %v2054_v48 = vpack.c.bf16 %v1349_v10, %v1347_v1  ;;  %v1351_v41 = vadd.f32 %v1350_v29, %v1258_v3  ;;  %v1191_v10 = vadd.f32 %v3077_v40, %v3080_v42  ;;  %v1193_v29 = vadd.f32 %v3087_v45, %v3083_v44 }
 0x148   :  { %v1352_v46 = vpop.f32.mrf.mxu0  ;;  %v1288_v42 = vadd.f32 %v3114_v52, %v1195_v16 }
 0x149   :  { %v3151_v32 = vpop.f32.mrf.mxu1  ;;  %1816 = vst [vmem:[%s3344_s3 + $0x40] sm:$0xff] %v2054_v48  ;;  %v1353_v12 = vadd.f32 %v1352_v46, %v1260_v8  ;;  %v1284_v46 = vadd.f32 %v3099_v36, %v1191_v10  ;;  %v1286_v45 = vadd.f32 %v3103_v34, %v1193_v29 }
 0x14a   :  { %v1356_v25 = vpop.f32.mrf.mxu0 }
 0x14b   :  { %v3157_v57 = vpop.f32.mrf.mxu1  ;;  %v2056_v31 = vpack.c.bf16 %v1353_v12, %v1351_v41  ;;  %v1357_v13 = vadd.f32 %v1356_v25, %v1264_v61 }
 0x14c   :  { %v1358_v54 = vpop.f32.mrf.mxu0 }
 0x14d   :  { %v3164_v58 = vpop.f32.mrf.mxu1  ;;  %1818 = vst [vmem:[%s3344_s3 + $0x50] sm:$0xff] %v2056_v31  ;;  %v1359_v50 = vadd.f32 %v1358_v54, %v1266_v11 }
 0x14e   :  { %v1360_v55 = vpop.f32.mrf.mxu0 }
 0x14f   :  { %v3171_v17 = vpop.f32.mrf.mxu1  ;;  %v2058_v51 = vpack.c.bf16 %v1359_v50, %v1357_v13  ;;  %v1361_v0 = vadd.f32 %v1360_v55, %v1268_v15  ;;  %v207_v15 = vsub.s32 2, %v3058_v27 }
 0x150   :  { %v1362_v62 = vpop.f32.mrf.mxu0 }
 0x151   :  { %v3177_v43 = vpop.f32.mrf.mxu1  ;;  %1820 = vst [vmem:[%s3344_s3 + $0x60] sm:$0xff] %v2058_v51  ;;  %v1363_v26 = vadd.f32 %v1362_v62, %v1270_v23  ;;  %v3248_v62 = vrot.slane %v3071_v35, %v207_v15 }
 0x152   :  { %v1366_v59 = vpop.f32.mrf.mxu0 }
 0x153   :  { %v3183_v49 = vpop.f32.mrf.mxu1  ;;  %v2060_v2 = vpack.c.bf16 %v1363_v26, %v1361_v0  ;;  %v1367_v30 = vadd.f32 %v1366_v59, %v1274_v47  ;;  %v3253_v26 = vrot.slane %v3071_v35, %v211_v60  ;;  %v1420_v59 = vadd.f32 %v3131_v5, %v3248_v62 }
 0x154   :  { %v1368_v18 = vpop.f32.mrf.mxu0 }
 0x155   :  { %v3190_v22 = vpop.f32.mrf.mxu1  ;;  %1822 = vst [vmem:[%s3344_s3 + $0x70] sm:$0xff] %v2060_v2  ;;  %v1369_v1 = vadd.f32 %v1368_v18, %v1276_v24  ;;  %v1422_v27 = vadd.f32 %v3138_v4, %v3253_v26  ;;  %v1430_v4 = vadd.f32 %v3157_v57, %v3248_v62 }
 0x156   :  { %v1370_v21 = vpop.f32.mrf.mxu0  ;;  %v1442_v60 = vadd.f32 %v3190_v22, %v3253_v26 }
 0x157   :  { %v3197_v33 = vpop.f32.mrf.mxu1  ;;  %v2062_v3 = vpack.c.bf16 %v1369_v1, %v1367_v30  ;;  %v1371_v48 = vadd.f32 %v1370_v21, %v1278_v37  ;;  %v1424_v30 = vadd.f32 %v3145_v6, %v3248_v62  ;;  %v1426_v21 = vadd.f32 %v3151_v32, %v3253_v26 }
 0x158   :  { %v1372_v8 = vpop.f32.mrf.mxu0  ;;  %v1432_v6 = vadd.f32 %v3164_v58, %v3253_v26 }
 0x159   :  { %v3203_v38 = vpop.f32.mrf.mxu1  ;;  %1824 = vst [vmem:[%s3344_s3 + $0x80] sm:$0xff] %v2062_v3  ;;  %v1373_v40 = vadd.f32 %v1372_v8, %v1280_v9 }
 0x15a   :  { %v1376_v41 = vpop.f32.mrf.mxu0 }
 0x15b   :  { %v3209_v12 = vpop.f32.mrf.mxu1  ;;  %v2064_v61 = vpack.c.bf16 %v1373_v40, %v1371_v48  ;;  %v1377_v36 = vadd.f32 %v1376_v41, %v1284_v46 }
 0x15c   :  { %v1378_v25 = vpop.f32.mrf.mxu0 }
 0x15d   :  { %v3216_v7 = vpop.f32.mrf.mxu1  ;;  %1826 = vst [vmem:[%s3344_s3 + $0x90] sm:$0xff] %v2064_v61  ;;  %v1379_v11 = vadd.f32 %v1378_v25, %v1286_v45  ;;  %v1434_v61 = vadd.f32 %v3171_v17, %v3248_v62 }
 0x15e   :  { %v1380_v14 = vpop.f32.mrf.mxu0 }
 0x15f   :  { %v3221_v31 = vpop.f32.mrf.mxu1  ;;  %v2066_v34 = vpack.c.bf16 %v1379_v11, %v1377_v36  ;;  %v1381_v56 = vadd.f32 %v1380_v14, %v1288_v42  ;;  %v1436_v14 = vadd.f32 %v3177_v43, %v3253_v26 }
 0x160   :  { %v1382_v54 = vpop.f32.mrf.mxu0 }
 0x161   :  { %v3225_v44 = vpop.f32.mrf.mxu1  ;;  %1828 = vst [vmem:[%s3344_s3 + $0xa0] sm:$0xff] %v2066_v34  ;;  %v1383_v13 = vadd.f32 %v1382_v54, %v1290_v20 }
 0x163   :  { %v3230_v50 = vpop.f32.mrf.mxu1  ;;  %v2068_v63 = vpack.c.bf16 %v1383_v13, %v1381_v56  ;;  %v1440_v56 = vadd.f32 %v3183_v49, %v3248_v62 }
 0x165   :  { %v3232_v55 = vpop.f32.mrf.mxu1  ;;  %1830 = vst [vmem:[%s3344_s3 + $0xb0] sm:$0xff] %v2068_v63 }
 0x167   :  { %v3237_v52 = vpop.f32.mrf.mxu1 }
 0x169   :  { %v3239_v39 = vpop.f32.mrf.mxu1 }
 0x16b   :  { %v3242_v23 = vpop.f32.mrf.mxu1 }
 0x16d   :  { %v3245_v51 = vpop.f32.mrf.mxu1 }
 0x16f   :  { %v3250_v0 = vpop.f32.mrf.mxu1 }
 0x171   :  { %v3255_v47 = vpop.f32.mrf.mxu1 }
 0x172   :  { %v1512_v19 = vpop.f32.mrf.mxu0 }
 0x173   :  { %v1605_v24 = vpop.f32.mrf.mxu1  ;;  %v1513_v28 = vadd.f32 %v1512_v19, %v1420_v59 }
 0x174   :  { %v1514_v2 = vpop.f32.mrf.mxu0 }
 0x175   :  { %v1607_v18 = vpop.f32.mrf.mxu1  ;;  %v1515_v1 = vadd.f32 %v1514_v2, %v1422_v27  ;;  %v1606_v37 = vadd.f32 %v1605_v24, %v1513_v28  ;;  %v1444_v28 = vadd.f32 %v3197_v33, %v3248_v62 }
 0x176   :  { %v1516_v10 = vpop.f32.mrf.mxu0 }
 0x177   :  { %v1609_v35 = vpop.f32.mrf.mxu1  ;;  %v1608_v9 = vadd.f32 %v1607_v18, %v1515_v1  ;;  %v1517_v5 = vadd.f32 %v1516_v10, %v1424_v30  ;;  %v1446_v1 = vadd.f32 %v3203_v38, %v3253_v26 }
 0x178   :  { %v1518_v29 = vpop.f32.mrf.mxu0 }
 0x179   :  { %v1611_v3 = vpop.f32.mrf.mxu1  ;;  %v2047_v8 = vpack.c.bf16 %v1608_v9, %v1606_v37  ;;  %v1519_v48 = vadd.f32 %v1518_v29, %v1426_v21  ;;  %v1610_v32 = vadd.f32 %v1609_v35, %v1517_v5  ;;  %v1450_v9 = vadd.f32 %v3209_v12, %v3248_v62 }
 0x17a   :  { %v1522_v40 = vpop.f32.mrf.mxu0 }
 0x17b   :  { %v1615_v46 = vpop.f32.mrf.mxu1  ;;  %1809 = vst [vmem:[%s3344_s3 + $0x8] sm:$0xff] %v2047_v8  ;;  %v1612_v41 = vadd.f32 %v1611_v3, %v1519_v48  ;;  %v1523_v16 = vadd.f32 %v1522_v40, %v1430_v4  ;;  %v1452_v4 = vadd.f32 %v3216_v7, %v3253_v26 }
 0x17c   :  { %v1524_v45 = vpop.f32.mrf.mxu0 }
 0x17d   :  { %v1617_v53 = vpop.f32.mrf.mxu1  ;;  %v2049_v57 = vpack.c.bf16 %v1612_v41, %v1610_v32  ;;  %v1525_v25 = vadd.f32 %v1524_v45, %v1432_v6  ;;  %v1616_v58 = vadd.f32 %v1615_v46, %v1523_v16  ;;  %v1454_v6 = vadd.f32 %v3221_v31, %v3248_v62 }
 0x17e   :  { %v1526_v36 = vpop.f32.mrf.mxu0  ;;  %v1456_v45 = vadd.f32 %v3225_v44, %v3253_v26 }
 0x17f   :  { %v1619_v11 = vpop.f32.mrf.mxu1  ;;  %1811 = vst [vmem:[%s3344_s3 + $0x18] sm:$0xff] %v2049_v57  ;;  %v1618_v42 = vadd.f32 %v1617_v53, %v1525_v25  ;;  %v1527_v20 = vadd.f32 %v1526_v36, %v1434_v61  ;;  %v1460_v36 = vadd.f32 %v3230_v50, %v3248_v62 }
 0x180   :  { %v1528_v34 = vpop.f32.mrf.mxu0 }
 0x181   :  { %v1621_v54 = vpop.f32.mrf.mxu1  ;;  %v2051_v17 = vpack.c.bf16 %v1618_v42, %v1616_v58  ;;  %v1529_v13 = vadd.f32 %v1528_v34, %v1436_v14  ;;  %v1620_v43 = vadd.f32 %v1619_v11, %v1527_v20  ;;  %v1462_v42 = vadd.f32 %v3232_v55, %v3253_v26 }
 0x182   :  { %v1532_v63 = vpop.f32.mrf.mxu0 }
 0x183   :  { %v1625_v15 = vpop.f32.mrf.mxu1  ;;  %1813 = vst [vmem:[%s3344_s3 + $0x28] sm:$0xff] %v2051_v17  ;;  %v1622_v59 = vadd.f32 %v1621_v54, %v1529_v13  ;;  %v1533_v19 = vadd.f32 %v1532_v63, %v1440_v56  ;;  %v1464_v17 = vadd.f32 %v3237_v52, %v3248_v62 }
 0x184   :  { %v1534_v24 = vpop.f32.mrf.mxu0 }
 0x185   :  { %v1627_v27 = vpop.f32.mrf.mxu1  ;;  %v2053_v49 = vpack.c.bf16 %v1622_v59, %v1620_v43  ;;  %v1535_v2 = vadd.f32 %v1534_v24, %v1442_v60  ;;  %v1626_v22 = vadd.f32 %v1625_v15, %v1533_v19  ;;  %v1466_v60 = vadd.f32 %v3239_v39, %v3253_v26 }
 0x186   :  { %v1536_v18 = vpop.f32.mrf.mxu0 }
 0x187   :  { %v1629_v30 = vpop.f32.mrf.mxu1  ;;  %1815 = vst [vmem:[%s3344_s3 + $0x38] sm:$0xff] %v2053_v49  ;;  %v1628_v10 = vadd.f32 %v1627_v27, %v1535_v2  ;;  %v1537_v35 = vadd.f32 %v1536_v18, %v1444_v28  ;;  %v1470_v27 = vadd.f32 %v3242_v23, %v3248_v62  ;;  %v1472_v18 = vadd.f32 %v3245_v51, %v3253_v26 }
 0x188   :  { %v1538_v21 = vpop.f32.mrf.mxu0 }
 0x189   :  { %v1631_v37 = vpop.f32.mrf.mxu1  ;;  %v2055_v33 = vpack.c.bf16 %v1628_v10, %v1626_v22  ;;  %v1539_v5 = vadd.f32 %v1538_v21, %v1446_v1  ;;  %v1630_v38 = vadd.f32 %v1629_v30, %v1537_v35  ;;  %v1474_v35 = vadd.f32 %v3250_v0, %v3248_v62 }
 0x18a   :  { %v1542_v29 = vpop.f32.mrf.mxu0 }
 0x18b   :  { %v1635_v3 = vpop.f32.mrf.mxu1  ;;  %1817 = vst [vmem:[%s3344_s3 + $0x48] sm:$0xff] %v2055_v33  ;;  %v1632_v8 = vadd.f32 %v1631_v37, %v1539_v5  ;;  %v1543_v48 = vadd.f32 %v1542_v29, %v1450_v9  ;;  %v1476_v33 = vadd.f32 %v3255_v47, %v3253_v26 }
 0x18c   :  { %v1544_v40 = vpop.f32.mrf.mxu0 }
 0x18d   :  { %v1637_v46 = vpop.f32.mrf.mxu1  ;;  %v2057_v12 = vpack.c.bf16 %v1632_v8, %v1630_v38  ;;  %v1545_v32 = vadd.f32 %v1544_v40, %v1452_v4  ;;  %v1636_v7 = vadd.f32 %v1635_v3, %v1543_v48 }
 0x18e   :  { %v1546_v41 = vpop.f32.mrf.mxu0 }
 0x18f   :  { %v1639_v16 = vpop.f32.mrf.mxu1  ;;  %1819 = vst [vmem:[%s3344_s3 + $0x58] sm:$0xff] %v2057_v12  ;;  %v1638_v53 = vadd.f32 %v1637_v46, %v1545_v32  ;;  %v1547_v61 = vadd.f32 %v1546_v41, %v1454_v6 }
 0x190   :  { %v1548_v57 = vpop.f32.mrf.mxu0 }
 0x191   :  { %v1641_v25 = vpop.f32.mrf.mxu1  ;;  %v2059_v31 = vpack.c.bf16 %v1638_v53, %v1636_v7  ;;  %v1549_v11 = vadd.f32 %v1548_v57, %v1456_v45  ;;  %v1640_v44 = vadd.f32 %v1639_v16, %v1547_v61 }
 0x192   :  { %v1552_v14 = vpop.f32.mrf.mxu0 }
 0x193   :  { %v1645_v58 = vpop.f32.mrf.mxu1  ;;  %1821 = vst [vmem:[%s3344_s3 + $0x68] sm:$0xff] %v2059_v31  ;;  %v1642_v20 = vadd.f32 %v1641_v25, %v1549_v11  ;;  %v1553_v34 = vadd.f32 %v1552_v14, %v1460_v36 }
 0x194   :  { %v1554_v54 = vpop.f32.mrf.mxu0 }
 0x195   :  { %v1647_v56 = vpop.f32.mrf.mxu1  ;;  %v2061_v50 = vpack.c.bf16 %v1642_v20, %v1640_v44  ;;  %v1555_v13 = vadd.f32 %v1554_v54, %v1462_v42  ;;  %v1646_v55 = vadd.f32 %v1645_v58, %v1553_v34 }
 0x196   :  { %v1556_v63 = vpop.f32.mrf.mxu0 }
 0x197   :  { %v1649_v15 = vpop.f32.mrf.mxu1  ;;  %1823 = vst [vmem:[%s3344_s3 + $0x78] sm:$0xff] %v2061_v50  ;;  %v1648_v43 = vadd.f32 %v1647_v56, %v1555_v13  ;;  %v1557_v59 = vadd.f32 %v1556_v63, %v1464_v17 }
 0x198   :  { %v1558_v19 = vpop.f32.mrf.mxu0 }
 0x199   :  { %v1651_v24 = vpop.f32.mrf.mxu1  ;;  %v2063_v52 = vpack.c.bf16 %v1648_v43, %v1646_v55  ;;  %v1559_v28 = vadd.f32 %v1558_v19, %v1466_v60  ;;  %v1650_v39 = vadd.f32 %v1649_v15, %v1557_v59 }
 0x19a   :  { %v1562_v49 = vpop.f32.mrf.mxu0 }
 0x19b   :  { %v1655_v2 = vpop.f32.mrf.mxu1  ;;  %1825 = vst [vmem:[%s3344_s3 + $0x88] sm:$0xff] %v2063_v52  ;;  %v1652_v30 = vadd.f32 %v1651_v24, %v1559_v28  ;;  %v1563_v1 = vadd.f32 %v1562_v49, %v1470_v27 }
 0x19c   :  { %v1564_v22 = vpop.f32.mrf.mxu0 }
 0x19d   :  { %v1657_v10 = vpop.f32.mrf.mxu1  ;;  %v2065_v23 = vpack.c.bf16 %v1652_v30, %v1650_v39  ;;  %v1565_v21 = vadd.f32 %v1564_v22, %v1472_v18  ;;  %v1656_v51 = vadd.f32 %v1655_v2, %v1563_v1 }
 0x19e   :  { %v1566_v37 = vpop.f32.mrf.mxu0 }
 0x19f   :  { %v1659_v9 = vpop.f32.mrf.mxu1  ;;  %1827 = vst [vmem:[%s3344_s3 + $0x98] sm:$0xff] %v2065_v23  ;;  %v1658_v5 = vadd.f32 %v1657_v10, %v1565_v21  ;;  %v1567_v29 = vadd.f32 %v1566_v37, %v1474_v35 }
 0x1a0   :  { %v1568_v3 = vpop.f32.mrf.mxu0 }
 0x1a1   :  { %v1661_v4 = vpop.f32.mrf.mxu1  ;;  %v2067_v38 = vpack.c.bf16 %v1658_v5, %v1656_v51  ;;  %v1569_v8 = vadd.f32 %v1568_v3, %v1476_v33  ;;  %v1660_v62 = vadd.f32 %v1659_v9, %v1567_v29 }
 0x1a3   :  { %1829 = vst [vmem:[%s3344_s3 + $0xa8] sm:$0xff] %v2067_v38  ;;  %v1662_v0 = vadd.f32 %v1661_v4, %v1569_v8 }
 0x1a5   :  { %v2069_v48 = vpack.c.bf16 %v1662_v0, %v1660_v62 }
 0x1a7   :  { %1831 = vst [vmem:[%s3344_s3 + $0xb8] sm:$0xff] %v2069_v48 }

// kernel: vision_network_forward.7
= control target key start
LH: loop header
LB: loop body
LE: loop exit
PB: predicated region body
PF: predicated region fallthrough
CT: control target
= control target key end

     0   :  { %13 = vsyncpa [#allocation6], 0  ;;  %s6249_s0 = inlined_call_operand.vmem [shape: bf16[3,32,512], index: 0, kind: input, shape index: {}]   ;;  %s6250_s1 = inlined_call_operand.vmem [shape: f32[3,2,1,1], index: 1, kind: input, shape index: {}]   ;;  %s6251_s2 = inlined_call_operand.vmem [shape: bf16[1152,512], index: 2, kind: input, shape index: {}]   ;;  %s6252_s3 = inlined_call_operand.vmem [shape: f32[2,4,4,128], index: 3, kind: input, shape index: {}]   ;;  %s6253_s4 = inlined_call_operand.vmem [shape: f32[2,4,4,128], index: 4, kind: input, shape index: {}]   ;;  %s6254_s5 = inlined_call_operand.hbm [shape: f32[3,32,128], index: 5, kind: output, shape index: {0}]   ;;  %s6255_s6 = inlined_call_operand.hbm [shape: f32[2,4,4,128], index: 6, kind: output, shape index: {1}]   ;;  %s6256_s7 = inlined_call_operand.hbm [shape: f32[2,4,4,128], index: 7, kind: output, shape index: {2}]  }
   0x1   :  { %15 = vsyncpa [#allocation6 + $0x1], 0 }
   0x2   :  { %16 = vsyncpa [#allocation8], 0  ;;  %s4956_s24 = smov 0   ;;  %s4958_s25 = smov 0  }
   0x3   :  { %s4960_s26 = smov 0   ;;  %s4962_s27 = smov 0  }
   0x4 LB: > { %s4977_s28 = sadd.s32 4294967295, %s4905_s27   ;;  %s3687_s29 = sadd.s32 4294967294, %s4905_s27   ;;  %s4905_s27 = sphi %s4962_s27, %s6264_s27   ;;  %s4901_s26 = sphi %s4960_s26, %s6263_s26   ;;  %s4897_s25 = sphi %s4958_s25, %s6262_s25   ;;  %s4893_s24 = sphi %s4956_s24, %s6261_s24  }
   0x5   : > { %s4981_s30 = sadd.s32 1, %s4905_s27   ;;  %s144_s8 = sadd.s32 1, %s4901_s26 }
   0x6   : > { %s141_s9 = ssub.s32 %s4905_s27, %s4981_s30  ;;  %p154_p0 = scmp.ne.s32.totalorder %s4901_s26, %s4897_s25 }
   0x7   : > { %p142_p1 = scmp.eq.s32.totalorder %s141_s9, 0  ;;  %p155_p2 = scmp.eq.s32.totalorder %s4977_s28, 2 }
   0x8   : > { %p160_p3 = scmp.ne.s32.totalorder %s4897_s25, %s4893_s24  ;;  %p161_p4 = scmp.eq.s32.totalorder %s3687_s29, 2 }
   0x9   : > { %s4992_s10 = scalar_select %p142_p1, %s4901_s26, %s144_s8  }
   0xa   : > { %p4996_p5 = por %p155_p2, %p154_p0  ;;  %p5000_p6 = por %p161_p4, %p160_p3 }
   0xb   : > { %p3690_p7 = scmp.ge.s32.totalorder %s4905_s27, 1  ;;  %p245_p8 = scmp.lt.s32.totalorder %s4905_s27, 4 }
   0xd   : > { %p246_p9 = pnand %p3690_p7, %p245_p8 }
   0xe   : > { %s6257_s13 = sand.u32 (!%p246_p9), 1, %s4897_s25   ;;  %p281_p10 = scmp.lt.s32.totalorder (!%p246_p9), %s4977_s28, 2 }
   0xf   : > { %249 = sbr.rel (%p246_p9) target bundleno = 732 (0x2dc), region = 40  ;;  %s3691_s14 = sshll.u32 (!%p246_p9), %s6257_s13, 5 }
  0x10   : > { %s5021_s29 = scalar_lea.vmem (!%p246_p9), [#allocation5], %s3691_s14  ;;  %p3695_p11 = scmp.ne.s32.totalorder (!%p246_p9), %s4977_s28, 0 }
  0x14   : > { %s282_s15 = scalar_select %p281_p10, %s4977_s28, 2 }
  0x15   : > { %294 = sbr.rel (%p3695_p11) target bundleno = 39 (0x27), region = 44 }
  0x16   : > { %s4074_s16 = sshll.u32 %s282_s15, 6  ;;  %s3694_s17 = sshll.u32 %s282_s15, 1 }
  0x17   : > { %s5014_s20 = scalar_lea.vmem %s6249_s0, %s4074_s16  ;;  %s5019_s23 = scalar_lea.vmem %s6250_s1, %s3694_s17 }
  0x1a   : > { %v307_v0 = vld [vmem:[%s6252_s3] sm:$0xf]  ;;  %v308_v1 = vld [vmem:[%s6252_s3 + $0x4] sm:$0xf]  ;;  %v4907_v3 = vmov 0.0   ;;  %v326_v10 = vld [vmem:[%s6253_s4 + $0x8] sm:$0xff]  }
  0x1b   : > { %v324_v2 = vld [vmem:[%s6253_s4] sm:$0xff]   ;;  %296 = vst [vmem:[#allocation2 + $0x8] sm:$0x3f] %v4907_v3  ;;  %295 = vst [vmem:[#allocation2] sm:$0x3f] %v4907_v3  ;;  %v328_v11 = vld [vmem:[%s6253_s4 + $0x10] sm:$0xff]  }
  0x1c   : > { %297 = vst [vmem:[#allocation2 + $0x10] sm:$0x3f] %v4907_v3  ;;  %298 = vst [vmem:[#allocation2 + $0x18] sm:$0x3f] %v4907_v3  ;;  %v309_v4 = vld [vmem:[%s6252_s3 + $0x8] sm:$0xf] }
  0x1d   : > { %299 = vst [vmem:[#allocation2 + $0x20] sm:$0x3f] %v4907_v3  ;;  %300 = vst [vmem:[#allocation2 + $0x28] sm:$0x3f] %v4907_v3  ;;  %v310_v5 = vld [vmem:[%s6252_s3 + $0xc] sm:$0xf] }
  0x1e   : > { %301 = vst [vmem:[#allocation2 + $0x30] sm:$0x3f] %v4907_v3  ;;  %302 = vst [vmem:[#allocation2 + $0x38] sm:$0x3f] %v4907_v3  ;;  %v311_v6 = vld [vmem:[%s6252_s3 + $0x10] sm:$0xf] }
  0x1f   : > { %303 = vst [vmem:[#allocation2 + $0x40] sm:$0x3f] %v4907_v3  ;;  %304 = vst [vmem:[#allocation2 + $0x48] sm:$0x3f] %v4907_v3  ;;  %v312_v7 = vld [vmem:[%s6252_s3 + $0x14] sm:$0xf] }
  0x20   : > { %305 = vst [vmem:[#allocation2 + $0x50] sm:$0x3f] %v4907_v3  ;;  %306 = vst [vmem:[#allocation2 + $0x58] sm:$0x3f] %v4907_v3  ;;  %v313_v8 = vld [vmem:[%s6252_s3 + $0x18] sm:$0xf] }
  0x21   : > { %332 = vst [vmem:[#allocation3] sm:$0xff] %v324_v2   ;;  %316 = vst [vmem:[#allocation2 + $0x9] sm:$0xf] %v307_v0  ;;  %v314_v9 = vld [vmem:[%s6252_s3 + $0x1c] sm:$0xf] }
  0x22   : > { %317 = vst [vmem:[#allocation2 + $0x11] sm:$0xf] %v308_v1  ;;  %318 = vst [vmem:[#allocation2 + $0x19] sm:$0xf] %v309_v4  ;;  %v330_v12 = vld [vmem:[%s6253_s4 + $0x18] sm:$0xff]  }
  0x23   : > { %319 = vst [vmem:[#allocation2 + $0x21] sm:$0xf] %v310_v5  ;;  %320 = vst [vmem:[#allocation2 + $0x39] sm:$0xf] %v311_v6 }
  0x24   : > { %321 = vst [vmem:[#allocation2 + $0x41] sm:$0xf] %v312_v7  ;;  %322 = vst [vmem:[#allocation2 + $0x49] sm:$0xf] %v313_v8 }
  0x25   : > { %323 = vst [vmem:[#allocation2 + $0x51] sm:$0xf] %v314_v9  ;;  %334 = vst [vmem:[#allocation3 + $0x8] sm:$0xff] %v326_v10  }
  0x26   : > { %336 = vst [vmem:[#allocation3 + $0x10] sm:$0xff] %v328_v11   ;;  %338 = vst [vmem:[#allocation3 + $0x18] sm:$0xff] %v330_v12  }
  0x27 PF: > { %v3696_v13 = vld [vmem:[%s5019_s23] ss:$0 sm:$0xff]  ;;  %v4908_v14 = vmov 0   ;;  %v3697_v15 = vld [vmem:[%s5019_s23 + $0x1] ss:$0 sm:$0xff]  ;;  %p4064_p12 = scmp.ne.s32.totalorder %s4977_s28, 2 }
  0x28   : > { %4171 = vset.pattern.permute.xlu0 %v4908_v14  ;;  %v4172_v16 = vld [vmem:[%s6251_s2 + $0xe4] ss:$16 sps:$4 sm:$0xff]   ;;  %v4176_v18 = vld [vmem:[%s6251_s2 + $0xe0] ss:$16 sps:$4 sm:$0xff]  }
  0x29   : > { %362 = vperm.xlu0 %4171, %v3696_v13   ;;  %v4174_v17 = vld [vmem:[%s6251_s2 + $0x2e4] ss:$16 sps:$4 sm:$0xff]   ;;  %2670 = vmatprep.subr.bf16.mxu0 %v4172_v16  ;;  %v4177_v19 = vld [vmem:[%s6251_s2 + $0x2e0] ss:$16 sps:$4 sm:$0xff]  }
  0x2a   : > { %2723 = vmatprep.subr.bf16.mxu1 %v4174_v17  ;;  %2671 = vmatpush1.bf16.msra.mxu0 %v4176_v18  ;;  %v4178_v20 = vld [vmem:[%s6251_s2 + $0xc4] ss:$16 sps:$4 sm:$0xff]   ;;  %v4182_v22 = vld [vmem:[%s6251_s2 + $0xc0] ss:$16 sps:$4 sm:$0xff]  }
  0x2b   : > { %2724 = vmatpush1.bf16.msra.mxu1 %v4177_v19  ;;  %v4180_v21 = vld [vmem:[%s6251_s2 + $0x2c4] ss:$16 sps:$4 sm:$0xff]   ;;  %v4183_v23 = vld [vmem:[%s6251_s2 + $0x2c0] ss:$16 sps:$4 sm:$0xff]   ;;  %2672 = vmatprep.subr.bf16.mxu0 %v4178_v20  ;;  %v343_v19 = vld [vmem:[#allocation2 + $0x9] sm:$0xf] }
  0x2c   : > { %v4184_v24 = vld [vmem:[%s6251_s2 + $0xa4] ss:$16 sps:$4 sm:$0xff]   ;;  %2725 = vmatprep.subr.bf16.mxu1 %v4180_v21  ;;  %v4188_v26 = vld [vmem:[%s6251_s2 + $0xa0] ss:$16 sps:$4 sm:$0xff]   ;;  %v345_v21 = vld [vmem:[#allocation2 + $0x19] sm:$0xf] }
  0x2d   : > { %366 = vperm.xlu0 %4171, %v3697_v15   ;;  %v4186_v25 = vld [vmem:[%s6251_s2 + $0x2a4] ss:$16 sps:$4 sm:$0xff]   ;;  %v4189_v27 = vld [vmem:[%s6251_s2 + $0x2a0] ss:$16 sps:$4 sm:$0xff]  }
  0x2e   : > { %2673 = vmatpush1.bf16.msra.mxu0 %v4182_v22  ;;  %v4190_v28 = vld [vmem:[%s6251_s2 + $0x84] ss:$16 sps:$4 sm:$0xff]   ;;  %v4194_v30 = vld [vmem:[%s6251_s2 + $0x80] ss:$16 sps:$4 sm:$0xff]  }
  0x2f   : > { %2726 = vmatpush1.bf16.msra.mxu1 %v4183_v23  ;;  %2674 = vmatprep.subr.bf16.mxu0 %v4184_v24  ;;  %v4192_v29 = vld [vmem:[%s6251_s2 + $0x284] ss:$16 sps:$4 sm:$0xff]   ;;  %v4195_v31 = vld [vmem:[%s6251_s2 + $0x280] ss:$16 sps:$4 sm:$0xff]  }
  0x30   : > { %2727 = vmatprep.subr.bf16.mxu1 %v4186_v25  ;;  %v4196_v32 = vld [vmem:[%s6251_s2 + $0x64] ss:$16 sps:$4 sm:$0xff]   ;;  %v4200_v34 = vld [vmem:[%s6251_s2 + $0x60] ss:$16 sps:$4 sm:$0xff]   ;;  %v387_v25 = vld [vmem:[#allocation3 + $0x8] sm:$0xf] }
  0x31   : > { %v4198_v33 = vld [vmem:[%s6251_s2 + $0x264] ss:$16 sps:$4 sm:$0xff]   ;;  %v4201_v35 = vld [vmem:[%s6251_s2 + $0x260] ss:$16 sps:$4 sm:$0xff]  }
  0x32   : > { %2675 = vmatpush1.bf16.msra.mxu0 %v4188_v26  ;;  %v4202_v36 = vld [vmem:[%s6251_s2 + $0x44] ss:$16 sps:$4 sm:$0xff]   ;;  %v4206_v38 = vld [vmem:[%s6251_s2 + $0x40] ss:$16 sps:$4 sm:$0xff]   ;;  %v388_v26 = vld [vmem:[#allocation3 + $0xc] sm:$0xf] }
  0x33   : > { %2728 = vmatpush1.bf16.msra.mxu1 %v4189_v27  ;;  %2676 = vmatprep.subr.bf16.mxu0 %v4190_v28  ;;  %v4204_v37 = vld [vmem:[%s6251_s2 + $0x244] ss:$16 sps:$4 sm:$0xff]   ;;  %v4207_v39 = vld [vmem:[%s6251_s2 + $0x240] ss:$16 sps:$4 sm:$0xff]   ;;  %v347_v28 = vld [vmem:[#allocation2 + $0x39] sm:$0xf] }
  0x34   : > { %2729 = vmatprep.subr.bf16.mxu1 %v4192_v29  ;;  %v4208_v40 = vld [vmem:[%s6251_s2 + $0x24] ss:$16 sps:$4 sm:$0xff]   ;;  %v4212_v42 = vld [vmem:[%s6251_s2 + $0x20] ss:$16 sps:$4 sm:$0xff]  }
  0x35   : > { %v4210_v41 = vld [vmem:[%s6251_s2 + $0x224] ss:$16 sps:$4 sm:$0xff]   ;;  %v4213_v43 = vld [vmem:[%s6251_s2 + $0x220] ss:$16 sps:$4 sm:$0xff]  }
  0x36   : > { %2677 = vmatpush1.bf16.msra.mxu0 %v4194_v30  ;;  %v4214_v44 = vld [vmem:[%s6251_s2 + $0x4] ss:$16 sps:$4 sm:$0xff]   ;;  %v4218_v46 = vld [vmem:[%s6251_s2] ss:$16 sps:$4 sm:$0xff]   ;;  %v349_v30 = vld [vmem:[#allocation2 + $0x49] sm:$0xf] }
  0x37   : > { %2730 = vmatpush1.bf16.msra.mxu1 %v4195_v31  ;;  %2678 = vmatprep.subr.bf16.mxu0 %v4196_v32  ;;  %v4216_v45 = vld [vmem:[%s6251_s2 + $0x204] ss:$16 sps:$4 sm:$0xff]   ;;  %v4219_v47 = vld [vmem:[%s6251_s2 + $0x200] ss:$16 sps:$4 sm:$0xff]  }
  0x38   : > { %2731 = vmatprep.subr.bf16.mxu1 %v4198_v33  ;;  %v4220_v48 = vld [vmem:[%s6251_s2 + $0x1e4] ss:$16 sps:$4 sm:$0xff]   ;;  %v4224_v50 = vld [vmem:[%s6251_s2 + $0x1e0] ss:$16 sps:$4 sm:$0xff]  }
  0x39   : > { %v4222_v49 = vld [vmem:[%s6251_s2 + $0x3e4] ss:$16 sps:$4 sm:$0xff]   ;;  %v4225_v51 = vld [vmem:[%s6251_s2 + $0x3e0] ss:$16 sps:$4 sm:$0xff]  }
  0x3a   : > { %2679 = vmatpush1.bf16.msra.mxu0 %v4200_v34  ;;  %v4226_v52 = vld [vmem:[%s6251_s2 + $0x1c4] ss:$16 sps:$4 sm:$0xff]   ;;  %v4230_v54 = vld [vmem:[%s6251_s2 + $0x1c0] ss:$16 sps:$4 sm:$0xff]  }
  0x3b   : > { %2732 = vmatpush1.bf16.msra.mxu1 %v4201_v35  ;;  %2680 = vmatprep.subr.bf16.mxu0 %v4202_v36  ;;  %v4228_v53 = vld [vmem:[%s6251_s2 + $0x3c4] ss:$16 sps:$4 sm:$0xff]   ;;  %v4231_v55 = vld [vmem:[%s6251_s2 + $0x3c0] ss:$16 sps:$4 sm:$0xff]  }
  0x3c   : > { %2733 = vmatprep.subr.bf16.mxu1 %v4204_v37  ;;  %v4232_v56 = vld [vmem:[%s6251_s2 + $0x1a4] ss:$16 sps:$4 sm:$0xff]   ;;  %v4236_v58 = vld [vmem:[%s6251_s2 + $0x1a0] ss:$16 sps:$4 sm:$0xff]  }
  0x3d   : > { %v4234_v57 = vld [vmem:[%s6251_s2 + $0x3a4] ss:$16 sps:$4 sm:$0xff]   ;;  %v4237_v59 = vld [vmem:[%s6251_s2 + $0x3a0] ss:$16 sps:$4 sm:$0xff]  }
  0x3e   : > { %2681 = vmatpush1.bf16.msra.mxu0 %v4206_v38  ;;  %v4238_v60 = vld [vmem:[%s6251_s2 + $0x184] ss:$16 sps:$4 sm:$0xff]   ;;  %v4242_v62 = vld [vmem:[%s6251_s2 + $0x180] ss:$16 sps:$4 sm:$0xff]   ;;  %v391_v38 = vld [vmem:[#allocation3 + $0x18] sm:$0xf] }
  0x3f   : > { %2734 = vmatpush1.bf16.msra.mxu1 %v4207_v39  ;;  %2682 = vmatprep.subr.bf16.mxu0 %v4208_v40  ;;  %v4240_v61 = vld [vmem:[%s6251_s2 + $0x384] ss:$16 sps:$4 sm:$0xff]   ;;  %v4243_v63 = vld [vmem:[%s6251_s2 + $0x380] ss:$16 sps:$4 sm:$0xff]   ;;  %v392_v39 = vld [vmem:[#allocation3 + $0x1c] sm:$0xf] }
  0x40   : > { %2735 = vmatprep.subr.bf16.mxu1 %v4210_v41  ;;  %v4244_v0 = vld [vmem:[%s6251_s2 + $0x164] ss:$16 sps:$4 sm:$0xff]   ;;  %v4248_v2 = vld [vmem:[%s6251_s2 + $0x160] ss:$16 sps:$4 sm:$0xff]  }
  0x41   : > { %v4246_v1 = vld [vmem:[%s6251_s2 + $0x364] ss:$16 sps:$4 sm:$0xff]   ;;  %v4249_v3 = vld [vmem:[%s6251_s2 + $0x360] ss:$16 sps:$4 sm:$0xff]  }
  0x42   : > { %2683 = vmatpush1.bf16.msra.mxu0 %v4212_v42  ;;  %v4250_v4 = vld [vmem:[%s6251_s2 + $0x144] ss:$16 sps:$4 sm:$0xff]   ;;  %v4254_v6 = vld [vmem:[%s6251_s2 + $0x140] ss:$16 sps:$4 sm:$0xff]  }
  0x43   : > { %2736 = vmatpush1.bf16.msra.mxu1 %v4213_v43  ;;  %2684 = vmatprep.subr.bf16.mxu0 %v4214_v44  ;;  %v4252_v5 = vld [vmem:[%s6251_s2 + $0x344] ss:$16 sps:$4 sm:$0xff]   ;;  %v4255_v7 = vld [vmem:[%s6251_s2 + $0x340] ss:$16 sps:$4 sm:$0xff]  }
  0x44   : > { %2737 = vmatprep.subr.bf16.mxu1 %v4216_v45  ;;  %v4256_v8 = vld [vmem:[%s6251_s2 + $0x124] ss:$16 sps:$4 sm:$0xff]   ;;  %v4260_v10 = vld [vmem:[%s6251_s2 + $0x120] ss:$16 sps:$4 sm:$0xff]  }
  0x45   : > { %v4258_v9 = vld [vmem:[%s6251_s2 + $0x324] ss:$16 sps:$4 sm:$0xff]   ;;  %v4261_v11 = vld [vmem:[%s6251_s2 + $0x320] ss:$16 sps:$4 sm:$0xff]  }
  0x46   : > { %2685 = vmatpush1.bf16.msra.mxu0 %v4218_v46  ;;  %v4262_v12 = vld [vmem:[%s6251_s2 + $0x104] ss:$16 sps:$4 sm:$0xff]   ;;  %v4266_v15 = vld [vmem:[%s6251_s2 + $0x100] ss:$16 sps:$4 sm:$0xff]  }
  0x47   : > { %2738 = vmatpush1.bf16.msra.mxu1 %v4219_v47  ;;  %2686 = vmatprep.subr.bf16.mxu0 %v4220_v48  ;;  %v4264_v13 = vld [vmem:[%s6251_s2 + $0x304] ss:$16 sps:$4 sm:$0xff]   ;;  %v4267_v16 = vld [vmem:[%s6251_s2 + $0x300] ss:$16 sps:$4 sm:$0xff]  }
  0x48   : > { %2739 = vmatprep.subr.bf16.mxu1 %v4222_v49  ;;  %v4284_v17 = vld [vmem:[%s6251_s2 + $0x4e4] ss:$16 sps:$4 sm:$0xff]   ;;  %v385_v23 = vld [vmem:[#allocation3] sm:$0xf]  ;;  %v389_v36 = vld [vmem:[#allocation3 + $0x10] sm:$0xf] }
  0x49   : > { %v4287_v18 = vld [vmem:[%s6251_s2 + $0x6e4] ss:$16 sps:$4 sm:$0xff]  }
  0x4a   : > { %2687 = vmatpush2.bf16.msra.mxu0 %v4224_v50  ;;  %v344_v20 = vld [vmem:[#allocation2 + $0x11] sm:$0xf]  ;;  %v346_v22 = vld [vmem:[#allocation2 + $0x21] sm:$0xf] }
  0x4b   : > { %2740 = vmatpush2.bf16.msra.mxu1 %v4225_v51  ;;  %2688 = vmatprep.subr.bf16.mxu0 %v4226_v52  ;;  %v386_v24 = vld [vmem:[#allocation3 + $0x4] sm:$0xf]  ;;  %v350_v31 = vld [vmem:[#allocation2 + $0x51] sm:$0xf] }
  0x4c   : > { %2741 = vmatprep.subr.bf16.mxu1 %v4228_v53  ;;  %v348_v29 = vld [vmem:[#allocation2 + $0x41] sm:$0xf]  ;;  %v390_v37 = vld [vmem:[#allocation3 + $0x14] sm:$0xf] }
  0x4e   : > { %2689 = vmatpush2.bf16.msra.mxu0 %v4230_v54 }
  0x4f   : > { %2742 = vmatpush2.bf16.msra.mxu1 %v4231_v55  ;;  %2690 = vmatprep.subr.bf16.mxu0 %v4232_v56 }
  0x50   : > { %2743 = vmatprep.subr.bf16.mxu1 %v4234_v57 }
  0x52   : > { %2691 = vmatpush2.bf16.msra.mxu0 %v4236_v58 }
  0x53   : > { %2744 = vmatpush2.bf16.msra.mxu1 %v4237_v59  ;;  %2692 = vmatprep.subr.bf16.mxu0 %v4238_v60 }
  0x54   : > { %2745 = vmatprep.subr.bf16.mxu1 %v4240_v61 }
  0x56   : > { %2693 = vmatpush2.bf16.msra.mxu0 %v4242_v62 }
  0x57   : > { %2746 = vmatpush2.bf16.msra.mxu1 %v4243_v63  ;;  %2694 = vmatprep.subr.bf16.mxu0 %v4244_v0 }
  0x58   : > { %2747 = vmatprep.subr.bf16.mxu1 %v4246_v1 }
  0x5a   : > { %2695 = vmatpush2.bf16.msra.mxu0 %v4248_v2 }
  0x5b   : > { %2748 = vmatpush2.bf16.msra.mxu1 %v4249_v3  ;;  %2696 = vmatprep.subr.bf16.mxu0 %v4250_v4 }
  0x5c   : > { %2749 = vmatprep.subr.bf16.mxu1 %v4252_v5 }
  0x5e   : > { %2697 = vmatpush2.bf16.msra.mxu0 %v4254_v6 }
  0x5f   : > { %2750 = vmatpush2.bf16.msra.mxu1 %v4255_v7  ;;  %2698 = vmatprep.subr.bf16.mxu0 %v4256_v8 }
  0x60   : > { %2751 = vmatprep.subr.bf16.mxu1 %v4258_v9 }
  0x62   : > { %2699 = vmatpush2.bf16.msra.mxu0 %v4260_v10 }
  0x63   : > { %2752 = vmatpush2.bf16.msra.mxu1 %v4261_v11  ;;  %2700 = vmatprep.subr.bf16.mxu0 %v4262_v12 }
  0x64   : > { %2753 = vmatprep.subr.bf16.mxu1 %v4264_v13 }
  0x66   : > { %2701 = vmatpush2.bf16.msra.mxu0 %v4266_v15  ;;  %v4282_v15 = vld [vmem:[%s6251_s2 + $0x4e0] ss:$16 sps:$4 sm:$0xff]  }
  0x67   : > { %2754 = vmatpush2.bf16.msra.mxu1 %v4267_v16  ;;  %2776 = vmatprep.subr.bf16.mxu0 %v4284_v17 }
  0x68   : > { %2829 = vmatprep.subr.bf16.mxu1 %v4287_v18 }
  0xa4   : > { %v363_v27 = vpop.permute.xlu0 %362 }
  0xa5   : > { %v369_v32 = vmul.f32 %v363_v27, %v343_v19  ;;  %v370_v33 = vmul.f32 %v363_v27, %v344_v20  ;;  %v371_v34 = vmul.f32 %v363_v27, %v345_v21  ;;  %v372_v35 = vmul.f32 %v363_v27, %v346_v22  ;;  %v4302_v20 = vld [vmem:[%s6251_s2 + $0x4c4] ss:$16 sps:$4 sm:$0xff]  }
  0xa6   : > { %v393_v40 = vmul.f32 %v385_v23, %v363_v27  ;;  %v394_v41 = vmul.f32 %v386_v24, %v363_v27  ;;  %v395_v42 = vmul.f32 %v387_v25, %v363_v27  ;;  %v396_v43 = vmul.f32 %v388_v26, %v363_v27  ;;  %v4285_v25 = vld [vmem:[%s6251_s2 + $0x6e0] ss:$16 sps:$4 sm:$0xff]  }
  0xa7   : > { %377 = vst [vmem:[#allocation2 + $0x9] sm:$0xf] %v369_v32  ;;  %378 = vst [vmem:[#allocation2 + $0x11] sm:$0xf] %v370_v33  ;;  %v4300_v26 = vld [vmem:[%s6251_s2 + $0x4c0] ss:$16 sps:$4 sm:$0xff]  }
  0xa8   : > { %379 = vst [vmem:[#allocation2 + $0x19] sm:$0xf] %v371_v34  ;;  %380 = vst [vmem:[#allocation2 + $0x21] sm:$0xf] %v372_v35  ;;  %v367_v44 = vpop.permute.xlu0 %366  ;;  %v4308_v32 = vld [vmem:[%s6251_s2 + $0x4a4] ss:$16 sps:$4 sm:$0xff]  }
  0xa9   : > { %401 = vst [vmem:[#allocation3] sm:$0xf] %v393_v40  ;;  %402 = vst [vmem:[#allocation3 + $0x4] sm:$0xf] %v394_v41  ;;  %v373_v45 = vmul.f32 %v367_v44, %v347_v28  ;;  %v374_v46 = vmul.f32 %v367_v44, %v348_v29  ;;  %v375_v47 = vmul.f32 %v367_v44, %v349_v30  ;;  %v4305_v30 = vld [vmem:[%s6251_s2 + $0x6c4] ss:$16 sps:$4 sm:$0xff]  }
  0xaa   : > { %403 = vst [vmem:[#allocation3 + $0x8] sm:$0xf] %v395_v42  ;;  %404 = vst [vmem:[#allocation3 + $0xc] sm:$0xf] %v396_v43  ;;  %v376_v48 = vmul.f32 %v367_v44, %v350_v31  ;;  %v397_v49 = vmul.f32 %v389_v36, %v367_v44  ;;  %v398_v50 = vmul.f32 %v390_v37, %v367_v44  ;;  %v4303_v36 = vld [vmem:[%s6251_s2 + $0x6c0] ss:$16 sps:$4 sm:$0xff]  }
  0xab   : > { %v399_v51 = vmul.f32 %v391_v38, %v367_v44  ;;  %v400_v52 = vmul.f32 %v392_v39, %v367_v44  ;;  %381 = vst [vmem:[#allocation2 + $0x39] sm:$0xf] %v373_v45  ;;  %382 = vst [vmem:[#allocation2 + $0x41] sm:$0xf] %v374_v46  ;;  %v4306_v37 = vld [vmem:[%s6251_s2 + $0x4a0] ss:$16 sps:$4 sm:$0xff]  }
  0xac   : > { %383 = vst [vmem:[#allocation2 + $0x49] sm:$0xf] %v375_v47  ;;  %384 = vst [vmem:[#allocation2 + $0x51] sm:$0xf] %v376_v48  ;;  %v4311_v43 = vld [vmem:[%s6251_s2 + $0x6a4] ss:$16 sps:$4 sm:$0xff]  }
  0xad   : > { %405 = vst [vmem:[#allocation3 + $0x10] sm:$0xf] %v397_v49  ;;  %406 = vst [vmem:[#allocation3 + $0x14] sm:$0xf] %v398_v50  ;;  %v4329_v44 = vld [vmem:[%s6251_s2 + $0x484] ss:$16 sps:$4 sm:$0xff]  }
  0xae   : > { %407 = vst [vmem:[#allocation3 + $0x18] sm:$0xf] %v399_v51  ;;  %408 = vst [vmem:[#allocation3 + $0x1c] sm:$0xf] %v400_v52  ;;  %v4268_v53 = vld [vmem:[#allocation2] ss:$8 sps:$4 sm:$0xff]  }
  0xaf   : > { %v4269_v54 = vld [vmem:[#allocation2 + $0x10] ss:$8 sps:$4 sm:$0xff]   ;;  %v4270_v55 = vld [vmem:[#allocation2 + $0x1] ss:$8 sps:$4 sm:$0xff]   ;;  %v4075_v56 = vpack.c.bf16 %v4268_v53, %v4268_v53 }
  0xb0   : > { %v4076_v57 = vpack.c.bf16 %v4269_v54, %v4269_v54  ;;  %v4271_v58 = vld [vmem:[#allocation2 + $0x11] ss:$8 sps:$4 sm:$0xff]   ;;  %v4079_v59 = vpack.c.bf16 %v4270_v55, %v4270_v55  ;;  %v4275_v60 = vld [vmem:[#allocation2 + $0x2] ss:$8 sps:$4 sm:$0xff]  }
  0xb1   : > { %v4276_v61 = vld [vmem:[#allocation2 + $0x12] ss:$8 sps:$4 sm:$0xff]   ;;  %449 = vst [vmem:[#allocation4] sm:$0xf] %v4075_v56  ;;  %v4080_v62 = vpack.c.bf16 %v4271_v58, %v4271_v58  ;;  %v4083_v63 = vpack.c.bf16 %v4275_v60, %v4275_v60  ;;  %v4321_v49 = vld [vmem:[#allocation2 + $0x20] ss:$8 sps:$4 sm:$0xff]  }
  0xb2   : > { %450 = vst [vmem:[#allocation4 + $0x24] sm:$0xf] %v4076_v57  ;;  %493 = vst [vmem:[#allocation4 + $0x4] sm:$0xf] %v4079_v59  ;;  %v4084_v0 = vpack.c.bf16 %v4276_v61, %v4276_v61  ;;  %v4277_v1 = vld [vmem:[#allocation2 + $0x8] ss:$8 sps:$4 sm:$0xff]   ;;  %v4100_v54 = vpack.c.bf16 %v4321_v49, %v4321_v49 }
  0xb3   : > { %v4278_v2 = vld [vmem:[#allocation2 + $0x18] ss:$8 sps:$4 sm:$0xff]   ;;  %494 = vst [vmem:[#allocation4 + $0x28] sm:$0xf] %v4080_v62  ;;  %537 = vst [vmem:[#allocation4 + $0x8] sm:$0xf] %v4083_v63  ;;  %v4087_v3 = vpack.c.bf16 %v4277_v1, %v4277_v1 }
  0xb4   : > { %538 = vst [vmem:[#allocation4 + $0x2c] sm:$0xf] %v4084_v0  ;;  %v4088_v4 = vpack.c.bf16 %v4278_v2, %v4278_v2  ;;  %v4288_v5 = vld [vmem:[#allocation2 + $0x30] ss:$8 sps:$4 sm:$0xff]   ;;  %v4289_v6 = vld [vmem:[#allocation2 + $0x40] ss:$8 sps:$4 sm:$0xff]  }
  0xb5   : > { %v4290_v7 = vld [vmem:[#allocation2 + $0x31] ss:$8 sps:$4 sm:$0xff]   ;;  %581 = vst [vmem:[#allocation4 + $0xc] sm:$0xf] %v4087_v3  ;;  %v4077_v8 = vpack.c.bf16 %v4288_v5, %v4288_v5  ;;  %v4078_v9 = vpack.c.bf16 %v4289_v6, %v4289_v6  ;;  %v4291_v10 = vld [vmem:[#allocation2 + $0x41] ss:$8 sps:$4 sm:$0xff]  }
  0xb6   : > { %582 = vst [vmem:[#allocation4 + $0x30] sm:$0xf] %v4088_v4  ;;  %v4081_v11 = vpack.c.bf16 %v4290_v7, %v4290_v7  ;;  %v4294_v12 = vld [vmem:[#allocation2 + $0x32] ss:$8 sps:$4 sm:$0xff]   ;;  %v4295_v13 = vld [vmem:[#allocation2 + $0x42] ss:$8 sps:$4 sm:$0xff]   ;;  %v4082_v16 = vpack.c.bf16 %v4291_v10, %v4291_v10 }
  0xb7   : > { %451 = vst [vmem:[#allocation4 + $0x48] sm:$0xf] %v4077_v8  ;;  %452 = vst [vmem:[#allocation4 + $0x6c] sm:$0xf] %v4078_v9  ;;  %v4085_v17 = vpack.c.bf16 %v4294_v12, %v4294_v12  ;;  %v4086_v18 = vpack.c.bf16 %v4295_v13, %v4295_v13  ;;  %v4296_v19 = vld [vmem:[#allocation2 + $0x38] ss:$8 sps:$4 sm:$0xff]  }
  0xb8   : > { %495 = vst [vmem:[#allocation4 + $0x4c] sm:$0xf] %v4081_v11  ;;  %496 = vst [vmem:[#allocation4 + $0x70] sm:$0xf] %v4082_v16  ;;  %v4297_v23 = vld [vmem:[#allocation2 + $0x48] ss:$8 sps:$4 sm:$0xff]   ;;  %v4089_v24 = vpack.c.bf16 %v4296_v19, %v4296_v19 }
  0xb9   : > { %v5267_v21 = vld [vmem:[#allocation4] ss:$36 sps:$4 sm:$0xff]   ;;  %539 = vst [vmem:[#allocation4 + $0x50] sm:$0xf] %v4085_v17  ;;  %540 = vst [vmem:[#allocation4 + $0x74] sm:$0xf] %v4086_v18  ;;  %v4090_v29 = vpack.c.bf16 %v4297_v23, %v4297_v23 }
  0xba   : > { %v5269_v22 = vld [vmem:[#allocation4 + $0x4] ss:$36 sps:$4 sm:$0xff]   ;;  %583 = vst [vmem:[#allocation4 + $0x54] sm:$0xf] %v4089_v24  ;;  %v4320_v47 = vld [vmem:[#allocation2 + $0x10] ss:$8 sps:$4 sm:$0xff]  }
  0xbb   : > { %2702 = vmatprep.mubr.bf16.mxu0 %v5269_v22  ;;  %v4313_v27 = vld [vmem:[#allocation2 + $0x9] ss:$8 sps:$4 sm:$0xff]   ;;  %v4314_v33 = vld [vmem:[#allocation2 + $0x19] ss:$8 sps:$4 sm:$0xff]   ;;  %584 = vst [vmem:[#allocation4 + $0x78] sm:$0xf] %v4090_v29  ;;  %v4099_v51 = vpack.c.bf16 %v4320_v47, %v4320_v47 }
  0xbc   : > { %v4279_v28 = vld [vmem:[#allocation4 + $0x8] ss:$36 sps:$4 sm:$0xff]   ;;  %2703 = vmatmul.mubr.bf16.vlgmr.msra.gmra.mxu0 %v5267_v21  ;;  %v4091_v34 = vpack.c.bf16 %v4313_v27, %v4313_v27  ;;  %v4092_v38 = vpack.c.bf16 %v4314_v33, %v4314_v33  ;;  %v4316_v40 = vld [vmem:[#allocation2 + $0x1a] ss:$8 sps:$4 sm:$0xff]   ;;  %715 = vst [vmem:[#allocation4 + $0x3c] sm:$0xf] %v4100_v54 }
  0xbd   : > { %v5282_v31 = vld [vmem:[#allocation4 + $0xc] ss:$36 sps:$4 sm:$0xff]   ;;  %2777 = vmatpush1.bf16.msra.mxu0 %v4282_v15  ;;  %v4096_v46 = vpack.c.bf16 %v4316_v40, %v4316_v40  ;;  %v4332_v56 = vld [vmem:[%s6251_s2 + $0x684] ss:$16 sps:$4 sm:$0xff]   ;;  %714 = vst [vmem:[#allocation4 + $0x18] sm:$0xf] %v4099_v51 }
  0xbe   : > { %2778 = vmatprep.subr.bf16.mxu0 %v4302_v20  ;;  %2755 = vmatprep.mubr.bf16.mxu1 %v5282_v31  ;;  %625 = vst [vmem:[#allocation4 + $0x10] sm:$0xf] %v4091_v34  ;;  %v4315_v39 = vld [vmem:[#allocation2 + $0xa] ss:$8 sps:$4 sm:$0xff]   ;;  %626 = vst [vmem:[#allocation4 + $0x34] sm:$0xf] %v4092_v38 }
  0xbf   : > { %v840_v35 = vld [vmem:[#allocation4 + $0x48] sm:$0xff]  ;;  %2756 = vmatmul.mubr.bf16.vlgmr.msra.gmra.mxu1 %v4279_v28  ;;  %v4095_v45 = vpack.c.bf16 %v4315_v39, %v4315_v39  ;;  %v4309_v50 = vld [vmem:[%s6251_s2 + $0x6a0] ss:$16 sps:$4 sm:$0xff]   ;;  %670 = vst [vmem:[#allocation4 + $0x38] sm:$0xf] %v4096_v46 }
  0xc0   : > { %v845_v41 = vld [vmem:[#allocation4 + $0x6c] sm:$0xff]  ;;  %2830 = vmatpush1.bf16.msra.mxu1 %v4285_v25  ;;  %v4335_v57 = vld [vmem:[%s6251_s2 + $0x464] ss:$16 sps:$4 sm:$0xff]   ;;  %v4417_v12 = vld [vmem:[#allocation2 + $0x40] ss:$8 sps:$4 sm:$0xff]  }
  0xc1   : > { %v5294_v42 = vld [vmem:[#allocation4 + $0x4c] ss:$36 sps:$4 sm:$0xff]   ;;  %2779 = vmatpush1.bf16.msra.mxu0 %v4300_v26  ;;  %2831 = vmatprep.subr.bf16.mxu1 %v4305_v30  ;;  %v5303_v48 = vcombine.low %v840_v35, %v845_v41  ;;  %669 = vst [vmem:[#allocation4 + $0x14] sm:$0xf] %v4095_v45  ;;  %v4411_v62 = vld [vmem:[#allocation2 + $0x39] ss:$8 sps:$4 sm:$0xff]   ;;  %v4101_v17 = vpack.c.bf16 %v4417_v12, %v4417_v12 }
  0xc2   : > { %2712 = vmatprep.mubr.bf16.mxu0 %v5294_v42  ;;  %2780 = vmatprep.subr.bf16.mxu0 %v4308_v32  ;;  %v4322_v52 = vld [vmem:[#allocation2 + $0x11] ss:$8 sps:$4 sm:$0xff]   ;;  %v4323_v55 = vld [vmem:[#allocation2 + $0x21] ss:$8 sps:$4 sm:$0xff]   ;;  %v4093_v3 = vpack.c.bf16 %v4411_v62, %v4411_v62 }
  0xc3   : > { %v4327_v53 = vld [vmem:[%s6251_s2 + $0x480] ss:$16 sps:$4 sm:$0xff]   ;;  %v5318_v58 = vld [vmem:[#allocation4 + $0x54] ss:$36 sps:$4 sm:$0xff]   ;;  %v4103_v60 = vpack.c.bf16 %v4322_v52, %v4322_v52  ;;  %v4104_v61 = vpack.c.bf16 %v4323_v55, %v4323_v55  ;;  %716 = vst [vmem:[#allocation4 + $0x60] sm:$0xf] %v4101_v17 }
  0xc4   : > { %2713 = vmatmul.mubr.bf16.gmra.mxu0 %v5303_v48  ;;  %2832 = vmatpush1.bf16.msra.mxu1 %v4303_v36  ;;  %v5320_v59 = vld [vmem:[#allocation4 + $0x50] ss:$36 sps:$4 sm:$0xff]   ;;  %v4413_v4 = vld [vmem:[#allocation2 + $0x3a] ss:$8 sps:$4 sm:$0xff]   ;;  %627 = vst [vmem:[#allocation4 + $0x58] sm:$0xf] %v4093_v3 }
  0xc5   : > { %2781 = vmatpush1.bf16.msra.mxu0 %v4306_v37  ;;  %2833 = vmatprep.subr.bf16.mxu1 %v4311_v43  ;;  %758 = vst [vmem:[#allocation4 + $0x1c] sm:$0xf] %v4103_v60  ;;  %v4330_v63 = vld [vmem:[%s6251_s2 + $0x680] ss:$16 sps:$4 sm:$0xff]   ;;  %759 = vst [vmem:[#allocation4 + $0x40] sm:$0xf] %v4104_v61  ;;  %v4097_v8 = vpack.c.bf16 %v4413_v4, %v4413_v4 }
  0xc6   : > { %2782 = vmatprep.subr.bf16.mxu0 %v4329_v44  ;;  %2765 = vmatprep.mubr.bf16.mxu1 %v5318_v58  ;;  %v4412_v0 = vld [vmem:[#allocation2 + $0x49] ss:$8 sps:$4 sm:$0xff]  }
  0xc7   : > { %2766 = vmatmul.mubr.bf16.gmra.mxu1 %v5320_v59  ;;  %v4333_v1 = vld [vmem:[%s6251_s2 + $0x460] ss:$16 sps:$4 sm:$0xff]   ;;  %v4338_v2 = vld [vmem:[%s6251_s2 + $0x664] ss:$16 sps:$4 sm:$0xff]   ;;  %v4094_v5 = vpack.c.bf16 %v4412_v0, %v4412_v0  ;;  %671 = vst [vmem:[#allocation4 + $0x5c] sm:$0xf] %v4097_v8 }
  0xc8   : > { %2834 = vmatpush1.bf16.msra.mxu1 %v4309_v50  ;;  %v4414_v6 = vld [vmem:[#allocation2 + $0x4a] ss:$8 sps:$4 sm:$0xff]  }
  0xc9   : > { %2783 = vmatpush1.bf16.msra.mxu0 %v4327_v53  ;;  %2835 = vmatprep.subr.bf16.mxu1 %v4332_v56  ;;  %v4341_v7 = vld [vmem:[%s6251_s2 + $0x444] ss:$16 sps:$4 sm:$0xff]   ;;  %v4336_v10 = vld [vmem:[%s6251_s2 + $0x660] ss:$16 sps:$4 sm:$0xff]   ;;  %628 = vst [vmem:[#allocation4 + $0x7c] sm:$0xf] %v4094_v5  ;;  %v4098_v11 = vpack.c.bf16 %v4414_v6, %v4414_v6 }
  0xca   : > { %2784 = vmatprep.subr.bf16.mxu0 %v4335_v57  ;;  %v5336_v9 = vld [vmem:[#allocation4 + $0x14] ss:$36 sps:$4 sm:$0xff]   ;;  %v4339_v13 = vld [vmem:[%s6251_s2 + $0x440] ss:$16 sps:$4 sm:$0xff]  }
  0xcb   : > { %v4344_v15 = vld [vmem:[%s6251_s2 + $0x644] ss:$16 sps:$4 sm:$0xff]   ;;  %v4418_v16 = vld [vmem:[#allocation2 + $0x50] ss:$8 sps:$4 sm:$0xff]   ;;  %2808 = vmatprep.mubr.bf16.mxu0 %v5336_v9  ;;  %672 = vst [vmem:[#allocation4 + $0x80] sm:$0xf] %v4098_v11 }
  0xcc   : > { %2836 = vmatpush1.bf16.msra.mxu1 %v4330_v63  ;;  %v4419_v18 = vld [vmem:[#allocation2 + $0x41] ss:$8 sps:$4 sm:$0xff]   ;;  %v4420_v19 = vld [vmem:[#allocation2 + $0x51] ss:$8 sps:$4 sm:$0xff]   ;;  %v4102_v20 = vpack.c.bf16 %v4418_v16, %v4418_v16 }
  0xcd   : > { %2837 = vmatprep.subr.bf16.mxu1 %v4338_v2  ;;  %2785 = vmatpush1.bf16.msra.mxu0 %v4333_v1  ;;  %v5348_v23 = vld [vmem:[#allocation4 + $0x1c] ss:$36 sps:$4 sm:$0xff]   ;;  %v4347_v25 = vld [vmem:[%s6251_s2 + $0x424] ss:$16 sps:$4 sm:$0xff]   ;;  %v4105_v26 = vpack.c.bf16 %v4419_v18, %v4419_v18  ;;  %v4106_v27 = vpack.c.bf16 %v4420_v19, %v4420_v19 }
  0xce   : > { %2786 = vmatprep.subr.bf16.mxu0 %v4341_v7  ;;  %v4342_v24 = vld [vmem:[%s6251_s2 + $0x640] ss:$16 sps:$4 sm:$0xff]   ;;  %717 = vst [vmem:[#allocation4 + $0x84] sm:$0xf] %v4102_v20  ;;  %2861 = vmatprep.mubr.bf16.mxu1 %v5348_v23  ;;  %v4350_v32 = vld [vmem:[%s6251_s2 + $0x624] ss:$16 sps:$4 sm:$0xff]  }
  0xcf   : > { %v4345_v28 = vld [vmem:[%s6251_s2 + $0x420] ss:$16 sps:$4 sm:$0xff]   ;;  %760 = vst [vmem:[#allocation4 + $0x64] sm:$0xf] %v4105_v26  ;;  %761 = vst [vmem:[#allocation4 + $0x88] sm:$0xf] %v4106_v27 }
  0xd0   : > { %v4466_v29 = vld [vmem:[#allocation2 + $0x12] ss:$8 sps:$4 sm:$0xff]   ;;  %v4467_v30 = vld [vmem:[#allocation2 + $0x22] ss:$8 sps:$4 sm:$0xff]   ;;  %2838 = vmatpush1.bf16.msra.mxu1 %v4336_v10 }
  0xd1   : > { %2839 = vmatprep.subr.bf16.mxu1 %v4344_v15  ;;  %2787 = vmatpush1.bf16.msra.mxu0 %v4339_v13  ;;  %v4107_v33 = vpack.c.bf16 %v4466_v29, %v4466_v29  ;;  %v4108_v34 = vpack.c.bf16 %v4467_v30, %v4467_v30  ;;  %v4481_v35 = vld [vmem:[#allocation2 + $0x42] ss:$8 sps:$4 sm:$0xff]   ;;  %v4482_v36 = vld [vmem:[#allocation2 + $0x52] ss:$8 sps:$4 sm:$0xff]  }
  0xd2   : > { %2788 = vmatprep.subr.bf16.mxu0 %v4347_v25  ;;  %v4353_v37 = vld [vmem:[%s6251_s2 + $0x404] ss:$16 sps:$4 sm:$0xff]   ;;  %v4109_v38 = vpack.c.bf16 %v4481_v35, %v4481_v35  ;;  %v4110_v39 = vpack.c.bf16 %v4482_v36, %v4482_v36  ;;  %v4348_v40 = vld [vmem:[%s6251_s2 + $0x620] ss:$16 sps:$4 sm:$0xff]   ;;  %v4410_v20 = vld [vmem:[%s6251_s2 + $0xec] ss:$16 sps:$4 sm:$0xff]  }
  0xd3   : > { %802 = vst [vmem:[#allocation4 + $0x20] sm:$0xf] %v4107_v33  ;;  %803 = vst [vmem:[#allocation4 + $0x44] sm:$0xf] %v4108_v34  ;;  %v4351_v41 = vld [vmem:[%s6251_s2 + $0x400] ss:$16 sps:$4 sm:$0xff]  }
  0xd4   : > { %2840 = vmatpush1.bf16.msra.mxu1 %v4342_v24  ;;  %v4356_v43 = vld [vmem:[%s6251_s2 + $0x604] ss:$16 sps:$4 sm:$0xff]   ;;  %804 = vst [vmem:[#allocation4 + $0x68] sm:$0xf] %v4109_v38  ;;  %805 = vst [vmem:[#allocation4 + $0x8c] sm:$0xf] %v4110_v39 }
  0xd5   : > { %2841 = vmatprep.subr.bf16.mxu1 %v4350_v32  ;;  %2789 = vmatpush1.bf16.msra.mxu0 %v4345_v28  ;;  %v4359_v44 = vld [vmem:[%s6251_s2 + $0x5e4] ss:$16 sps:$4 sm:$0xff]   ;;  %v4354_v45 = vld [vmem:[%s6251_s2 + $0x600] ss:$16 sps:$4 sm:$0xff]   ;;  %v4408_v25 = vld [vmem:[%s6251_s2 + $0xe8] ss:$16 sps:$4 sm:$0xff]  }
  0xd6   : > { %2790 = vmatprep.subr.bf16.mxu0 %v4353_v37  ;;  %v4357_v46 = vld [vmem:[%s6251_s2 + $0x5e0] ss:$16 sps:$4 sm:$0xff]   ;;  %v4362_v47 = vld [vmem:[%s6251_s2 + $0x7e4] ss:$16 sps:$4 sm:$0xff]   ;;  %v4428_v29 = vld [vmem:[%s6251_s2 + $0xcc] ss:$16 sps:$4 sm:$0xff]  }
  0xd7   : > { %v4365_v49 = vld [vmem:[%s6251_s2 + $0x5c4] ss:$16 sps:$4 sm:$0xff]   ;;  %v4360_v50 = vld [vmem:[%s6251_s2 + $0x7e0] ss:$16 sps:$4 sm:$0xff]   ;;  %v5500_v30 = vld [vmem:[#allocation4 + $0x18] ss:$36 sps:$4 sm:$0xff]  }
  0xd8   : > { %2842 = vmatpush1.bf16.msra.mxu1 %v4348_v40  ;;  %v4363_v51 = vld [vmem:[%s6251_s2 + $0x5c0] ss:$16 sps:$4 sm:$0xff]   ;;  %v4368_v52 = vld [vmem:[%s6251_s2 + $0x7c4] ss:$16 sps:$4 sm:$0xff]   ;;  %v842_v34 = vld [vmem:[#allocation4 + $0x58] sm:$0xff] }
  0xd9   : > { %2843 = vmatprep.subr.bf16.mxu1 %v4356_v43  ;;  %2791 = vmatpush1.bf16.msra.mxu0 %v4351_v41  ;;  %v4371_v53 = vld [vmem:[%s6251_s2 + $0x5a4] ss:$16 sps:$4 sm:$0xff]   ;;  %v4366_v54 = vld [vmem:[%s6251_s2 + $0x7c0] ss:$16 sps:$4 sm:$0xff]   ;;  %v4426_v36 = vld [vmem:[%s6251_s2 + $0xc8] ss:$16 sps:$4 sm:$0xff]  }
  0xda   : > { %2792 = vmatprep.subr.bf16.mxu0 %v4359_v44  ;;  %v4369_v55 = vld [vmem:[%s6251_s2 + $0x5a0] ss:$16 sps:$4 sm:$0xff]   ;;  %v4374_v56 = vld [vmem:[%s6251_s2 + $0x7a4] ss:$16 sps:$4 sm:$0xff]   ;;  %v4435_v37 = vld [vmem:[%s6251_s2 + $0xac] ss:$16 sps:$4 sm:$0xff]  }
  0xdb   : > { %v4377_v57 = vld [vmem:[%s6251_s2 + $0x584] ss:$16 sps:$4 sm:$0xff]   ;;  %v4372_v60 = vld [vmem:[%s6251_s2 + $0x7a0] ss:$16 sps:$4 sm:$0xff]   ;;  %v4433_v41 = vld [vmem:[%s6251_s2 + $0xa8] ss:$16 sps:$4 sm:$0xff]  }
  0xdc   : > { %2844 = vmatpush1.bf16.msra.mxu1 %v4354_v45  ;;  %v4375_v61 = vld [vmem:[%s6251_s2 + $0x580] ss:$16 sps:$4 sm:$0xff]   ;;  %v4380_v62 = vld [vmem:[%s6251_s2 + $0x784] ss:$16 sps:$4 sm:$0xff]   ;;  %v4441_v43 = vld [vmem:[%s6251_s2 + $0x8c] ss:$16 sps:$4 sm:$0xff]  }
  0xdd   : > { %2845 = vmatprep.subr.bf16.mxu1 %v4362_v47  ;;  %2793 = vmatpush2.bf16.msra.mxu0 %v4357_v46  ;;  %v4383_v63 = vld [vmem:[%s6251_s2 + $0x564] ss:$16 sps:$4 sm:$0xff]   ;;  %v4378_v0 = vld [vmem:[%s6251_s2 + $0x780] ss:$16 sps:$4 sm:$0xff]   ;;  %v4439_v47 = vld [vmem:[%s6251_s2 + $0x88] ss:$16 sps:$4 sm:$0xff]  }
  0xde   : > { %2794 = vmatprep.subr.bf16.mxu0 %v4365_v49  ;;  %v4381_v1 = vld [vmem:[%s6251_s2 + $0x560] ss:$16 sps:$4 sm:$0xff]   ;;  %v4386_v2 = vld [vmem:[%s6251_s2 + $0x764] ss:$16 sps:$4 sm:$0xff]   ;;  %v4447_v49 = vld [vmem:[%s6251_s2 + $0x6c] ss:$16 sps:$4 sm:$0xff]  }
  0xdf   : > { %v4389_v3 = vld [vmem:[%s6251_s2 + $0x544] ss:$16 sps:$4 sm:$0xff]   ;;  %v4384_v4 = vld [vmem:[%s6251_s2 + $0x760] ss:$16 sps:$4 sm:$0xff]  }
  0xe0   : > { %2846 = vmatpush2.bf16.msra.mxu1 %v4360_v50  ;;  %v4387_v5 = vld [vmem:[%s6251_s2 + $0x540] ss:$16 sps:$4 sm:$0xff]   ;;  %v4392_v6 = vld [vmem:[%s6251_s2 + $0x744] ss:$16 sps:$4 sm:$0xff]  }
  0xe1   : > { %2847 = vmatprep.subr.bf16.mxu1 %v4368_v52  ;;  %2795 = vmatpush2.bf16.msra.mxu0 %v4363_v51  ;;  %v4395_v7 = vld [vmem:[%s6251_s2 + $0x524] ss:$16 sps:$4 sm:$0xff]   ;;  %v4390_v8 = vld [vmem:[%s6251_s2 + $0x740] ss:$16 sps:$4 sm:$0xff]   ;;  %v4453_v52 = vld [vmem:[%s6251_s2 + $0x4c] ss:$16 sps:$4 sm:$0xff]  }
  0xe2   : > { %2796 = vmatprep.subr.bf16.mxu0 %v4371_v53  ;;  %v4393_v10 = vld [vmem:[%s6251_s2 + $0x520] ss:$16 sps:$4 sm:$0xff]   ;;  %v4398_v11 = vld [vmem:[%s6251_s2 + $0x724] ss:$16 sps:$4 sm:$0xff]  }
  0xe3   : > { %v4401_v12 = vld [vmem:[%s6251_s2 + $0x504] ss:$16 sps:$4 sm:$0xff]   ;;  %v4396_v13 = vld [vmem:[%s6251_s2 + $0x720] ss:$16 sps:$4 sm:$0xff]  }
  0xe4   : > { %2848 = vmatpush2.bf16.msra.mxu1 %v4366_v54  ;;  %v4399_v15 = vld [vmem:[%s6251_s2 + $0x500] ss:$16 sps:$4 sm:$0xff]   ;;  %v4404_v16 = vld [vmem:[%s6251_s2 + $0x704] ss:$16 sps:$4 sm:$0xff]  }
  0xe5   : > { %2849 = vmatprep.subr.bf16.mxu1 %v4374_v56  ;;  %2797 = vmatpush2.bf16.msra.mxu0 %v4369_v55  ;;  %v4407_v17 = vld [vmem:[%s6251_s2 + $0x8e4] ss:$16 sps:$4 sm:$0xff]   ;;  %v4402_v18 = vld [vmem:[%s6251_s2 + $0x700] ss:$16 sps:$4 sm:$0xff]   ;;  %v4451_v55 = vld [vmem:[%s6251_s2 + $0x48] ss:$16 sps:$4 sm:$0xff]  }
  0xe6   : > { %2798 = vmatprep.subr.bf16.mxu0 %v4377_v57  ;;  %v4405_v19 = vld [vmem:[%s6251_s2 + $0x8e0] ss:$16 sps:$4 sm:$0xff]   ;;  %v4425_v27 = vld [vmem:[%s6251_s2 + $0x8c4] ss:$16 sps:$4 sm:$0xff]   ;;  %v4459_v56 = vld [vmem:[%s6251_s2 + $0x2c] ss:$16 sps:$4 sm:$0xff]  }
  0xe7   : > { %v5483_v24 = vld [vmem:[#allocation4 + $0x10] ss:$36 sps:$4 sm:$0xff]   ;;  %v5488_v26 = vld [vmem:[#allocation4 + $0x5c] ss:$36 sps:$4 sm:$0xff]   ;;  %v5506_v33 = vld [vmem:[#allocation4 + $0x64] ss:$36 sps:$4 sm:$0xff]  }
  0xe8   : > { %2850 = vmatpush2.bf16.msra.mxu1 %v4372_v60  ;;  %v4423_v28 = vld [vmem:[%s6251_s2 + $0x8c0] ss:$16 sps:$4 sm:$0xff]   ;;  %v4432_v32 = vld [vmem:[%s6251_s2 + $0x8a4] ss:$16 sps:$4 sm:$0xff]  }
  0xe9   : > { %2851 = vmatprep.subr.bf16.mxu1 %v4380_v62  ;;  %2799 = vmatpush2.bf16.msra.mxu0 %v4375_v61  ;;  %v847_v35 = vld [vmem:[#allocation4 + $0x7c] sm:$0xff]  ;;  %v4438_v40 = vld [vmem:[%s6251_s2 + $0x884] ss:$16 sps:$4 sm:$0xff]   ;;  %v4457_v61 = vld [vmem:[%s6251_s2 + $0x28] ss:$16 sps:$4 sm:$0xff]  }
  0xea   : > { %2800 = vmatprep.subr.bf16.mxu0 %v4383_v63  ;;  %v5516_v38 = vcombine.low %v842_v34, %v847_v35  ;;  %v4430_v39 = vld [vmem:[%s6251_s2 + $0x8a0] ss:$16 sps:$4 sm:$0xff]   ;;  %v4444_v46 = vld [vmem:[%s6251_s2 + $0x864] ss:$16 sps:$4 sm:$0xff]   ;;  %v4465_v62 = vld [vmem:[%s6251_s2 + $0xc] ss:$16 sps:$4 sm:$0xff]  }
  0xeb   : > { %v5531_v44 = vld [vmem:[#allocation4 + $0x60] ss:$36 sps:$4 sm:$0xff]   ;;  %v4505_v34 = vld [vmem:[%s6251_s2 + $0x248] ss:$16 sps:$4 sm:$0xff]   ;;  %v4513_v35 = vld [vmem:[%s6251_s2 + $0x22c] ss:$16 sps:$4 sm:$0xff]  }
  0xec   : > { %2852 = vmatpush2.bf16.msra.mxu1 %v4378_v0  ;;  %v4436_v45 = vld [vmem:[%s6251_s2 + $0x880] ss:$16 sps:$4 sm:$0xff]   ;;  %v4450_v51 = vld [vmem:[%s6251_s2 + $0x844] ss:$16 sps:$4 sm:$0xff]   ;;  %v4474_v0 = vld [vmem:[%s6251_s2 + $0x2ec] ss:$16 sps:$4 sm:$0xff]  }
  0xed   : > { %2853 = vmatprep.subr.bf16.mxu1 %v4386_v2  ;;  %2801 = vmatpush2.bf16.msra.mxu0 %v4381_v1  ;;  %v4442_v50 = vld [vmem:[%s6251_s2 + $0x860] ss:$16 sps:$4 sm:$0xff]   ;;  %v4456_v54 = vld [vmem:[%s6251_s2 + $0x824] ss:$16 sps:$4 sm:$0xff]   ;;  %v4463_v1 = vld [vmem:[%s6251_s2 + $0x8] ss:$16 sps:$4 sm:$0xff]  }
  0xee   : > { %2802 = vmatprep.subr.bf16.mxu0 %v4389_v3  ;;  %v4448_v53 = vld [vmem:[%s6251_s2 + $0x840] ss:$16 sps:$4 sm:$0xff]   ;;  %v4462_v60 = vld [vmem:[%s6251_s2 + $0x804] ss:$16 sps:$4 sm:$0xff]   ;;  %v4471_v2 = vld [vmem:[%s6251_s2 + $0x1ec] ss:$16 sps:$4 sm:$0xff]  }
  0xef   : > { %v4454_v57 = vld [vmem:[%s6251_s2 + $0x820] ss:$16 sps:$4 sm:$0xff]   ;;  %v4472_v3 = vld [vmem:[%s6251_s2 + $0x2e8] ss:$16 sps:$4 sm:$0xff]  }
  0xf0   : > { %2854 = vmatpush2.bf16.msra.mxu1 %v4384_v4  ;;  %v4460_v63 = vld [vmem:[%s6251_s2 + $0x800] ss:$16 sps:$4 sm:$0xff]  }
  0xf1   : > { %2855 = vmatprep.subr.bf16.mxu1 %v4392_v6  ;;  %2803 = vmatpush2.bf16.msra.mxu0 %v4387_v5  ;;  %v5599_v4 = vld [vmem:[#allocation4 + $0x20] ss:$36 sps:$4 sm:$0xff]   ;;  %v4480_v5 = vld [vmem:[%s6251_s2 + $0x2cc] ss:$16 sps:$4 sm:$0xff]   ;;  %v4469_v6 = vld [vmem:[%s6251_s2 + $0x1e8] ss:$16 sps:$4 sm:$0xff]  }
  0xf2   : > { %2804 = vmatprep.subr.bf16.mxu0 %v4395_v7  ;;  %v4477_v7 = vld [vmem:[%s6251_s2 + $0x1cc] ss:$16 sps:$4 sm:$0xff]  }
  0xf4   : > { %2856 = vmatpush2.bf16.msra.mxu1 %v4390_v8  ;;  %v4478_v8 = vld [vmem:[%s6251_s2 + $0x2c8] ss:$16 sps:$4 sm:$0xff]  }
  0xf5   : > { %2857 = vmatprep.subr.bf16.mxu1 %v4398_v11  ;;  %2805 = vmatpush2.bf16.msra.mxu0 %v4393_v10  ;;  %v4489_v10 = vld [vmem:[%s6251_s2 + $0x2ac] ss:$16 sps:$4 sm:$0xff]   ;;  %v4475_v11 = vld [vmem:[%s6251_s2 + $0x1c8] ss:$16 sps:$4 sm:$0xff]  }
  0xf6   : > { %2806 = vmatprep.subr.bf16.mxu0 %v4401_v12  ;;  %v4486_v12 = vld [vmem:[%s6251_s2 + $0x1ac] ss:$16 sps:$4 sm:$0xff]  }
  0xf8   : > { %2858 = vmatpush2.bf16.msra.mxu1 %v4396_v13  ;;  %v4487_v13 = vld [vmem:[%s6251_s2 + $0x2a8] ss:$16 sps:$4 sm:$0xff]  }
  0xf9   : > { %2859 = vmatprep.subr.bf16.mxu1 %v4404_v16  ;;  %2807 = vmatpush2.bf16.msra.mxu0 %v4399_v15  ;;  %v5627_v15 = vld [vmem:[#allocation4 + $0x68] ss:$36 sps:$4 sm:$0xff]  }
  0xfa   : > { %2882 = vmatprep.subr.bf16.mxu0 %v4407_v17  ;;  %v4495_v16 = vld [vmem:[%s6251_s2 + $0x28c] ss:$16 sps:$4 sm:$0xff]   ;;  %v4484_v17 = vld [vmem:[%s6251_s2 + $0x1a8] ss:$16 sps:$4 sm:$0xff]  }
  0xfc   : > { %2860 = vmatpush2.bf16.msra.mxu1 %v4402_v18  ;;  %2809 = vmatmul.mubr.bf16.vlgmr.msra.gmra.mxu0 %v5483_v24  ;;  %v4492_v18 = vld [vmem:[%s6251_s2 + $0x18c] ss:$16 sps:$4 sm:$0xff]  }
  0xfd   : > { %2935 = vmatprep.subr.bf16.mxu1 %v4410_v20  ;;  %2818 = vmatprep.mubr.bf16.mxu0 %v5488_v26  ;;  %v4501_v20 = vld [vmem:[%s6251_s2 + $0x26c] ss:$16 sps:$4 sm:$0xff]  }
  0xfe   : > { %2883 = vmatpush1.bf16.msra.mxu0 %v4405_v19  ;;  %v4493_v19 = vld [vmem:[%s6251_s2 + $0x288] ss:$16 sps:$4 sm:$0xff]  }
  0xff   : > { %2862 = vmatmul.mubr.bf16.vlgmr.msra.gmra.mxu1 %v5500_v30  ;;  %2884 = vmatprep.subr.bf16.mxu0 %v4425_v27  ;;  %v4498_v27 = vld [vmem:[%s6251_s2 + $0x16c] ss:$16 sps:$4 sm:$0xff]  }
 0x100   : > { %2871 = vmatprep.mubr.bf16.mxu1 %v5506_v33  ;;  %2936 = vmatpush1.bf16.msra.mxu1 %v4408_v25  ;;  %v4490_v25 = vld [vmem:[%s6251_s2 + $0x188] ss:$16 sps:$4 sm:$0xff]  }
 0x101   : > { %2937 = vmatprep.subr.bf16.mxu1 %v4428_v29  ;;  %v4496_v29 = vld [vmem:[%s6251_s2 + $0x168] ss:$16 sps:$4 sm:$0xff]  }
 0x102   : > { %2885 = vmatpush1.bf16.msra.mxu0 %v4423_v28  ;;  %v4507_v28 = vld [vmem:[%s6251_s2 + $0x24c] ss:$16 sps:$4 sm:$0xff]  }
 0x103   : > { %2886 = vmatprep.subr.bf16.mxu0 %v4432_v32  ;;  %v4504_v32 = vld [vmem:[%s6251_s2 + $0x14c] ss:$16 sps:$4 sm:$0xff]  }
 0x104   : > { %2938 = vmatpush1.bf16.msra.mxu1 %v4426_v36  ;;  %2819 = vmatmul.mubr.bf16.gmra.mxu0 %v5516_v38  ;;  %v4502_v36 = vld [vmem:[%s6251_s2 + $0x148] ss:$16 sps:$4 sm:$0xff]  }
 0x105   : > { %2939 = vmatprep.subr.bf16.mxu1 %v4435_v37  ;;  %2914 = vmatprep.mubr.bf16.mxu0 %v4908_v14  ;;  %v4510_v37 = vld [vmem:[%s6251_s2 + $0x12c] ss:$16 sps:$4 sm:$0xff]  }
 0x106   : > { %2887 = vmatpush1.bf16.msra.mxu0 %v4430_v39  ;;  %v4511_v39 = vld [vmem:[%s6251_s2 + $0x228] ss:$16 sps:$4 sm:$0xff]  }
 0x107   : > { %2872 = vmatmul.mubr.bf16.gmra.mxu1 %v5531_v44  ;;  %2888 = vmatprep.subr.bf16.mxu0 %v4438_v40  ;;  %v4519_v40 = vld [vmem:[%s6251_s2 + $0x20c] ss:$16 sps:$4 sm:$0xff]  }
 0x108   : > { %2940 = vmatpush1.bf16.msra.mxu1 %v4433_v41  ;;  %2967 = vmatprep.mubr.bf16.mxu1 %v5269_v22  ;;  %v4445_v22 = vld [vmem:[%s6251_s2 + $0x68] ss:$16 sps:$4 sm:$0xff]  }
 0x109   : > { %2941 = vmatprep.subr.bf16.mxu1 %v4441_v43  ;;  %v4508_v41 = vld [vmem:[%s6251_s2 + $0x128] ss:$16 sps:$4 sm:$0xff]   ;;  %v4516_v43 = vld [vmem:[%s6251_s2 + $0x10c] ss:$16 sps:$4 sm:$0xff]  }
 0x10a   : > { %2889 = vmatpush1.bf16.msra.mxu0 %v4436_v45  ;;  %v4517_v45 = vld [vmem:[%s6251_s2 + $0x208] ss:$16 sps:$4 sm:$0xff]  }
 0x10b   : > { %2890 = vmatprep.subr.bf16.mxu0 %v4444_v46  ;;  %v4522_v46 = vld [vmem:[%s6251_s2 + $0x3ec] ss:$16 sps:$4 sm:$0xff]  }
 0x10c   : > { %2942 = vmatpush1.bf16.msra.mxu1 %v4439_v47  ;;  %v4514_v47 = vld [vmem:[%s6251_s2 + $0x108] ss:$16 sps:$4 sm:$0xff]  }
 0x10d   : > { %2943 = vmatprep.subr.bf16.mxu1 %v4447_v49  ;;  %v4525_v49 = vld [vmem:[%s6251_s2 + $0x4ec] ss:$16 sps:$4 sm:$0xff]  }
 0x10e   : > { %2891 = vmatpush1.bf16.msra.mxu0 %v4442_v50  ;;  %v4520_v50 = vld [vmem:[%s6251_s2 + $0x3e8] ss:$16 sps:$4 sm:$0xff]  }
 0x10f   : > { %2892 = vmatprep.subr.bf16.mxu0 %v4450_v51  ;;  %v4528_v51 = vld [vmem:[%s6251_s2 + $0x3cc] ss:$16 sps:$4 sm:$0xff]  }
 0x110   : > { %2944 = vmatpush1.bf16.msra.mxu1 %v4445_v22  ;;  %v4523_v22 = vld [vmem:[%s6251_s2 + $0x4e8] ss:$16 sps:$4 sm:$0xff]  }
 0x111   : > { %2945 = vmatprep.subr.bf16.mxu1 %v4453_v52  ;;  %v4531_v52 = vld [vmem:[%s6251_s2 + $0x4cc] ss:$16 sps:$4 sm:$0xff]  }
 0x112   : > { %2893 = vmatpush1.bf16.msra.mxu0 %v4448_v53  ;;  %v4526_v53 = vld [vmem:[%s6251_s2 + $0x3c8] ss:$16 sps:$4 sm:$0xff]  }
 0x113   : > { %2894 = vmatprep.subr.bf16.mxu0 %v4456_v54  ;;  %v4534_v54 = vld [vmem:[%s6251_s2 + $0x3ac] ss:$16 sps:$4 sm:$0xff]  }
 0x114   : > { %2946 = vmatpush1.bf16.msra.mxu1 %v4451_v55  ;;  %v4529_v55 = vld [vmem:[%s6251_s2 + $0x4c8] ss:$16 sps:$4 sm:$0xff]  }
 0x115   : > { %2947 = vmatprep.subr.bf16.mxu1 %v4459_v56  ;;  %v4537_v56 = vld [vmem:[%s6251_s2 + $0x4ac] ss:$16 sps:$4 sm:$0xff]  }
 0x116   : > { %2895 = vmatpush1.bf16.msra.mxu0 %v4454_v57  ;;  %v4535_v57 = vld [vmem:[%s6251_s2 + $0x4a8] ss:$16 sps:$4 sm:$0xff]  }
 0x117   : > { %2896 = vmatprep.subr.bf16.mxu0 %v4462_v60  ;;  %v4543_v60 = vld [vmem:[%s6251_s2 + $0x48c] ss:$16 sps:$4 sm:$0xff]  }
 0x118   : > { %2948 = vmatpush1.bf16.msra.mxu1 %v4457_v61  ;;  %v4538_v61 = vld [vmem:[%s6251_s2 + $0x388] ss:$16 sps:$4 sm:$0xff]  }
 0x119   : > { %2949 = vmatprep.subr.bf16.mxu1 %v4465_v62  ;;  %v4546_v62 = vld [vmem:[%s6251_s2 + $0x36c] ss:$16 sps:$4 sm:$0xff]  }
 0x11a   : > { %2897 = vmatpush1.bf16.msra.mxu0 %v4460_v63  ;;  %v4541_v63 = vld [vmem:[%s6251_s2 + $0x488] ss:$16 sps:$4 sm:$0xff]  }
 0x11b   : > { %2988 = vmatprep.subr.bf16.mxu0 %v4474_v0  ;;  %v4549_v0 = vld [vmem:[%s6251_s2 + $0x46c] ss:$16 sps:$4 sm:$0xff]  }
 0x11c   : > { %2950 = vmatpush1.bf16.msra.mxu1 %v4463_v1  ;;  %v4552_v1 = vld [vmem:[%s6251_s2 + $0x34c] ss:$16 sps:$4 sm:$0xff]  }
 0x11d   : > { %2915 = vmatmul.mubr.bf16.vlgmr.msra.gmra.mxu0 %v5599_v4  ;;  %2951 = vmatprep.subr.bf16.mxu1 %v4471_v2  ;;  %v4555_v2 = vld [vmem:[%s6251_s2 + $0x44c] ss:$16 sps:$4 sm:$0xff]  }
 0x11e   : > { %2989 = vmatpush1.bf16.msra.mxu0 %v4472_v3  ;;  %2924 = vmatprep.mubr.bf16.mxu0 %v4908_v14  ;;  %v4550_v3 = vld [vmem:[%s6251_s2 + $0x348] ss:$16 sps:$4 sm:$0xff]  }
 0x11f   : > { %2990 = vmatprep.subr.bf16.mxu0 %v4480_v5  ;;  %v4558_v5 = vld [vmem:[%s6251_s2 + $0x32c] ss:$16 sps:$4 sm:$0xff]  }
 0x120   : > { %2952 = vmatpush2.bf16.msra.mxu1 %v4469_v6  ;;  %v4553_v6 = vld [vmem:[%s6251_s2 + $0x448] ss:$16 sps:$4 sm:$0xff]  }
 0x121   : > { %2953 = vmatprep.subr.bf16.mxu1 %v4477_v7  ;;  %v4561_v7 = vld [vmem:[%s6251_s2 + $0x42c] ss:$16 sps:$4 sm:$0xff]  }
 0x122   : > { %2991 = vmatpush1.bf16.msra.mxu0 %v4478_v8  ;;  %v4556_v8 = vld [vmem:[%s6251_s2 + $0x328] ss:$16 sps:$4 sm:$0xff]  }
 0x123   : > { %2992 = vmatprep.subr.bf16.mxu0 %v4489_v10  ;;  %v4564_v10 = vld [vmem:[%s6251_s2 + $0x30c] ss:$16 sps:$4 sm:$0xff]  }
 0x124   : > { %2954 = vmatpush2.bf16.msra.mxu1 %v4475_v11  ;;  %v4559_v11 = vld [vmem:[%s6251_s2 + $0x428] ss:$16 sps:$4 sm:$0xff]  }
 0x125   : > { %2925 = vmatmul.mubr.bf16.gmra.mxu0 %v5627_v15  ;;  %2955 = vmatprep.subr.bf16.mxu1 %v4486_v12  ;;  %v4567_v12 = vld [vmem:[%s6251_s2 + $0x40c] ss:$16 sps:$4 sm:$0xff]  }
 0x126   : > { %2993 = vmatpush1.bf16.msra.mxu0 %v4487_v13  ;;  %3020 = vmatprep.mubr.bf16.mxu0 %v5282_v31  ;;  %v4499_v31 = vld [vmem:[%s6251_s2 + $0x268] ss:$16 sps:$4 sm:$0xff]  }
 0x127   : > { %2994 = vmatprep.subr.bf16.mxu0 %v4495_v16  ;;  %v4562_v13 = vld [vmem:[%s6251_s2 + $0x308] ss:$16 sps:$4 sm:$0xff]   ;;  %v4573_v16 = vld [vmem:[%s6251_s2 + $0x6ec] ss:$16 sps:$4 sm:$0xff]  }
 0x128   : > { %2956 = vmatpush2.bf16.msra.mxu1 %v4484_v17  ;;  %v4565_v17 = vld [vmem:[%s6251_s2 + $0x408] ss:$16 sps:$4 sm:$0xff]  }
 0x129   : > { %2957 = vmatprep.subr.bf16.mxu1 %v4492_v18  ;;  %v4570_v18 = vld [vmem:[%s6251_s2 + $0x5ec] ss:$16 sps:$4 sm:$0xff]  }
 0x12a   : > { %2995 = vmatpush1.bf16.msra.mxu0 %v4493_v19  ;;  %v4571_v19 = vld [vmem:[%s6251_s2 + $0x6e8] ss:$16 sps:$4 sm:$0xff]  }
 0x12b   : > { %2996 = vmatprep.subr.bf16.mxu0 %v4501_v20  ;;  %v4579_v20 = vld [vmem:[%s6251_s2 + $0x6cc] ss:$16 sps:$4 sm:$0xff]  }
 0x12c   : > { %2958 = vmatpush2.bf16.msra.mxu1 %v4490_v25  ;;  %v4568_v25 = vld [vmem:[%s6251_s2 + $0x5e8] ss:$16 sps:$4 sm:$0xff]  }
 0x12d   : > { %2959 = vmatprep.subr.bf16.mxu1 %v4498_v27  ;;  %v4792_v27 = vld [vmem:[#allocation4 + $0x8] ss:$36 sps:$4 sm:$0xff]  }
 0x12e   : > { %2997 = vmatpush1.bf16.msra.mxu0 %v4499_v31  ;;  %v4576_v31 = vld [vmem:[%s6251_s2 + $0x5cc] ss:$16 sps:$4 sm:$0xff]  }
 0x12f   : > { %2998 = vmatprep.subr.bf16.mxu0 %v4507_v28  ;;  %v4577_v28 = vld [vmem:[%s6251_s2 + $0x6c8] ss:$16 sps:$4 sm:$0xff]  }
 0x130   : > { %2960 = vmatpush2.bf16.msra.mxu1 %v4496_v29  ;;  %v4585_v29 = vld [vmem:[%s6251_s2 + $0x6ac] ss:$16 sps:$4 sm:$0xff]  }
 0x131   : > { %2961 = vmatprep.subr.bf16.mxu1 %v4504_v32  ;;  %v4574_v32 = vld [vmem:[%s6251_s2 + $0x5c8] ss:$16 sps:$4 sm:$0xff]  }
 0x132   : > { %2999 = vmatpush1.bf16.msra.mxu0 %v4505_v34  ;;  %v4583_v34 = vld [vmem:[%s6251_s2 + $0x6a8] ss:$16 sps:$4 sm:$0xff]  }
 0x133   : > { %3000 = vmatprep.subr.bf16.mxu0 %v4513_v35  ;;  %v4591_v35 = vld [vmem:[%s6251_s2 + $0x68c] ss:$16 sps:$4 sm:$0xff]  }
 0x134   : > { %2962 = vmatpush2.bf16.msra.mxu1 %v4502_v36  ;;  %v4580_v36 = vld [vmem:[%s6251_s2 + $0x5a8] ss:$16 sps:$4 sm:$0xff]  }
 0x135   : > { %2963 = vmatprep.subr.bf16.mxu1 %v4510_v37  ;;  %v4588_v37 = vld [vmem:[%s6251_s2 + $0x58c] ss:$16 sps:$4 sm:$0xff]  }
 0x136   : > { %3001 = vmatpush1.bf16.msra.mxu0 %v4511_v39  ;;  %v4589_v39 = vld [vmem:[%s6251_s2 + $0x688] ss:$16 sps:$4 sm:$0xff]  }
 0x137   : > { %3002 = vmatprep.subr.bf16.mxu0 %v4519_v40  ;;  %v4597_v40 = vld [vmem:[%s6251_s2 + $0x66c] ss:$16 sps:$4 sm:$0xff]  }
 0x138   : > { %2964 = vmatpush2.bf16.msra.mxu1 %v4508_v41  ;;  %v4594_v41 = vld [vmem:[%s6251_s2 + $0x56c] ss:$16 sps:$4 sm:$0xff]  }
 0x139   : > { %2965 = vmatprep.subr.bf16.mxu1 %v4516_v43  ;;  %v4603_v43 = vld [vmem:[%s6251_s2 + $0x64c] ss:$16 sps:$4 sm:$0xff]  }
 0x13a   : > { %3003 = vmatpush1.bf16.msra.mxu0 %v4517_v45  ;;  %v4592_v45 = vld [vmem:[%s6251_s2 + $0x568] ss:$16 sps:$4 sm:$0xff]  }
 0x13b   : > { %3004 = vmatprep.subr.bf16.mxu0 %v4522_v46  ;;  %v4600_v46 = vld [vmem:[%s6251_s2 + $0x54c] ss:$16 sps:$4 sm:$0xff]  }
 0x13c   : > { %2966 = vmatpush2.bf16.msra.mxu1 %v4514_v47  ;;  %v4601_v47 = vld [vmem:[%s6251_s2 + $0x648] ss:$16 sps:$4 sm:$0xff]  }
 0x13d   : > { %3041 = vmatprep.subr.bf16.mxu1 %v4525_v49  ;;  %v4609_v49 = vld [vmem:[%s6251_s2 + $0x62c] ss:$16 sps:$4 sm:$0xff]  }
 0x13e   : > { %3005 = vmatpush2.bf16.msra.mxu0 %v4520_v50  ;;  %v4598_v50 = vld [vmem:[%s6251_s2 + $0x548] ss:$16 sps:$4 sm:$0xff]  }
 0x13f   : > { %2968 = vmatmul.mubr.bf16.vlgmr.msra.gmra.mxu1 %v5267_v21  ;;  %3006 = vmatprep.subr.bf16.mxu0 %v4528_v51  ;;  %v4532_v21 = vld [vmem:[%s6251_s2 + $0x3a8] ss:$16 sps:$4 sm:$0xff]   ;;  %v4606_v51 = vld [vmem:[%s6251_s2 + $0x52c] ss:$16 sps:$4 sm:$0xff]  }
 0x140   : > { %2977 = vmatprep.mubr.bf16.mxu1 %v5294_v42  ;;  %3042 = vmatpush1.bf16.msra.mxu1 %v4523_v22  ;;  %v4540_v42 = vld [vmem:[%s6251_s2 + $0x38c] ss:$16 sps:$4 sm:$0xff]   ;;  %v4607_v22 = vld [vmem:[%s6251_s2 + $0x628] ss:$16 sps:$4 sm:$0xff]  }
 0x141   : > { %3043 = vmatprep.subr.bf16.mxu1 %v4531_v52  ;;  %v4615_v52 = vld [vmem:[%s6251_s2 + $0x60c] ss:$16 sps:$4 sm:$0xff]  }
 0x142   : > { %3007 = vmatpush2.bf16.msra.mxu0 %v4526_v53  ;;  %v4604_v53 = vld [vmem:[%s6251_s2 + $0x528] ss:$16 sps:$4 sm:$0xff]  }
 0x143   : > { %3008 = vmatprep.subr.bf16.mxu0 %v4534_v54  ;;  %v4612_v54 = vld [vmem:[%s6251_s2 + $0x50c] ss:$16 sps:$4 sm:$0xff]  }
 0x144   : > { %3044 = vmatpush1.bf16.msra.mxu1 %v4529_v55  ;;  %v4613_v55 = vld [vmem:[%s6251_s2 + $0x608] ss:$16 sps:$4 sm:$0xff]  }
 0x145   : > { %3045 = vmatprep.subr.bf16.mxu1 %v4537_v56  ;;  %v4618_v56 = vld [vmem:[%s6251_s2 + $0x7ec] ss:$16 sps:$4 sm:$0xff]  }
 0x146   : > { %3009 = vmatpush2.bf16.msra.mxu0 %v4532_v21  ;;  %v4610_v21 = vld [vmem:[%s6251_s2 + $0x508] ss:$16 sps:$4 sm:$0xff]  }
 0x147   : > { %2978 = vmatmul.mubr.bf16.gmra.mxu1 %v5303_v48  ;;  %3010 = vmatprep.subr.bf16.mxu0 %v4540_v42  ;;  %v4544_v48 = vld [vmem:[%s6251_s2 + $0x368] ss:$16 sps:$4 sm:$0xff]   ;;  %v4621_v42 = vld [vmem:[%s6251_s2 + $0x8ec] ss:$16 sps:$4 sm:$0xff]  }
 0x148   : > { %3046 = vmatpush1.bf16.msra.mxu1 %v4535_v57  ;;  %3073 = vmatprep.mubr.bf16.mxu1 %v5336_v9  ;;  %v4547_v9 = vld [vmem:[%s6251_s2 + $0x468] ss:$16 sps:$4 sm:$0xff]  }
 0x149   : > { %3047 = vmatprep.subr.bf16.mxu1 %v4543_v60  ;;  %v4616_v57 = vld [vmem:[%s6251_s2 + $0x7e8] ss:$16 sps:$4 sm:$0xff]   ;;  %v4624_v60 = vld [vmem:[%s6251_s2 + $0x7cc] ss:$16 sps:$4 sm:$0xff]  }
 0x14a   : > { %3011 = vmatpush2.bf16.msra.mxu0 %v4538_v61  ;;  %v4619_v61 = vld [vmem:[%s6251_s2 + $0x8e8] ss:$16 sps:$4 sm:$0xff]  }
 0x14b   : > { %3012 = vmatprep.subr.bf16.mxu0 %v4546_v62  ;;  %v4627_v62 = vld [vmem:[%s6251_s2 + $0x8cc] ss:$16 sps:$4 sm:$0xff]  }
 0x14c   : > { %3048 = vmatpush1.bf16.msra.mxu1 %v4541_v63  ;;  %v4622_v63 = vld [vmem:[%s6251_s2 + $0x7c8] ss:$16 sps:$4 sm:$0xff]  }
 0x14d   : > { %3049 = vmatprep.subr.bf16.mxu1 %v4549_v0  ;;  %v4630_v0 = vld [vmem:[%s6251_s2 + $0x7ac] ss:$16 sps:$4 sm:$0xff]  }
 0x14e   : > { %3013 = vmatpush2.bf16.msra.mxu0 %v4544_v48  ;;  %v4625_v48 = vld [vmem:[%s6251_s2 + $0x8c8] ss:$16 sps:$4 sm:$0xff]  }
 0x14f   : > { %3014 = vmatprep.subr.bf16.mxu0 %v4552_v1  ;;  %v4633_v1 = vld [vmem:[%s6251_s2 + $0x8ac] ss:$16 sps:$4 sm:$0xff]  }
 0x150   : > { %3050 = vmatpush1.bf16.msra.mxu1 %v4547_v9  ;;  %v4631_v9 = vld [vmem:[%s6251_s2 + $0x8a8] ss:$16 sps:$4 sm:$0xff]  }
 0x151   : > { %3051 = vmatprep.subr.bf16.mxu1 %v4555_v2  ;;  %v4639_v2 = vld [vmem:[%s6251_s2 + $0x88c] ss:$16 sps:$4 sm:$0xff]  }
 0x152   : > { %3015 = vmatpush2.bf16.msra.mxu0 %v4550_v3  ;;  %v4634_v3 = vld [vmem:[%s6251_s2 + $0x788] ss:$16 sps:$4 sm:$0xff]  }
 0x153   : > { %3016 = vmatprep.subr.bf16.mxu0 %v4558_v5  ;;  %v4642_v5 = vld [vmem:[%s6251_s2 + $0x76c] ss:$16 sps:$4 sm:$0xff]  }
 0x154   : > { %3052 = vmatpush1.bf16.msra.mxu1 %v4553_v6  ;;  %v4637_v6 = vld [vmem:[%s6251_s2 + $0x888] ss:$16 sps:$4 sm:$0xff]  }
 0x155   : > { %3053 = vmatprep.subr.bf16.mxu1 %v4561_v7  ;;  %v4645_v7 = vld [vmem:[%s6251_s2 + $0x86c] ss:$16 sps:$4 sm:$0xff]  }
 0x156   : > { %3017 = vmatpush2.bf16.msra.mxu0 %v4556_v8  ;;  %v4648_v8 = vld [vmem:[%s6251_s2 + $0x74c] ss:$16 sps:$4 sm:$0xff]  }
 0x157   : > { %3018 = vmatprep.subr.bf16.mxu0 %v4564_v10  ;;  %v4643_v10 = vld [vmem:[%s6251_s2 + $0x868] ss:$16 sps:$4 sm:$0xff]  }
 0x158   : > { %3054 = vmatpush1.bf16.msra.mxu1 %v4559_v11  ;;  %v4651_v11 = vld [vmem:[%s6251_s2 + $0x84c] ss:$16 sps:$4 sm:$0xff]  }
 0x159   : > { %3055 = vmatprep.subr.bf16.mxu1 %v4567_v12  ;;  %v4646_v12 = vld [vmem:[%s6251_s2 + $0x748] ss:$16 sps:$4 sm:$0xff]  }
 0x15a   : > { %3019 = vmatpush2.bf16.msra.mxu0 %v4562_v13  ;;  %v4654_v13 = vld [vmem:[%s6251_s2 + $0x72c] ss:$16 sps:$4 sm:$0xff]  }
 0x15b   : > { %3094 = vmatprep.subr.bf16.mxu0 %v4573_v16  ;;  %v4649_v16 = vld [vmem:[%s6251_s2 + $0x848] ss:$16 sps:$4 sm:$0xff]  }
 0x15c   : > { %3056 = vmatpush1.bf16.msra.mxu1 %v4565_v17  ;;  %v4657_v17 = vld [vmem:[%s6251_s2 + $0x82c] ss:$16 sps:$4 sm:$0xff]  }
 0x15d   : > { %3021 = vmatmul.mubr.bf16.vlgmr.msra.gmra.mxu0 %v4792_v27  ;;  %3057 = vmatprep.subr.bf16.mxu1 %v4570_v18  ;;  %v4652_v18 = vld [vmem:[%s6251_s2 + $0x728] ss:$16 sps:$4 sm:$0xff]  }
 0x15e   : > { %3030 = vmatprep.mubr.bf16.mxu0 %v5318_v58  ;;  %3095 = vmatpush1.bf16.msra.mxu0 %v4571_v19  ;;  %v4582_v58 = vld [vmem:[%s6251_s2 + $0x5ac] ss:$16 sps:$4 sm:$0xff]   ;;  %v4658_v27 = vld [vmem:[%s6251_s2 + $0x708] ss:$16 sps:$4 sm:$0xff]  }
 0x15f   : > { %3096 = vmatprep.subr.bf16.mxu0 %v4579_v20  ;;  %v4660_v19 = vld [vmem:[%s6251_s2 + $0x70c] ss:$16 sps:$4 sm:$0xff]   ;;  %v4655_v20 = vld [vmem:[%s6251_s2 + $0x828] ss:$16 sps:$4 sm:$0xff]  }
 0x160   : > { %3058 = vmatpush2.bf16.msra.mxu1 %v4568_v25  ;;  %v4663_v25 = vld [vmem:[%s6251_s2 + $0x80c] ss:$16 sps:$4 sm:$0xff]  }
 0x161   : > { %3059 = vmatprep.subr.bf16.mxu1 %v4576_v31  ;;  %v4661_v31 = vld [vmem:[%s6251_s2 + $0x808] ss:$16 sps:$4 sm:$0xff]  }
 0x162   : > { %3097 = vmatpush1.bf16.msra.mxu0 %v4577_v28 }
 0x163   : > { %3098 = vmatprep.subr.bf16.mxu0 %v4585_v29 }
 0x164   : > { %3060 = vmatpush2.bf16.msra.mxu1 %v4574_v32 }
 0x165   : > { %3031 = vmatmul.mubr.bf16.gmra.mxu0 %v5320_v59  ;;  %3061 = vmatprep.subr.bf16.mxu1 %v4582_v58  ;;  %v4586_v59 = vld [vmem:[%s6251_s2 + $0x588] ss:$16 sps:$4 sm:$0xff]  }
 0x166   : > { %3099 = vmatpush1.bf16.msra.mxu0 %v4583_v34  ;;  %3126 = vmatprep.mubr.bf16.mxu0 %v5348_v23  ;;  %v4595_v23 = vld [vmem:[%s6251_s2 + $0x668] ss:$16 sps:$4 sm:$0xff]  }
 0x167   : > { %3100 = vmatprep.subr.bf16.mxu0 %v4591_v35 }
 0x168   : > { %3062 = vmatpush2.bf16.msra.mxu1 %v4580_v36 }
 0x169   : > { %3063 = vmatprep.subr.bf16.mxu1 %v4588_v37 }
 0x16a   : > { %3101 = vmatpush1.bf16.msra.mxu0 %v4589_v39 }
 0x16b   : > { %3102 = vmatprep.subr.bf16.mxu0 %v4597_v40 }
 0x16c   : > { %3064 = vmatpush2.bf16.msra.mxu1 %v4586_v59 }
 0x16d   : > { %3065 = vmatprep.subr.bf16.mxu1 %v4594_v41 }
 0x16e   : > { %3103 = vmatpush1.bf16.msra.mxu0 %v4595_v23 }
 0x16f   : > { %3104 = vmatprep.subr.bf16.mxu0 %v4603_v43 }
 0x170   : > { %3066 = vmatpush2.bf16.msra.mxu1 %v4592_v45 }
 0x171   : > { %3067 = vmatprep.subr.bf16.mxu1 %v4600_v46 }
 0x172   : > { %3105 = vmatpush1.bf16.msra.mxu0 %v4601_v47 }
 0x173   : > { %3106 = vmatprep.subr.bf16.mxu0 %v4609_v49 }
 0x174   : > { %3068 = vmatpush2.bf16.msra.mxu1 %v4598_v50 }
 0x175   : > { %3069 = vmatprep.subr.bf16.mxu1 %v4606_v51 }
 0x176   : > { %3107 = vmatpush1.bf16.msra.mxu0 %v4607_v22 }
 0x177   : > { %3108 = vmatprep.subr.bf16.mxu0 %v4615_v52 }
 0x178   : > { %3070 = vmatpush2.bf16.msra.mxu1 %v4604_v53 }
 0x179   : > { %3071 = vmatprep.subr.bf16.mxu1 %v4612_v54 }
 0x17a   : > { %3109 = vmatpush1.bf16.msra.mxu0 %v4613_v55 }
 0x17b   : > { %3110 = vmatprep.subr.bf16.mxu0 %v4618_v56 }
 0x17c   : > { %3072 = vmatpush2.bf16.msra.mxu1 %v4610_v21  ;;  %v2704_v28 = vpop.f32.mrf.mxu0 }
 0x17d   : > { %3147 = vmatprep.subr.bf16.mxu1 %v4621_v42 }
 0x17e   : > { %3111 = vmatpush2.bf16.msra.mxu0 %v4616_v57  ;;  %v2706_v29 = vpop.f32.mrf.mxu0 }
 0x17f   : > { %3074 = vmatmul.mubr.bf16.vlgmr.msra.gmra.mxu1 %v5483_v24  ;;  %3112 = vmatprep.subr.bf16.mxu0 %v4624_v60  ;;  %v4628_v24 = vld [vmem:[%s6251_s2 + $0x7a8] ss:$16 sps:$4 sm:$0xff]   ;;  %v2757_v58 = vpop.f32.mrf.mxu1 }
 0x180   : > { %3083 = vmatprep.mubr.bf16.mxu1 %v5488_v26  ;;  %3148 = vmatpush1.bf16.msra.mxu1 %v4619_v61  ;;  %v4636_v26 = vld [vmem:[%s6251_s2 + $0x78c] ss:$16 sps:$4 sm:$0xff]   ;;  %v2708_v32 = vpop.f32.mrf.mxu0 }
 0x181   : > { %3149 = vmatprep.subr.bf16.mxu1 %v4627_v62  ;;  %v2759_v35 = vpop.f32.mrf.mxu1  ;;  %v2758_v62 = vadd.f32 %v2757_v58, %v2704_v28 }
 0x182   : > { %3113 = vmatpush2.bf16.msra.mxu0 %v4622_v63  ;;  %v2710_v34 = vpop.f32.mrf.mxu0  ;;  %v2760_v60 = vadd.f32 %v2759_v35, %v2706_v29 }
 0x183   : > { %3114 = vmatprep.subr.bf16.mxu0 %v4630_v0  ;;  %v2761_v37 = vpop.f32.mrf.mxu1 }
 0x184   : > { %3150 = vmatpush1.bf16.msra.mxu1 %v4625_v48  ;;  %v2714_v36 = vpop.f32.mrf.mxu0 }
 0x185   : > { %3151 = vmatprep.subr.bf16.mxu1 %v4633_v1 }
 0x186   : > { %3115 = vmatpush2.bf16.msra.mxu0 %v4628_v24  ;;  %v2716_v39 = vpop.f32.mrf.mxu0 }
 0x187   : > { %3084 = vmatmul.mubr.bf16.gmra.mxu1 %v5516_v38  ;;  %3116 = vmatprep.subr.bf16.mxu0 %v4636_v26  ;;  %v4640_v38 = vld [vmem:[%s6251_s2 + $0x768] ss:$16 sps:$4 sm:$0xff]   ;;  %v2762_v26 = vadd.f32 %v2761_v37, %v2708_v32 }
 0x188   : > { %3152 = vmatpush1.bf16.msra.mxu1 %v4631_v9  ;;  %3179 = vmatprep.mubr.bf16.mxu1 %v4908_v14  ;;  %v5999_v40 = vpop.f32.mrf.mxu0 }
 0x189   : > { %3153 = vmatprep.subr.bf16.mxu1 %v4639_v2 }
 0x18a   : > { %3117 = vmatpush2.bf16.msra.mxu0 %v4634_v3  ;;  %v806_v3 = vld [vmem:[%s5014_s20] sm:$0xff] }
 0x18b   : > { %3118 = vmatprep.subr.bf16.mxu0 %v4642_v5  ;;  %v815_v5 = vunpack.c.h.bf16 %v806_v3 }
 0x18c   : > { %3154 = vmatpush1.bf16.msra.mxu1 %v4637_v6 }
 0x18d   : > { %3155 = vmatprep.subr.bf16.mxu1 %v4645_v7 }
 0x18e   : > { %3119 = vmatpush2.bf16.msra.mxu0 %v4640_v38 }
 0x18f   : > { %3120 = vmatprep.subr.bf16.mxu0 %v4648_v8 }
 0x190   : > { %3156 = vmatpush1.bf16.msra.mxu1 %v4643_v10 }
 0x191   : > { %3157 = vmatprep.subr.bf16.mxu1 %v4651_v11 }
 0x192   : > { %3121 = vmatpush2.bf16.msra.mxu0 %v4646_v12 }
 0x193   : > { %3122 = vmatprep.subr.bf16.mxu0 %v4654_v13 }
 0x194   : > { %3158 = vmatpush1.bf16.msra.mxu1 %v4649_v16 }
 0x195   : > { %3159 = vmatprep.subr.bf16.mxu1 %v4657_v17  ;;  %v814_v17 = vunpack.c.l.bf16 %v806_v3 }
 0x196   : > { %3123 = vmatpush2.bf16.msra.mxu0 %v4652_v18 }
 0x197   : > { %3124 = vmatprep.subr.bf16.mxu0 %v4660_v19  ;;  %v808_v19 = vld [vmem:[%s5014_s20 + $0x10] sm:$0xff] }
 0x198   : > { %3160 = vmatpush1.bf16.msra.mxu1 %v4655_v20  ;;  %v819_v28 = vunpack.c.h.bf16 %v808_v19  ;;  %v818_v58 = vunpack.c.l.bf16 %v808_v19 }
 0x199   : > { %3161 = vmatprep.subr.bf16.mxu1 %v4663_v25 }
 0x19a   : > { %3125 = vmatpush2.bf16.msra.mxu0 %v4658_v27 }
 0x19c   : > { %3162 = vmatpush1.bf16.msra.mxu1 %v4661_v31 }
 0x19d   : > { %3127 = vmatmul.mubr.bf16.vlgmr.msra.gmra.mxu0 %v5500_v30  ;;  %v2763_v30 = vpop.f32.mrf.mxu1 }
 0x19e   : > { %3136 = vmatprep.mubr.bf16.mxu0 %v5506_v33  ;;  %v2764_v48 = vadd.f32 %v2763_v30, %v2710_v34 }
 0x19f   : > { %3180 = vmatmul.mubr.bf16.vlgmr.msra.gmra.mxu1 %v5599_v4  ;;  %v2767_v33 = vpop.f32.mrf.mxu1  ;;  %v2720_v4 = vpop.f32.mrf.mxu0 }
 0x1a0   : > { %3189 = vmatprep.mubr.bf16.mxu1 %v4908_v14  ;;  %v2768_v12 = vadd.f32 %v2767_v33, %v2714_v36  ;;  %v810_v36 = vld [vmem:[%s5014_s20 + $0x20] sm:$0xff] }
 0x1a1   : > { %v2769_v59 = vpop.f32.mrf.mxu1 }
 0x1a2   : > { %v2770_v7 = vadd.f32 %v2769_v59, %v2716_v39  ;;  %v823_v59 = vunpack.c.h.bf16 %v810_v36 }
 0x1a3   : > { %v2771_v41 = vpop.f32.mrf.mxu1 }
 0x1a4   : > { %v2772_v30 = vadd.f32 %v2771_v41, %v5999_v40  ;;  %v812_v41 = vld [vmem:[%s5014_s20 + $0x30] sm:$0xff] }
 0x1a5   : > { %3137 = vmatmul.mubr.bf16.gmra.mxu0 %v5531_v44  ;;  %v2773_v23 = vpop.f32.mrf.mxu1 }
 0x1a6   : > { %v2774_v34 = vadd.f32 %v2773_v23, %v2720_v4  ;;  %v822_v4 = vunpack.c.l.bf16 %v810_v36 }
 0x1a7   : > { %3190 = vmatmul.mubr.bf16.gmra.mxu1 %v5627_v15 }
 0x1bc   : > { %v2810_v14 = vpop.f32.mrf.mxu0 }
 0x1bd   : > { %v2811_v1 = vadd.f32 %v2810_v14, %v2758_v62 }
 0x1be   : > { %v2812_v44 = vpop.f32.mrf.mxu0 }
 0x1bf   : > { %v2863_v43 = vpop.f32.mrf.mxu1  ;;  %v2813_v63 = vadd.f32 %v2812_v44, %v2760_v60  ;;  %v827_v60 = vunpack.c.h.bf16 %v812_v41 }
 0x1c0   : > { %v2814_v15 = vpop.f32.mrf.mxu0  ;;  %v2864_v38 = vadd.f32 %v2863_v43, %v2811_v1  ;;  %v826_v1 = vunpack.c.l.bf16 %v812_v41 }
 0x1c1   : > { %v2865_v46 = vpop.f32.mrf.mxu1  ;;  %v2815_v8 = vadd.f32 %v2814_v15, %v2762_v26 }
 0x1c2   : > { %v2816_v45 = vpop.f32.mrf.mxu0  ;;  %v2866_v9 = vadd.f32 %v2865_v46, %v2813_v63 }
 0x1c3   : > { %v2867_v49 = vpop.f32.mrf.mxu1  ;;  %v2817_v2 = vadd.f32 %v2816_v45, %v2764_v48 }
 0x1c4   : > { %v2820_v47 = vpop.f32.mrf.mxu0  ;;  %v2868_v27 = vadd.f32 %v2867_v49, %v2815_v8 }
 0x1c5   : > { %v2869_v51 = vpop.f32.mrf.mxu1  ;;  %v2821_v20 = vadd.f32 %v2820_v47, %v2768_v12 }
 0x1c6   : > { %v2822_v50 = vpop.f32.mrf.mxu0  ;;  %v2870_v13 = vadd.f32 %v2869_v51, %v2817_v2 }
 0x1c7   : > { %v2873_v52 = vpop.f32.mrf.mxu1  ;;  %v2823_v16 = vadd.f32 %v2822_v50, %v2770_v7 }
 0x1c8   : > { %v2824_v22 = vpop.f32.mrf.mxu0  ;;  %v2874_v33 = vadd.f32 %v2873_v52, %v2821_v20 }
 0x1c9   : > { %v2875_v54 = vpop.f32.mrf.mxu1  ;;  %v2825_v49 = vadd.f32 %v2824_v22, %v2772_v30 }
 0x1ca   : > { %v2826_v53 = vpop.f32.mrf.mxu0  ;;  %v2876_v35 = vadd.f32 %v2875_v54, %v2823_v16 }
 0x1cb   : > { %v6001_v56 = vpop.f32.mrf.mxu1  ;;  %v2827_v44 = vadd.f32 %v2826_v53, %v2774_v34 }
 0x1cc   : > { %v2878_v62 = vadd.f32 %v6001_v56, %v2825_v49 }
 0x1cd   : > { %v2879_v42 = vpop.f32.mrf.mxu1 }
 0x1ce   : > { %v2880_v54 = vadd.f32 %v2879_v42, %v2827_v44 }
 0x1dd   : > { %v2916_v55 = vpop.f32.mrf.mxu0 }
 0x1de   : > { %v2917_v18 = vadd.f32 %v2916_v55, %v2864_v38 }
 0x1df   : > { %v2918_v21 = vpop.f32.mrf.mxu0 }
 0x1e0   : > { %v2919_v10 = vadd.f32 %v2918_v21, %v2866_v9  ;;  %v3200_v37 = vadd.f32 %v2917_v18, %v814_v17 }
 0x1e1   : > { %v2920_v57 = vpop.f32.mrf.mxu0 }
 0x1e2   : > { %v3201_v31 = vadd.f32 %v2919_v10, %v815_v5  ;;  %v2921_v39 = vadd.f32 %v2920_v57, %v2868_v27 }
 0x1e3   : > { %v2922_v0 = vpop.f32.mrf.mxu0 }
 0x1e4   : > { %v2923_v29 = vadd.f32 %v2922_v0, %v2870_v13  ;;  %v3232_v15 = vcombine.low %v3200_v37, %v3201_v31  ;;  %v3233_v47 = vcombine.high %v3200_v37, %v3201_v31  ;;  %v3204_v50 = vadd.f32 %v2921_v39, %v818_v58 }
 0x1e5   : > { %v2926_v6 = vpop.f32.mrf.mxu0 }
 0x1e6   : > { %v3205_v43 = vadd.f32 %v2923_v29, %v819_v28  ;;  %v2927_v23 = vadd.f32 %v2926_v6, %v2874_v33  ;;  %v3312_v55 = vrot.slane %v3232_v15, 4  ;;  %v3313_v57 = vrot.slane %v3233_v47, 4 }
 0x1e7   : > { %v2928_v25 = vpop.f32.mrf.mxu0  ;;  %v4040_v63 = vmul.f32 -1.442695, %v3232_v15  ;;  %v4041_v22 = vmul.f32 -1.442695, %v3233_v47 }
 0x1e8   : > { %v2929_v45 = vadd.f32 %v2928_v25, %v2876_v35  ;;  %v3236_v21 = vcombine.low %v3204_v50, %v3205_v43  ;;  %v3237_v53 = vcombine.high %v3204_v50, %v3205_v43  ;;  %v3208_v0 = vadd.f32 %v2927_v23, %v822_v4 }
 0x1e9   : > { %v2930_v14 = vpop.f32.mrf.mxu0  ;;  %v4048_v26 = vmul.f32 -1.442695, %v3312_v55  ;;  %v4049_v5 = vmul.f32 -1.442695, %v3313_v57  ;;  %4664 = vpow2.f32 %v4040_v63 }
 0x1ea   : > { %v3209_v40 = vadd.f32 %v2929_v45, %v823_v59  ;;  %v3314_v9 = vrot.slane %v3236_v21, 4  ;;  %v2931_v42 = vadd.f32 %v2930_v14, %v2878_v62  ;;  %v3315_v6 = vrot.slane %v3237_v53, 4 }
 0x1eb   : > { %v2932_v51 = vpop.f32.mrf.mxu0  ;;  %v4042_v38 = vmul.f32 -1.442695, %v3236_v21  ;;  %4666 = vpow2.f32 %v4041_v22  ;;  %v4043_v10 = vmul.f32 -1.442695, %v3237_v53 }
 0x1ec   : > { %v2933_v48 = vadd.f32 %v2932_v51, %v2880_v54  ;;  %v3240_v2 = vcombine.low %v3208_v0, %v3209_v40  ;;  %v3241_v7 = vcombine.high %v3208_v0, %v3209_v40  ;;  %4668 = vpow2.f32 %v4048_v26 }
 0x1ed   : > { %v4050_v56 = vmul.f32 -1.442695, %v3314_v9  ;;  %v3212_v13 = vadd.f32 %v2931_v42, %v826_v1  ;;  %4670 = vpow2.f32 %v4049_v5  ;;  %v4051_v18 = vmul.f32 -1.442695, %v3315_v6 }
 0x1ee   : > { %v3213_v8 = vadd.f32 %v2933_v48, %v827_v60  ;;  %v3316_v12 = vrot.slane %v3240_v2, 4  ;;  %v3317_v19 = vrot.slane %v3241_v7, 4  ;;  %4672 = vpow2.f32 %v4042_v38 }
 0x1ef   : > { %v4044_v20 = vmul.f32 -1.442695, %v3240_v2  ;;  %4674 = vpow2.f32 %v4043_v10  ;;  %v4045_v31 = vmul.f32 -1.442695, %v3241_v7 }
 0x1f0   : > { %v3244_v25 = vcombine.low %v3212_v13, %v3213_v8  ;;  %v3245_v28 = vcombine.high %v3212_v13, %v3213_v8  ;;  %4676 = vpow2.f32 %v4050_v56  ;;  %v4052_v29 = vmul.f32 -1.442695, %v3316_v12 }
 0x1f1   : > { %4678 = vpow2.f32 %v4051_v18  ;;  %v4053_v34 = vmul.f32 -1.442695, %v3317_v19 }
 0x1f2   : > { %4680 = vpow2.f32 %v4044_v20  ;;  %v4046_v35 = vmul.f32 -1.442695, %v3244_v25  ;;  %v3318_v37 = vrot.slane %v3244_v25, 4  ;;  %v3319_v36 = vrot.slane %v3245_v28, 4 }
 0x1f3   : > { %4682 = vpow2.f32 %v4045_v31  ;;  %v4047_v30 = vmul.f32 -1.442695, %v3245_v28 }
 0x1f4   : > { %4684 = vpow2.f32 %v4052_v29  ;;  %v4054_v59 = vmul.f32 -1.442695, %v3318_v37  ;;  %v4055_v15 = vmul.f32 -1.442695, %v3319_v36  ;;  %v807_v29 = vld [vmem:[%s5014_s20 + $0x8] sm:$0xff] }
 0x1f5   : > { %4686 = vpow2.f32 %v4053_v34 }
 0x1f6   : > { %4688 = vpow2.f32 %v4046_v35  ;;  %v4665_v44 = vpop.eup %4664 }
 0x1f7   : > { %4690 = vpow2.f32 %v4047_v30  ;;  %v3288_v50 = vadd.f32 1.0, %v4665_v44 }
 0x1f8   : > { %v4667_v43 = vpop.eup %4666  ;;  %4692 = vpow2.f32 %v4054_v59 }
 0x1f9   : > { %v4669_v47 = vpop.eup %4668  ;;  %v3289_v51 = vadd.f32 1.0, %v4667_v43  ;;  %4694 = vpow2.f32 %v4055_v15  ;;  %v817_v15 = vunpack.c.h.bf16 %v807_v29 }
 0x1fa   : > { %v4671_v49 = vpop.eup %4670  ;;  %v3352_v55 = vadd.f32 1.0, %v4669_v47  ;;  %4696 = vrcp.f32 %v3288_v50 }
 0x1fb   : > { %v4673_v23 = vpop.eup %4672  ;;  %v3353_v41 = vadd.f32 1.0, %v4671_v49  ;;  %4698 = vrcp.f32 %v3289_v51 }
 0x1fc   : > { %v4675_v54 = vpop.eup %4674  ;;  %v3290_v53 = vadd.f32 1.0, %v4673_v23  ;;  %4700 = vrcp.f32 %v3352_v55 }
 0x1fd   : > { %v4677_v40 = vpop.eup %4676  ;;  %v3291_v63 = vadd.f32 1.0, %v4675_v54  ;;  %4702 = vrcp.f32 %v3353_v41 }
 0x1fe   : > { %v4679_v57 = vpop.eup %4678  ;;  %v3354_v48 = vadd.f32 1.0, %v4677_v40  ;;  %4704 = vrcp.f32 %v3290_v53 }
 0x1ff   : > { %v6003_v61 = vpop.f32.mrf.mxu1  ;;  %v4681_v62 = vpop.eup %4680  ;;  %v3355_v26 = vadd.f32 1.0, %v4679_v57  ;;  %4706 = vrcp.f32 %v3291_v63 }
 0x200   : > { %v4683_v0 = vpop.eup %4682  ;;  %v3292_v2 = vadd.f32 1.0, %v4681_v62  ;;  %4708 = vrcp.f32 %v3354_v48 }
 0x201   : > { %v6005_v24 = vpop.f32.mrf.mxu1  ;;  %v4685_v1 = vpop.eup %4684  ;;  %v3293_v6 = vadd.f32 1.0, %v4683_v0  ;;  %4710 = vrcp.f32 %v3355_v26 }
 0x202   : > { %v4687_v9 = vpop.eup %4686  ;;  %v3356_v7 = vadd.f32 1.0, %v4685_v1  ;;  %4712 = vrcp.f32 %v3292_v2 }
 0x203   : > { %v6008_v11 = vpop.f32.mrf.mxu1  ;;  %v4689_v5 = vpop.eup %4688  ;;  %v3357_v10 = vadd.f32 1.0, %v4687_v9  ;;  %4714 = vrcp.f32 %v3293_v6 }
 0x204   : > { %v4691_v8 = vpop.eup %4690  ;;  %v3294_v56 = vadd.f32 1.0, %v4689_v5  ;;  %4716 = vrcp.f32 %v3356_v7 }
 0x205   : > { %v6011_v32 = vpop.f32.mrf.mxu1  ;;  %v4693_v13 = vpop.eup %4692  ;;  %v3295_v20 = vadd.f32 1.0, %v4691_v8  ;;  %4718 = vrcp.f32 %v3357_v10 }
 0x206   : > { %v4695_v19 = vpop.eup %4694  ;;  %4720 = vrcp.f32 %v3294_v56  ;;  %v3358_v34 = vadd.f32 1.0, %v4693_v13 }
 0x207   : > { %v6015_v46 = vpop.f32.mrf.mxu1  ;;  %v6061_v36 = vpop.eup %4696  ;;  %4722 = vrcp.f32 %v3295_v20 }
 0x208   : > { %4724 = vrcp.f32 %v3358_v34 }
 0x209   : > { %v6018_v52 = vpop.f32.mrf.mxu1 }
 0x20b   : > { %v6021_v3 = vpop.f32.mrf.mxu1 }
 0x20d   : > { %v6023_v16 = vpop.f32.mrf.mxu1 }
 0x21d   : > { %v6025_v17 = vpop.f32.mrf.mxu0 }
 0x21e   : > { %v3023_v18 = vadd.f32 %v6025_v17, %v6003_v61  ;;  %v3359_v61 = vadd.f32 1.0, %v4695_v19 }
 0x21f   : > { %v6029_v58 = vpop.f32.mrf.mxu0 }
 0x220   : > { %v3025_v31 = vadd.f32 %v6029_v58, %v6005_v24  ;;  %v6066_v24 = vpop.eup %4698  ;;  %4726 = vrcp.f32 %v3359_v61 }
 0x221   : > { %v6033_v33 = vpop.f32.mrf.mxu0  ;;  %v6068_v43 = vpop.eup %4700 }
 0x222   : > { %v3027_v17 = vadd.f32 %v6033_v33, %v6008_v11  ;;  %v809_v11 = vld [vmem:[%s5014_s20 + $0x18] sm:$0xff]  ;;  %v6075_v33 = vld [vmem:[%s5014_s20 + $0x28] sm:$0xff] }
 0x223   : > { %v6037_v45 = vpop.f32.mrf.mxu0  ;;  %v821_v63 = vunpack.c.h.bf16 %v809_v11  ;;  %v824_v0 = vunpack.c.l.bf16 %v6075_v33  ;;  %v825_v8 = vunpack.c.h.bf16 %v6075_v33 }
 0x224   : > { %v3029_v47 = vadd.f32 %v6037_v45, %v6011_v32  ;;  %v820_v45 = vunpack.c.l.bf16 %v809_v11 }
 0x225   : > { %v6041_v21 = vpop.f32.mrf.mxu0 }
 0x227   : > { %v6045_v22 = vpop.f32.mrf.mxu0 }
 0x228   : > { %v3035_v5 = vadd.f32 %v6045_v22, %v6018_v52 }
 0x229   : > { %v6049_v38 = vpop.f32.mrf.mxu0 }
 0x22b   : > { %v3038_v25 = vpop.f32.mrf.mxu0 }
 0x22c   : > { %v3039_v56 = vadd.f32 %v3038_v25, %v6023_v16  ;;  %v813_v25 = vld [vmem:[%s5014_s20 + $0x38] sm:$0xff] }
 0x22d   : > { %v829_v33 = vunpack.c.h.bf16 %v813_v25 }
 0x23f   : > { %v6027_v27 = vpop.f32.mrf.mxu1 }
 0x240   : > { %v3076_v28 = vadd.f32 %v6027_v27, %v3023_v18  ;;  %v816_v27 = vunpack.c.l.bf16 %v807_v29 }
 0x241   : > { %v6031_v39 = vpop.f32.mrf.mxu1 }
 0x242   : > { %v3078_v30 = vadd.f32 %v6031_v39, %v3025_v31  ;;  %v6077_v39 = vpop.eup %4702 }
 0x243   : > { %v6035_v14 = vpop.f32.mrf.mxu1  ;;  %v6079_v55 = vpop.eup %4704 }
 0x244   : > { %v3080_v49 = vadd.f32 %v6035_v14, %v3027_v17  ;;  %v6082_v32 = vpop.eup %4706  ;;  %v3033_v14 = vadd.f32 %v6041_v21, %v6015_v46  ;;  %v3037_v46 = vadd.f32 %v6049_v38, %v6021_v3 }
 0x245   : > { %v6039_v4 = vpop.f32.mrf.mxu1  ;;  %v6087_v48 = vpop.eup %4708 }
 0x246   : > { %v3082_v40 = vadd.f32 %v6039_v4, %v3029_v47  ;;  %v6089_v4 = vpop.eup %4710 }
 0x247   : > { %v6043_v60 = vpop.f32.mrf.mxu1  ;;  %v6097_v10 = vpop.eup %4712 }
 0x248   : > { %v3086_v21 = vadd.f32 %v6043_v60, %v3033_v14  ;;  %v6100_v20 = vpop.eup %4714 }
 0x249   : > { %v6047_v42 = vpop.f32.mrf.mxu1 }
 0x24a   : > { %v3088_v52 = vadd.f32 %v6047_v42, %v3035_v5 }
 0x24b   : > { %v6051_v12 = vpop.f32.mrf.mxu1 }
 0x24c   : > { %v3090_v3 = vadd.f32 %v6051_v12, %v3037_v46 }
 0x24d   : > { %v6059_v35 = vpop.f32.mrf.mxu1 }
 0x24e   : > { %v3092_v61 = vadd.f32 %v6059_v35, %v3039_v56 }
 0x25d   : > { %v3128_v37 = vpop.f32.mrf.mxu0 }
 0x25e   : > { %v3129_v59 = vadd.f32 %v3128_v37, %v3076_v28  ;;  %v6104_v28 = vpop.eup %4716 }
 0x25f   : > { %v3181_v58 = vpop.f32.mrf.mxu1  ;;  %v3130_v44 = vpop.f32.mrf.mxu0 }
 0x260   : > { %v3182_v50 = vadd.f32 %v3181_v58, %v3129_v59  ;;  %v3131_v23 = vadd.f32 %v3130_v44, %v3078_v30  ;;  %v6107_v37 = vpop.eup %4718 }
 0x261   : > { %v3183_v51 = vpop.f32.mrf.mxu1  ;;  %v3132_v54 = vpop.f32.mrf.mxu0 }
 0x262   : > { %v3184_v41 = vadd.f32 %v3183_v51, %v3131_v23  ;;  %v3133_v57 = vadd.f32 %v3132_v54, %v3080_v49  ;;  %v3202_v1 = vadd.f32 %v3182_v50, %v816_v27  ;;  %v6110_v59 = vpop.eup %4720  ;;  %v828_v50 = vunpack.c.l.bf16 %v813_v25 }
 0x263   : > { %v3185_v53 = vpop.f32.mrf.mxu1  ;;  %v3134_v62 = vpop.f32.mrf.mxu0 }
 0x264   : > { %v3203_v26 = vadd.f32 %v3184_v41, %v817_v15  ;;  %v3186_v9 = vadd.f32 %v3185_v53, %v3133_v57  ;;  %v3135_v2 = vadd.f32 %v3134_v62, %v3082_v40  ;;  %v6112_v51 = vpop.eup %4722 }
 0x265   : > { %v3187_v6 = vpop.f32.mrf.mxu1  ;;  %v3138_v7 = vpop.f32.mrf.mxu0 }
 0x266   : > { %v3234_v13 = vcombine.low %v3202_v1, %v3203_v26  ;;  %v3235_v18 = vcombine.high %v3202_v1, %v3203_v26  ;;  %v3188_v19 = vadd.f32 %v3187_v6, %v3135_v2  ;;  %v3206_v22 = vadd.f32 %v3186_v9, %v820_v45  ;;  %v6114_v53 = vpop.eup %4724 }
 0x267   : > { %v3139_v60 = vadd.f32 %v3138_v7, %v3086_v21  ;;  %v3191_v38 = vpop.f32.mrf.mxu1  ;;  %v3140_v31 = vpop.f32.mrf.mxu0 }
 0x268   : > { %4728 = vtanh.f32 %v3234_v13  ;;  %v3384_v29 = vrot.slane %v3234_v13, 4  ;;  %v3385_v34 = vrot.slane %v3235_v18, 4  ;;  %v3207_v16 = vadd.f32 %v3188_v19, %v821_v63  ;;  %v6116_v26 = vpop.eup %4726  ;;  %v3448_v13 = vld [vmem:[#allocation3] sm:$0xf] }
 0x269   : > { %4730 = vtanh.f32 %v3235_v18  ;;  %v3192_v17 = vadd.f32 %v3191_v38, %v3139_v60  ;;  %v3141_v42 = vadd.f32 %v3140_v31, %v3088_v52  ;;  %v3193_v30 = vpop.f32.mrf.mxu1  ;;  %v3142_v12 = vpop.f32.mrf.mxu0  ;;  %v3449_v60 = vld [vmem:[#allocation3 + $0x4] sm:$0xf] }
 0x26a   : > { %v4056_v27 = vmul.f32 -1.442695, %v3384_v29  ;;  %v4057_v58 = vmul.f32 -1.442695, %v3385_v34  ;;  %v3238_v44 = vcombine.low %v3206_v22, %v3207_v16  ;;  %v3239_v15 = vcombine.high %v3206_v22, %v3207_v16 }
 0x26b   : > { %v3194_v47 = vadd.f32 %v3193_v30, %v3141_v42  ;;  %v3143_v49 = vadd.f32 %v3142_v12, %v3090_v3  ;;  %v3195_v23 = vpop.f32.mrf.mxu1  ;;  %v3144_v11 = vpop.f32.mrf.mxu0  ;;  %v3210_v41 = vadd.f32 %v3192_v17, %v824_v0  ;;  %v3456_v3 = vmul.f32 %v6068_v43, %v3448_v13  ;;  %v3451_v12 = vld [vmem:[#allocation3 + $0xc] sm:$0xf] }
 0x26c   : > { %4732 = vpow2.f32 %v4056_v27  ;;  %v3386_v35 = vrot.slane %v3238_v44, 4  ;;  %v3387_v54 = vrot.slane %v3239_v15, 4  ;;  %v3145_v40 = vadd.f32 %v3144_v11, %v3092_v61 }
 0x26d   : > { %4734 = vpow2.f32 %v4057_v58  ;;  %v3211_v57 = vadd.f32 %v3194_v47, %v825_v8  ;;  %v3196_v14 = vadd.f32 %v3195_v23, %v3143_v49  ;;  %v3197_v45 = vpop.f32.mrf.mxu1  ;;  %v3457_v34 = vmul.f32 %v6077_v39, %v3449_v60 }
 0x26e   : > { %4736 = vtanh.f32 %v3238_v44  ;;  %v4058_v62 = vmul.f32 -1.442695, %v3386_v35  ;;  %v4059_v63 = vmul.f32 -1.442695, %v3387_v54  ;;  %v3198_v1 = vadd.f32 %v3197_v45, %v3145_v40  ;;  %v3452_v54 = vld [vmem:[#allocation3 + $0x10] sm:$0xf] }
 0x26f   : > { %4738 = vtanh.f32 %v3239_v15  ;;  %v3242_v9 = vcombine.low %v3210_v41, %v3211_v57  ;;  %v3243_v2 = vcombine.high %v3210_v41, %v3211_v57  ;;  %v3214_v5 = vadd.f32 %v3196_v14, %v828_v50  ;;  %v3454_v14 = vld [vmem:[#allocation3 + $0x18] sm:$0xf] }
 0x270   : > { %4740 = vpow2.f32 %v4058_v62  ;;  %v3215_v46 = vadd.f32 %v3198_v1, %v829_v33  ;;  %v3459_v15 = vmul.f32 %v6089_v4, %v3451_v12 }
 0x271   : > { %4742 = vpow2.f32 %v4059_v63  ;;  %v3388_v21 = vrot.slane %v3242_v9, 4  ;;  %v3389_v0 = vrot.slane %v3243_v2, 4  ;;  %v3462_v63 = vmul.f32 %v6114_v53, %v3454_v14 }
 0x272   : > { %4744 = vtanh.f32 %v3242_v9  ;;  %v3246_v6 = vcombine.low %v3214_v5, %v3215_v46  ;;  %v3247_v7 = vcombine.high %v3214_v5, %v3215_v46 }
 0x273   : > { %4746 = vtanh.f32 %v3243_v2  ;;  %v4060_v8 = vmul.f32 -1.442695, %v3388_v21  ;;  %v4061_v56 = vmul.f32 -1.442695, %v3389_v0 }
 0x274   : > { %4748 = vtanh.f32 %v3246_v6  ;;  %v3390_v18 = vrot.slane %v3246_v6, 4  ;;  %v3391_v19 = vrot.slane %v3247_v7, 4 }
 0x275   : > { %v4729_v52 = vpop.eup %4728  ;;  %4750 = vpow2.f32 %v4060_v8 }
 0x276   : > { %v4731_v22 = vpop.eup %4730  ;;  %v3464_v38 = vmul.f32 %v4729_v52, %v6061_v36  ;;  %4752 = vpow2.f32 %v4061_v56  ;;  %v4062_v31 = vmul.f32 -1.442695, %v3390_v18  ;;  %v4063_v29 = vmul.f32 -1.442695, %v3391_v19 }
 0x277   : > { %v3465_v16 = vmul.f32 %v4731_v22, %v6066_v24  ;;  %4754 = vtanh.f32 %v3247_v7  ;;  %v3450_v24 = vld [vmem:[#allocation3 + $0x8] sm:$0xf] }
 0x278   : > { %v6122_v25 = vadd.f32 %v3464_v38, %v3456_v3  ;;  %4756 = vpow2.f32 %v4062_v31  ;;  %v3458_v27 = vmul.f32 %v6087_v48, %v3450_v24  ;;  %v3460_v48 = vmul.f32 %v6104_v28, %v3452_v54 }
 0x279   : > { %v4733_v61 = vpop.eup %4732  ;;  %v6124_v17 = vadd.f32 %v3465_v16, %v3457_v34  ;;  %4758 = vpow2.f32 %v4063_v29 }
 0x27a   : > { %v4735_v43 = vpop.eup %4734  ;;  %v3424_v42 = vadd.f32 1.0, %v4733_v61  ;;  %4760 = vtanh.f32 %v6122_v25  ;;  %3496 = vst [vmem:[#allocation3] sm:$0xf] %v6122_v25 }
 0x27b   : > { %v4737_v36 = vpop.eup %4736  ;;  %v3425_v30 = vadd.f32 1.0, %v4735_v43  ;;  %4762 = vtanh.f32 %v6124_v17  ;;  %3497 = vst [vmem:[#allocation3 + $0x4] sm:$0xf] %v6124_v17 }
 0x27c   : > { %v4739_v39 = vpop.eup %4738  ;;  %4764 = vrcp.f32 %v3424_v42  ;;  %v3466_v58 = vmul.f32 %v4737_v36, %v6079_v55  ;;  %v3453_v55 = vld [vmem:[#allocation3 + $0x14] sm:$0xf] }
 0x27d   : > { %v4741_v44 = vpop.eup %4740  ;;  %4766 = vrcp.f32 %v3425_v30  ;;  %v3467_v47 = vmul.f32 %v4739_v39, %v6082_v32  ;;  %v3461_v32 = vmul.f32 %v6107_v37, %v3453_v55 }
 0x27e   : > { %v4743_v49 = vpop.eup %4742  ;;  %v3426_v50 = vadd.f32 1.0, %v4741_v44  ;;  %v6134_v23 = vadd.f32 %v3466_v58, %v3458_v27 }
 0x27f   : > { %v4745_v11 = vpop.eup %4744  ;;  %v3427_v33 = vadd.f32 1.0, %v4743_v49  ;;  %v6136_v35 = vadd.f32 %v3467_v47, %v3459_v15 }
 0x280   : > { %v4747_v40 = vpop.eup %4746  ;;  %4768 = vrcp.f32 %v3426_v50  ;;  %3498 = vst [vmem:[#allocation3 + $0x8] sm:$0xf] %v6134_v23  ;;  %v3468_v4 = vmul.f32 %v4745_v11, %v6097_v10 }
 0x281   : > { %v4749_v41 = vpop.eup %4748  ;;  %4770 = vrcp.f32 %v3427_v33  ;;  %3499 = vst [vmem:[#allocation3 + $0xc] sm:$0xf] %v6136_v35  ;;  %v3469_v57 = vmul.f32 %v4747_v40, %v6100_v20  ;;  %v3455_v20 = vld [vmem:[#allocation3 + $0x1c] sm:$0xf] }
 0x282   : > { %v4751_v45 = vpop.eup %4750  ;;  %4772 = vtanh.f32 %v6134_v23  ;;  %v6145_v62 = vadd.f32 %v3468_v4, %v3460_v48  ;;  %v3470_v28 = vmul.f32 %v4749_v41, %v6110_v59  ;;  %v3463_v59 = vmul.f32 %v6116_v26, %v3455_v20 }
 0x283   : > { %v4753_v1 = vpop.eup %4752  ;;  %4774 = vtanh.f32 %v6136_v35  ;;  %v3428_v10 = vadd.f32 1.0, %v4751_v45  ;;  %v6150_v9 = vadd.f32 %v3469_v57, %v3461_v32 }
 0x284   : > { %v4755_v2 = vpop.eup %4754  ;;  %v3429_v37 = vadd.f32 1.0, %v4753_v1  ;;  %4776 = vtanh.f32 %v6145_v62  ;;  %3500 = vst [vmem:[#allocation3 + $0x10] sm:$0xf] %v6145_v62  ;;  %v6154_v5 = vadd.f32 %v3470_v28, %v3462_v63 }
 0x285   : > { %v4757_v46 = vpop.eup %4756  ;;  %4778 = vrcp.f32 %v3428_v10  ;;  %3501 = vst [vmem:[#allocation3 + $0x14] sm:$0xf] %v6150_v9  ;;  %v3471_v53 = vmul.f32 %v4755_v2, %v6112_v51 }
 0x286   : > { %v4759_v21 = vpop.eup %4758  ;;  %4780 = vrcp.f32 %v3429_v37  ;;  %v3430_v0 = vadd.f32 1.0, %v4757_v46  ;;  %3502 = vst [vmem:[#allocation3 + $0x18] sm:$0xf] %v6154_v5 }
 0x287   : > { %v4761_v6 = vpop.eup %4760  ;;  %4782 = vtanh.f32 %v6150_v9  ;;  %v3431_v7 = vadd.f32 1.0, %v4759_v21  ;;  %v3479_v8 = vadd.f32 %v3471_v53, %v3463_v59 }
 0x288   : > { %v4763_v56 = vpop.eup %4762  ;;  %4784 = vrcp.f32 %v3430_v0 }
 0x289   : > { %v4765_v13 = vpop.eup %4764  ;;  %4786 = vrcp.f32 %v3431_v7  ;;  %3503 = vst [vmem:[#allocation3 + $0x1c] sm:$0xf] %v3479_v8 }
 0x28a   : > { %v4767_v18 = vpop.eup %4766  ;;  %v3488_v26 = vmul.f32 %v4765_v13, %v4761_v6  ;;  %4788 = vtanh.f32 %v6154_v5 }
 0x28b   : > { %v3489_v51 = vmul.f32 %v4767_v18, %v4763_v56  ;;  %4790 = vtanh.f32 %v3479_v8 }
 0x28c   : > { %3504 = vst [vmem:[#allocation2 + $0x9] sm:$0xf] %v3488_v26 }
 0x28d   : > { %v4769_v19 = vpop.eup %4768  ;;  %3505 = vst [vmem:[#allocation2 + $0x11] sm:$0xf] %v3489_v51  ;;  %v3520_v52 = vcombine.low %v3488_v26, %v3489_v51 }
 0x28e   : > { %v4771_v3 = vpop.eup %4770 }
 0x28f   : > { %v4773_v22 = vpop.eup %4772  ;;  %3528 = vst [vmem:[%s5021_s29] sm:$0xff] %v3520_v52 }
 0x290   : > { %v4775_v60 = vpop.eup %4774  ;;  %v3490_v38 = vmul.f32 %v4773_v22, %v4769_v19 }
 0x291   : > { %v4777_v31 = vpop.eup %4776  ;;  %v3491_v29 = vmul.f32 %v4775_v60, %v4771_v3 }
 0x292   : > { %v4779_v34 = vpop.eup %4778  ;;  %3506 = vst [vmem:[#allocation2 + $0x19] sm:$0xf] %v3490_v38 }
 0x293   : > { %v4781_v16 = vpop.eup %4780  ;;  %3507 = vst [vmem:[#allocation2 + $0x21] sm:$0xf] %v3491_v29  ;;  %v3521_v61 = vcombine.low %v3490_v38, %v3491_v29  ;;  %v3492_v43 = vmul.f32 %v4779_v34, %v4777_v31 }
 0x294   : > { %v4783_v42 = vpop.eup %4782 }
 0x295   : > { %v4785_v36 = vpop.eup %4784  ;;  %3529 = vst [vmem:[%s5021_s29 + $0x8] sm:$0xff] %v3521_v61  ;;  %v3493_v30 = vmul.f32 %v4783_v42, %v4781_v16  ;;  %3508 = vst [vmem:[#allocation2 + $0x39] sm:$0xf] %v3492_v43 }
 0x296   : > { %v4787_v24 = vpop.eup %4786 }
 0x297   : > { %v4789_v39 = vpop.eup %4788  ;;  %3509 = vst [vmem:[#allocation2 + $0x41] sm:$0xf] %v3493_v30  ;;  %v3522_v12 = vcombine.low %v3492_v43, %v3493_v30 }
 0x298   : > { %v4791_v27 = vpop.eup %4790  ;;  %v3494_v58 = vmul.f32 %v4789_v39, %v4785_v36 }
 0x299   : > { %3530 = vst [vmem:[%s5021_s29 + $0x10] sm:$0xff] %v3522_v12  ;;  %v3495_v44 = vmul.f32 %v4791_v27, %v4787_v24  ;;  %3535 = sbr.rel (%p4064_p12) target bundleno = 678 (0x2a6), region = 48 }
 0x29a   : > { %3510 = vst [vmem:[#allocation2 + $0x49] sm:$0xf] %v3494_v58 }
 0x29b   : > { %3511 = vst [vmem:[#allocation2 + $0x51] sm:$0xf] %v3495_v44  ;;  %v3523_v15 = vcombine.low %v3494_v58, %v3495_v44 }
 0x29d   : > { %3531 = vst [vmem:[%s5021_s29 + $0x18] sm:$0xff] %v3523_v15 }
 0x29e   : > { %3536 = vst [vmem:[#allocation7] sm:$0xf] %v3488_v26  ;;  %3537 = vst [vmem:[#allocation7 + $0x4] sm:$0xf] %v3489_v51 }
 0x29f   : > { %3538 = vst [vmem:[#allocation7 + $0x8] sm:$0xf] %v3490_v38  ;;  %3539 = vst [vmem:[#allocation7 + $0xc] sm:$0xf] %v3491_v29 }
 0x2a0   : > { %3540 = vst [vmem:[#allocation7 + $0x10] sm:$0xf] %v3492_v43  ;;  %3541 = vst [vmem:[#allocation7 + $0x14] sm:$0xf] %v3493_v30 }
 0x2a1   : > { %3542 = vst [vmem:[#allocation7 + $0x18] sm:$0xf] %v3494_v58  ;;  %3543 = vst [vmem:[#allocation7 + $0x1c] sm:$0xf] %v3495_v44 }
 0x2a2   : > { %3544 = vst [vmem:[#allocation9] sm:$0xf] %v6122_v25  ;;  %3545 = vst [vmem:[#allocation9 + $0x4] sm:$0xf] %v6124_v17 }
 0x2a3   : > { %3546 = vst [vmem:[#allocation9 + $0x8] sm:$0xf] %v6134_v23  ;;  %3547 = vst [vmem:[#allocation9 + $0xc] sm:$0xf] %v6136_v35 }
 0x2a4   : > { %3548 = vst [vmem:[#allocation9 + $0x10] sm:$0xf] %v6145_v62  ;;  %3549 = vst [vmem:[#allocation9 + $0x14] sm:$0xf] %v6150_v9 }
 0x2a5   : > { %3550 = vst [vmem:[#allocation9 + $0x18] sm:$0xf] %v6154_v5  ;;  %3551 = vst [vmem:[#allocation9 + $0x1c] sm:$0xf] %v3479_v8 }
 0x2a6 PF: > { %s4909_s20 = smov [#allocation7]  }
 0x2a7   : > { %s3579_s9 = sshll.u32 %s4909_s20, 4  ;;  %s3580_s9 = int_to_ptr.vmem [resolvable:$true] %s3579_s9 }
 0x2a8   : > { %s4793_s15 = scalar_lea.vmem %s3580_s9, 512  ;;  %p4800_p3 = scmp.lt.s32.totalorder %s3580_s9, %s3580_s9 }
 0x2a9   : > { %p4794_p13 = scmp.ne.s32.totalorder %s3580_s9, %s4793_s15  ;;  %p4801_p4 = scmp.lt.s32.totalorder %s4793_s15, %s4793_s15 }
 0x2ab   : > { %p4795_p0 = pnand %p4794_p13, %p155_p2  ;;  %p4802_p7 = por %p4801_p4, %p4800_p3 }
 0x2ad   : > { %p4796_p1 = pneg %p4795_p0 }
 0x2af   : > { %p4803_p8 = pnand %p4802_p7, %p4796_p1 }
 0x2b1   : > { %4806 = shalt.err (!%p4803_p8)
}
 0x2b2   : > { %s4910_s16 = smov 64   ;;  %s4911_s18 = smov 4  }
 0x2b3   : > { %4114 = dma.vmem_to_hbm [thread:$0]  (%p155_p2), %s3580_s9, 512, %s6255_s6, [#allocation8], %s4910_s16, %s4910_s16, %s4911_s18  }
 0x2b4   : > { %s4111_s17 = sshll.u32 %s4977_s28, 9  ;;  %s3566_s19 = sshll.u32 %s5021_s29, 4  ;;  %s6191_s19 = int_to_ptr.vmem [resolvable:$true] %s3566_s19 }
 0x2b5   : > { %s6189_s22 = scalar_lea.hbm %s6254_s5, %s4111_s17  ;;  %s6260_s8 = sand.u32 1, %s4897_s25  }
 0x2b6   : > { %s6195_s20 = scalar_lea.sflag [#allocation6], %s6260_s8  ;;  %s4817_s15 = scalar_lea.vmem %s6191_s19, 512 }
 0x2b7   : > { %p4818_p9 = scmp.ne.s32.totalorder %s6191_s19, %s4817_s15  ;;  %s4912_s9 = smov [#allocation5]  }
 0x2b8   : > { %s4821_s29 = sshll.u32 %s4912_s9, 4  ;;  %s4822_s29 = int_to_ptr.vmem [resolvable:$false] %s4821_s29 }
 0x2b9   : > { %p4819_p10 = pnand %p4818_p9, %p4996_p5  ;;  %s4823_s14 = scalar_lea.vmem %s4822_s29, 1024 }
 0x2ba   : > { %p4824_p12 = scmp.lt.s32.totalorder %s6191_s19, %s4822_s29  ;;  %p4825_p13 = scmp.lt.s32.totalorder %s4823_s14, %s4817_s15 }
 0x2bb   : > { %p4820_p11 = pneg %p4819_p10 }
 0x2bc   : > { %p4826_p0 = por %p4825_p13, %p4824_p12 }
 0x2be   : > { %p4827_p1 = pnand %p4826_p0, %p4820_p11 }
 0x2c0   : > { %4830 = shalt.err (!%p4827_p1)
}
 0x2c1   : > { %s4831_s13 = scalar_lea.hbm %s6189_s22, 512  ;;  %s4835_s21 = scalar_lea.hbm %s6254_s5, 1536 }
 0x2c2   : > { %p4832_p3 = scmp.ne.s32.totalorder %s6189_s22, %s4831_s13  ;;  %p4836_p8 = scmp.lt.s32.totalorder %s6189_s22, %s6254_s5 }
 0x2c3   : > { %p4837_p9 = scmp.lt.s32.totalorder %s4835_s21, %s4831_s13 }
 0x2c4   : > { %p4833_p4 = pnand %p4832_p3, %p4996_p5 }
 0x2c5   : > { %p4838_p10 = por %p4837_p9, %p4836_p8 }
 0x2c6   : > { %p4834_p7 = pneg %p4833_p4 }
 0x2c8   : > { %p4839_p11 = pnand %p4838_p10, %p4834_p7 }
 0x2ca   : > { %4842 = shalt.err (!%p4839_p11)
}
 0x2cb   : > { %s4913_s15 = smov 128   ;;  %s4914_s29 = smov 8  }
 0x2cc   : > { %4112 = dma.vmem_to_hbm [thread:$0]  (%p4996_p5), %s6191_s19, 512, %s6189_s22, %s6195_s20, %s4913_s15, %s4913_s15, %s4914_s29  }
 0x2cd   : > { %s4915_s14 = smov [#allocation9]  }
 0x2ce   : > { %s3592_s17 = sshll.u32 %s4915_s14, 4  ;;  %s3593_s17 = int_to_ptr.vmem [resolvable:$true] %s3592_s17 }
 0x2cf   : > { %s4843_s23 = scalar_lea.vmem %s3593_s17, 512  ;;  %p4850_p1 = scmp.lt.s32.totalorder %s3593_s17, %s3593_s17 }
 0x2d0   : > { %p4844_p12 = scmp.ne.s32.totalorder %s3593_s17, %s4843_s23  ;;  %p4851_p3 = scmp.lt.s32.totalorder %s4843_s23, %s4843_s23 }
 0x2d2   : > { %p4845_p13 = pnand %p4844_p12, %p155_p2  ;;  %p4852_p4 = por %p4851_p3, %p4850_p1 }
 0x2d4   : > { %p4846_p0 = pneg %p4845_p13 }
 0x2d6   : > { %p4853_p7 = pnand %p4852_p4, %p4846_p0 }
 0x2d8   : > { %4856 = shalt.err (!%p4853_p7)
}
 0x2d9   : > { %4116 = dma.vmem_to_hbm [thread:$0]  (%p155_p2), %s3593_s17, 512, %s6256_s7, [#allocation8], %s4910_s16, %s4910_s16, %s4911_s18  }
 0x2da   : > { %4884 = dma.done.wait (%p155_p2), [#allocation8], 1024  }
 0x2db   : > { %4886 = vsyncadd (%p155_p2), [#allocation8], 4294966272 }
 0x2dc PF: > { %p4130_p5 = scmp.ge.s32.totalorder %s4905_s27, 2  ;;  %s3615_s22 = sand.u32 1, %s4893_s24  }
 0x2dd   : > { %s3616_s20 = scalar_lea.sflag [#allocation6], %s3615_s22 }
 0x2de   : > { %p4123_p8 = pnand %p4130_p5, %p5000_p6 }
 0x2e0   : > { %p4124_p9 = pneg %p4123_p8 }
 0x2e2   : > { %4888 = dma.done.wait (%p4124_p9), %s3616_s20, 512  }
 0x2e3   : > { %4890 = vsyncadd (%p4124_p9), %s3616_s20, 4294966784  ;;  %p19_p10 = scmp.ge.s32.totalorder %s4981_s30, 5   ;;  %s6261_s24 = smov %s4897_s25 }
 0x2e4   : > { %s6262_s25 = smov %s4901_s26  ;;  %s6263_s26 = smov %s4992_s10 }
 0x2e5   : > { %s6264_s27 = smov %s4981_s30  ;;  %21 = sbr.rel (!%p19_p10) target bundleno = 4 (0x4), region = 105 }
 0x2ea   :  { %3621 = vsyncpa [#allocation6], 1 }
 0x2eb   :  { %3623 = vsyncpa [#allocation6 + $0x1], 1 }
 0x2ec   :  { %3624 = vsyncpa [#allocation8], 1 }

</bundles_post_ra>
